<compile_context>
chip_gen: v7x
topology: tpu7x:2x2x1
jax: 0.10.0
libtpu: 0.0.40
codegen_flags: <defaults>
</compile_context>

<pallas_src>
import math
import functools

import jax
import jax.numpy as jnp
from jax.experimental import pallas as pl
from jax.experimental.pallas import tpu as pltpu

# ----------------------------- config (small synthetic) -----------------------------
B = 4          # batch
L = 8          # sequence length (multiple of 8 keeps (Bb,L,H)<->(Bb*L,H) folds layout-trivial)
H = 32         # HIDDEN_SIZE
NH = 4         # MULTI_HEAD
DH = H // NH   # HIDDEN_SIZE_HEAD
FF = 64        # FF_SIZE
LN_EPS = 1e-6
GRID_BLOCKS = 2  # parallel grid axis >= 2 so both v7x TensorCores are used

_HI = jax.lax.Precision.HIGHEST   # exact f32 matmuls (kernel AND reference)


def _layernorm(x, g, b):
    # openvqa LayerNorm: torch.std is unbiased (n-1) and it divides by (std + eps)
    mean = jnp.mean(x, axis=-1, keepdims=True)
    var = jnp.sum((x - mean) ** 2, axis=-1, keepdims=True) / (x.shape[-1] - 1)
    std = jnp.sqrt(var)
    return g * (x - mean) / (std + LN_EPS) + b


def encoder_kernel(mask_ref, y_ref,
                   wqkv_ref, bqkv_ref, wmrg_ref,
                   w1_ref, b1_ref, w2_ref, vecs_ref,
                   out_ref,
                   *, num_heads, head_dim, bb, seq, hidden):
    nhb = bb * num_heads          # combined (batch, head) einsum batch axis
    bl = bb * seq                 # flattened row count for the dense matmuls

    y3 = y_ref[...]                                           # (Bb, L, H)

    # ---- fused per-head QKV projection, batched over (batch, head) ----
    # Replicate activations across heads and weights across the batch rows.
    # All of these touch only major (non-lane/non-sublane) dims: no relayout.
    y_rep = jnp.broadcast_to(y3[:, None], (bb, num_heads, seq, hidden))
    y_rep = y_rep.reshape(nhb, seq, hidden)                   # n = b*NH + h
    w_rep = jnp.concatenate([wqkv_ref[...]] * bb, axis=0)     # (nhb, H, 3*DH)
    b_rep = jnp.concatenate([bqkv_ref[...]] * bb, axis=0)     # (nhb, 1, 3*DH)

    qkv = jnp.einsum('nlh,nhd->nld', y_rep, w_rep, precision=_HI,
                     preferred_element_type=jnp.float32) + b_rep   # (nhb, L, 3*DH)
    q = qkv[..., 0:head_dim]
    k = qkv[..., head_dim:2 * head_dim]
    v = qkv[..., 2 * head_dim:3 * head_dim]

    # ---- attention scores, single masked_fill, softmax ----
    scale = 1.0 / math.sqrt(head_dim)
    scores = jnp.einsum('nqd,nkd->nqk', q, k, precision=_HI,
                        preferred_element_type=jnp.float32) * scale  # (nhb, L, L)

    mask = mask_ref[...].reshape(bb, 1, seq)                         # (Bb, 1, L)
    mask_rep = jnp.broadcast_to(mask[:, None], (bb, num_heads, 1, seq))
    mask_rep = mask_rep.reshape(nhb, 1, seq)
    scores = jnp.where(mask_rep > 0.5, -1e9, scores)                 # masked_fill(mask, -1e9)

    smax = jnp.max(scores, axis=-1, keepdims=True)
    p = jnp.exp(scores - smax)
    denom = jnp.sum(p, axis=-1, keepdims=True)
    att = p / denom                                                  # exact divide (1e-3 check)

    ctx = jnp.einsum('nqk,nkd->nqd', att, v, precision=_HI,
                     preferred_element_type=jnp.float32)             # (nhb, L, DH)

    # ---- merge projection folded per head, summed over heads (no concat) ----
    wm_rep = jnp.concatenate([wmrg_ref[...]] * bb, axis=0)           # (nhb, DH, H)
    partial = jnp.einsum('nqd,nde->nqe', ctx, wm_rep, precision=_HI,
                         preferred_element_type=jnp.float32)         # (nhb, L, H)
    partial = partial.reshape(bb, num_heads, seq, hidden)
    atted = partial[:, 0]
    for h in range(1, num_heads):                                    # static, unrolled
        atted = atted + partial[:, h]                                # (Bb, L, H)
    atted2d = atted.reshape(bl, hidden) + vecs_ref[0:1, :]           # + merge bias

    # ---- residual + LayerNorm 1 (on flattened rows) ----
    y2d = y3.reshape(bl, hidden)
    x1 = _layernorm(y2d + atted2d, vecs_ref[1:2, :], vecs_ref[2:3, :])

    # ---- FFN: Linear -> ReLU -> Linear on (Bb*L, H) rows ----
    h1 = jnp.maximum(
        jnp.dot(x1, w1_ref[...], precision=_HI,
                preferred_element_type=jnp.float32) + b1_ref[...], 0.0)
    ffn = jnp.dot(h1, w2_ref[...], precision=_HI,
                  preferred_element_type=jnp.float32) + vecs_ref[3:4, :]

    # ---- residual + LayerNorm 2 ----
    x2 = _layernorm(x1 + ffn, vecs_ref[4:5, :], vecs_ref[5:6, :])

    out_ref[...] = x2.reshape(bb, seq, hidden).astype(out_ref.dtype)


def pack_params(p):
    """Pack the 16 Linear/LN parameters into 7 arrays (fewer BlockSpec inputs)."""
    def to_heads(w):                               # (H, H) -> (NH, H, DH)
        return w.reshape(H, NH, DH).transpose(1, 0, 2)

    wqkv = jnp.concatenate([to_heads(p["wq"]), to_heads(p["wk"]), to_heads(p["wv"])],
                           axis=-1)                                   # (NH, H, 3*DH)
    bqkv = jnp.concatenate([p["bq"].reshape(NH, 1, DH),
                            p["bk"].reshape(NH, 1, DH),
                            p["bv"].reshape(NH, 1, DH)], axis=-1)     # (NH, 1, 3*DH)
    wmrg = p["wm"].reshape(NH, DH, H)                                 # (NH, DH, H)
    vecs = jnp.concatenate([p["bm"], p["ln1_g"], p["ln1_b"],
                            p["b2"], p["ln2_g"], p["ln2_b"]], axis=0)  # (6, H)
    return wqkv, bqkv, wmrg, p["w1"], p["b1"], p["w2"], vecs


def encoder_forward(y, y_mask, params):
    Bn, Ln, Hn = y.shape
    nb = GRID_BLOCKS if (Bn % GRID_BLOCKS == 0 and Bn >= GRID_BLOCKS) else 1
    bb = Bn // nb

    param_vals = list(pack_params(params))
    kernel = functools.partial(encoder_kernel, num_heads=NH, head_dim=DH,
                               bb=bb, seq=Ln, hidden=Hn)

    def _rep_spec(arr):
        zeros = (0,) * arr.ndim
        return pl.BlockSpec(arr.shape, lambda g, _z=zeros: _z)

    in_specs = ([pl.BlockSpec((bb, 1, 1, Ln), lambda g: (g, 0, 0, 0)),   # mask
                 pl.BlockSpec((bb, Ln, Hn), lambda g: (g, 0, 0))]        # y
                + [_rep_spec(p) for p in param_vals])
    out_spec = pl.BlockSpec((bb, Ln, Hn), lambda g: (g, 0, 0))

    return pl.pallas_call(
        kernel,
        out_shape=jax.ShapeDtypeStruct((Bn, Ln, Hn), jnp.float32),
        grid_spec=pltpu.PrefetchScalarGridSpec(
            num_scalar_prefetch=0,
            grid=(nb,),
            in_specs=in_specs,
            out_specs=out_spec,
        ),
        compiler_params=pltpu.CompilerParams(dimension_semantics=("parallel",)),
    )(y_mask, y, *param_vals)


# ----------------------------- pure-JAX reference -----------------------------
def encoder_reference(y, y_mask, p):
    def ln(x, g, b):
        mean = jnp.mean(x, axis=-1, keepdims=True)
        var = jnp.sum((x - mean) ** 2, axis=-1, keepdims=True) / (x.shape[-1] - 1)
        return g[0] * (x - mean) / (jnp.sqrt(var) + LN_EPS) + b[0]

    def mm(a, b):
        return jnp.dot(a, b, precision=_HI, preferred_element_type=jnp.float32)

    Bn, Ln, Hn = y.shape
    q = mm(y, p["wq"]) + p["bq"][0]
    k = mm(y, p["wk"]) + p["bk"][0]
    v = mm(y, p["wv"]) + p["bv"][0]
    q = q.reshape(Bn, Ln, NH, DH).transpose(0, 2, 1, 3)
    k = k.reshape(Bn, Ln, NH, DH).transpose(0, 2, 1, 3)
    v = v.reshape(Bn, Ln, NH, DH).transpose(0, 2, 1, 3)
    scores = jnp.einsum("bhqd,bhkd->bhqk", q, k, precision=_HI,
                        preferred_element_type=jnp.float32) / math.sqrt(DH)
    scores = jnp.where(y_mask > 0.5, -1e9, scores)
    att = jax.nn.softmax(scores, axis=-1)
    atted = jnp.einsum("bhqk,bhkd->bhqd", att, v, precision=_HI,
                       preferred_element_type=jnp.float32)
    atted = atted.transpose(0, 2, 1, 3).reshape(Bn, Ln, Hn)
    atted = mm(atted, p["wm"]) + p["bm"][0]
    y1 = ln(y + atted, p["ln1_g"], p["ln1_b"])
    ffn = mm(jnp.maximum(mm(y1, p["w1"]) + p["b1"][0], 0.0), p["w2"]) + p["b2"][0]
    return ln(y1 + ffn, p["ln2_g"], p["ln2_b"])


def init_params(key):
    keys = jax.random.split(key, 8)

    def xavier(k, shape):
        fan_in, fan_out = shape
        limit = math.sqrt(6.0 / (fan_in + fan_out))
        return jax.random.uniform(k, shape, jnp.float32, -limit, limit)

    return {
        "wq": xavier(keys[0], (H, H)), "bq": jnp.zeros((1, H), jnp.float32),
        "wk": xavier(keys[1], (H, H)), "bk": jnp.zeros((1, H), jnp.float32),
        "wv": xavier(keys[2], (H, H)), "bv": jnp.zeros((1, H), jnp.float32),
        "wm": xavier(keys[3], (H, H)), "bm": jnp.zeros((1, H), jnp.float32),
        "w1": xavier(keys[4], (H, FF)), "b1": jnp.zeros((1, FF), jnp.float32),
        "w2": xavier(keys[5], (FF, H)), "b2": jnp.zeros((1, H), jnp.float32),
        "ln1_g": jnp.ones((1, H), jnp.float32), "ln1_b": jnp.zeros((1, H), jnp.float32),
        "ln2_g": jnp.ones((1, H), jnp.float32), "ln2_b": jnp.zeros((1, H), jnp.float32),
    }


if __name__ == "__main__":
    key = jax.random.PRNGKey(0)
    k_y, k_p = jax.random.split(key)

    y = jax.random.normal(k_y, (B, L, H), jnp.float32)
    # mask: 1.0 = masked (as produced by make_mask in openvqa)
    mask = jnp.zeros((B, 1, 1, L), jnp.float32)
    mask = mask.at[1, 0, 0, -2:].set(1.0)
    mask = mask.at[3, 0, 0, -3:].set(1.0)

    params = init_params(k_p)

    out = encoder_forward(y, mask, params)
    out = jax.block_until_ready(out)

    ref = encoder_reference(y, mask, params)
    assert out.shape == (B, L, H)
    assert jnp.allclose(out, ref, atol=1e-3, rtol=1e-3), "mismatch vs JAX reference"

    print("KERNEL_OK")
</pallas_src>

<mosaic_0001>
module attributes {stable_mosaic.version = 11 : i64} {
  func.func @encoder_kernel(%arg0: i32, %arg1: memref<2x1x1x8xf32, #tpu.memory_space<vmem>>, %arg2: memref<2x8x32xf32, #tpu.memory_space<vmem>>, %arg3: memref<4x32x24xf32, #tpu.memory_space<vmem>>, %arg4: memref<4x1x24xf32, #tpu.memory_space<vmem>>, %arg5: memref<4x8x32xf32, #tpu.memory_space<vmem>>, %arg6: memref<32x64xf32, #tpu.memory_space<vmem>>, %arg7: memref<1x64xf32, #tpu.memory_space<vmem>>, %arg8: memref<64x32xf32, #tpu.memory_space<vmem>>, %arg9: memref<6x32xf32, #tpu.memory_space<vmem>>, %arg10: memref<2x8x32xf32, #tpu.memory_space<vmem>>) attributes {dimension_semantics = [#tpu.dimension_semantics<parallel>], iteration_bounds = array<i64: 2>, scalar_prefetch = 0 : i64, scratch_operands = 0 : i64, tpu.core_type = #tpu.core_type<tc>, window_params = [{transform_indices = @transform_0, window_bounds = array<i64: 2, 1, 1, 8>}, {transform_indices = @transform_1, window_bounds = array<i64: 2, 8, 32>}, {pipeline_mode = #tpu.pipeline_mode<synchronous>, transform_indices = @transform_2, window_bounds = array<i64: 4, 32, 24>}, {pipeline_mode = #tpu.pipeline_mode<synchronous>, transform_indices = @transform_3, window_bounds = array<i64: 4, 1, 24>}, {pipeline_mode = #tpu.pipeline_mode<synchronous>, transform_indices = @transform_4, window_bounds = array<i64: 4, 8, 32>}, {pipeline_mode = #tpu.pipeline_mode<synchronous>, transform_indices = @transform_5, window_bounds = array<i64: 32, 64>}, {pipeline_mode = #tpu.pipeline_mode<synchronous>, transform_indices = @transform_6, window_bounds = array<i64: 1, 64>}, {pipeline_mode = #tpu.pipeline_mode<synchronous>, transform_indices = @transform_7, window_bounds = array<i64: 64, 32>}, {pipeline_mode = #tpu.pipeline_mode<synchronous>, transform_indices = @transform_8, window_bounds = array<i64: 6, 32>}, {transform_indices = @transform_9, window_bounds = array<i64: 2, 8, 32>}]} {
    %c0 = arith.constant 0 : index
    %c0_0 = arith.constant 0 : index
    %c0_1 = arith.constant 0 : index
    %0 = vector.load %arg2[%c0, %c0_0, %c0_1] : memref<2x8x32xf32, #tpu.memory_space<vmem>>, vector<2x8x32xf32>
    %1 = vector.shape_cast %0 : vector<2x8x32xf32> to vector<2x1x8x32xf32>
    %2 = vector.shape_cast %1 : vector<2x1x8x32xf32> to vector<2x1x8x32xf32>
    %3 = vector.broadcast %2 : vector<2x1x8x32xf32> to vector<2x4x8x32xf32>
    %4 = vector.shape_cast %3 : vector<2x4x8x32xf32> to vector<8x8x32xf32>
    %c0_2 = arith.constant 0 : index
    %c0_3 = arith.constant 0 : index
    %c0_4 = arith.constant 0 : index
    %5 = vector.load %arg3[%c0_2, %c0_3, %c0_4] : memref<4x32x24xf32, #tpu.memory_space<vmem>>, vector<4x32x24xf32>
    %6 = tpu.concatenate %5, %5 in 0 : vector<4x32x24xf32>, vector<4x32x24xf32> -> vector<8x32x24xf32>
    %c0_5 = arith.constant 0 : index
    %c0_6 = arith.constant 0 : index
    %c0_7 = arith.constant 0 : index
    %7 = vector.load %arg4[%c0_5, %c0_6, %c0_7] : memref<4x1x24xf32, #tpu.memory_space<vmem>>, vector<4x1x24xf32>
    %8 = tpu.concatenate %7, %7 in 0 : vector<4x1x24xf32>, vector<4x1x24xf32> -> vector<8x1x24xf32>
    "tpu.trace_start"() <{level = 10 : i32, message = "nlh,nhd->nld"}> : () -> ()
    %cst = arith.constant dense<0.000000e+00> : vector<8x8x24xf32>
    %9 = tpu.matmul %4, %6, %cst {dimension_numbers = #tpu.dot_dimension_numbers<[2], [1], [1], [2], [0, 0, 0, 1, 1, 2], [0], [0]>, precision = #tpu.contract_precision<fp32>} : vector<8x8x32xf32>, vector<8x32x24xf32>, vector<8x8x24xf32> -> vector<8x8x24xf32>
    "tpu.trace_stop"() : () -> ()
    %10 = vector.broadcast %8 : vector<8x1x24xf32> to vector<8x8x24xf32>
    %11 = arith.addf %9, %10 : vector<8x8x24xf32>
    %12 = vector.extract_strided_slice %11 {offsets = [0, 0, 0], sizes = [8, 8, 8], strides = [1, 1, 1]} : vector<8x8x24xf32> to vector<8x8x8xf32>
    %13 = vector.extract_strided_slice %11 {offsets = [0, 0, 8], sizes = [8, 8, 8], strides = [1, 1, 1]} : vector<8x8x24xf32> to vector<8x8x8xf32>
    %14 = vector.extract_strided_slice %11 {offsets = [0, 0, 16], sizes = [8, 8, 8], strides = [1, 1, 1]} : vector<8x8x24xf32> to vector<8x8x8xf32>
    "tpu.trace_start"() <{level = 10 : i32, message = "nqd,nkd->nqk"}> : () -> ()
    %cst_8 = arith.constant dense<0.000000e+00> : vector<8x8x8xf32>
    %15 = tpu.matmul %12, %13, %cst_8 {dimension_numbers = #tpu.dot_dimension_numbers<[2], [2], [1], [1], [0, 0, 0, 1, 1, 1], [0], [0]>, precision = #tpu.contract_precision<fp32>} : vector<8x8x8xf32>, vector<8x8x8xf32>, vector<8x8x8xf32> -> vector<8x8x8xf32>
    "tpu.trace_stop"() : () -> ()
    %cst_9 = arith.constant 0.353553385 : f32
    %16 = vector.broadcast %cst_9 : f32 to vector<8x8x8xf32>
    %17 = arith.mulf %15, %16 : vector<8x8x8xf32>
    %c0_10 = arith.constant 0 : index
    %c0_11 = arith.constant 0 : index
    %c0_12 = arith.constant 0 : index
    %c0_13 = arith.constant 0 : index
    %18 = vector.load %arg1[%c0_10, %c0_11, %c0_12, %c0_13] : memref<2x1x1x8xf32, #tpu.memory_space<vmem>>, vector<2x1x1x8xf32>
    %19 = vector.shape_cast %18 : vector<2x1x1x8xf32> to vector<2x1x8xf32>
    %20 = vector.shape_cast %19 : vector<2x1x8xf32> to vector<2x1x1x8xf32>
    %21 = vector.shape_cast %20 : vector<2x1x1x8xf32> to vector<2x1x1x8xf32>
    %22 = vector.broadcast %21 : vector<2x1x1x8xf32> to vector<2x4x1x8xf32>
    %23 = vector.shape_cast %22 : vector<2x4x1x8xf32> to vector<8x1x8xf32>
    %cst_14 = arith.constant 5.000000e-01 : f32
    %24 = vector.broadcast %cst_14 : f32 to vector<8x1x8xf32>
    %25 = arith.cmpf ogt, %23, %24 : vector<8x1x8xf32>
    %cst_15 = arith.constant -1.000000e+09 : f32
    %26 = vector.shape_cast %25 : vector<8x1x8xi1> to vector<8x1x8xi1>
    %27 = vector.broadcast %26 : vector<8x1x8xi1> to vector<8x8x8xi1>
    %28 = vector.broadcast %cst_15 : f32 to vector<8x8x8xf32>
    %29 = arith.select %27, %28, %17 : vector<8x8x8xi1>, vector<8x8x8xf32>
    %cst_16 = arith.constant dense<0xFF800000> : vector<8x8xf32>
    %30 = vector.multi_reduction <maximumf>, %29, %cst_16 [2] : vector<8x8x8xf32> to vector<8x8xf32>
    %31 = vector.shape_cast %30 : vector<8x8xf32> to vector<8x8x1xf32>
    %32 = vector.broadcast %31 : vector<8x8x1xf32> to vector<8x8x8xf32>
    %33 = arith.subf %29, %32 : vector<8x8x8xf32>
    %34 = math.exp %33 : vector<8x8x8xf32>
    %cst_17 = arith.constant dense<0.000000e+00> : vector<8x8xf32>
    %35 = vector.multi_reduction <add>, %34, %cst_17 [2] : vector<8x8x8xf32> to vector<8x8xf32>
    %36 = vector.shape_cast %35 : vector<8x8xf32> to vector<8x8x1xf32>
    %37 = vector.broadcast %36 : vector<8x8x1xf32> to vector<8x8x8xf32>
    %38 = arith.divf %34, %37 : vector<8x8x8xf32>
    "tpu.trace_start"() <{level = 10 : i32, message = "nqk,nkd->nqd"}> : () -> ()
    %cst_18 = arith.constant dense<0.000000e+00> : vector<8x8x8xf32>
    %39 = tpu.matmul %38, %14, %cst_18 {dimension_numbers = #tpu.dot_dimension_numbers<[2], [1], [1], [2], [0, 0, 0, 1, 1, 2], [0], [0]>, precision = #tpu.contract_precision<fp32>} : vector<8x8x8xf32>, vector<8x8x8xf32>, vector<8x8x8xf32> -> vector<8x8x8xf32>
    "tpu.trace_stop"() : () -> ()
    %c0_19 = arith.constant 0 : index
    %c0_20 = arith.constant 0 : index
    %c0_21 = arith.constant 0 : index
    %40 = vector.load %arg5[%c0_19, %c0_20, %c0_21] : memref<4x8x32xf32, #tpu.memory_space<vmem>>, vector<4x8x32xf32>
    %41 = tpu.concatenate %40, %40 in 0 : vector<4x8x32xf32>, vector<4x8x32xf32> -> vector<8x8x32xf32>
    "tpu.trace_start"() <{level = 10 : i32, message = "nqd,nde->nqe"}> : () -> ()
    %cst_22 = arith.constant dense<0.000000e+00> : vector<8x8x32xf32>
    %42 = tpu.matmul %39, %41, %cst_22 {dimension_numbers = #tpu.dot_dimension_numbers<[2], [1], [1], [2], [0, 0, 0, 1, 1, 2], [0], [0]>, precision = #tpu.contract_precision<fp32>} : vector<8x8x8xf32>, vector<8x8x32xf32>, vector<8x8x32xf32> -> vector<8x8x32xf32>
    "tpu.trace_stop"() : () -> ()
    %43 = vector.shape_cast %42 : vector<8x8x32xf32> to vector<2x4x8x32xf32>
    %44 = vector.extract_strided_slice %43 {offsets = [0, 0, 0, 0], sizes = [2, 1, 8, 32], strides = [1, 1, 1, 1]} : vector<2x4x8x32xf32> to vector<2x1x8x32xf32>
    %45 = vector.shape_cast %44 : vector<2x1x8x32xf32> to vector<2x8x32xf32>
    %46 = vector.extract_strided_slice %43 {offsets = [0, 1, 0, 0], sizes = [2, 1, 8, 32], strides = [1, 1, 1, 1]} : vector<2x4x8x32xf32> to vector<2x1x8x32xf32>
    %47 = vector.shape_cast %46 : vector<2x1x8x32xf32> to vector<2x8x32xf32>
    %48 = arith.addf %45, %47 : vector<2x8x32xf32>
    %49 = vector.extract_strided_slice %43 {offsets = [0, 2, 0, 0], sizes = [2, 1, 8, 32], strides = [1, 1, 1, 1]} : vector<2x4x8x32xf32> to vector<2x1x8x32xf32>
    %50 = vector.shape_cast %49 : vector<2x1x8x32xf32> to vector<2x8x32xf32>
    %51 = arith.addf %48, %50 : vector<2x8x32xf32>
    %52 = vector.extract_strided_slice %43 {offsets = [0, 3, 0, 0], sizes = [2, 1, 8, 32], strides = [1, 1, 1, 1]} : vector<2x4x8x32xf32> to vector<2x1x8x32xf32>
    %53 = vector.shape_cast %52 : vector<2x1x8x32xf32> to vector<2x8x32xf32>
    %54 = arith.addf %51, %53 : vector<2x8x32xf32>
    %55 = vector.shape_cast %54 : vector<2x8x32xf32> to vector<16x32xf32>
    %c0_23 = arith.constant 0 : index
    %c0_24 = arith.constant 0 : index
    %56 = vector.load %arg9[%c0_23, %c0_24] : memref<6x32xf32, #tpu.memory_space<vmem>>, vector<1x32xf32>
    %57 = vector.broadcast %56 : vector<1x32xf32> to vector<16x32xf32>
    %58 = arith.addf %55, %57 : vector<16x32xf32>
    %59 = vector.shape_cast %0 : vector<2x8x32xf32> to vector<16x32xf32>
    %60 = arith.addf %59, %58 : vector<16x32xf32>
    %c1 = arith.constant 1 : index
    %c0_25 = arith.constant 0 : index
    %61 = vector.load %arg9[%c1, %c0_25] : memref<6x32xf32, #tpu.memory_space<vmem>>, vector<1x32xf32>
    %c2 = arith.constant 2 : index
    %c0_26 = arith.constant 0 : index
    %62 = vector.load %arg9[%c2, %c0_26] : memref<6x32xf32, #tpu.memory_space<vmem>>, vector<1x32xf32>
    %cst_27 = arith.constant dense<0.000000e+00> : vector<16xf32>
    %63 = vector.multi_reduction <add>, %60, %cst_27 [1] : vector<16x32xf32> to vector<16xf32>
    %64 = vector.shape_cast %63 : vector<16xf32> to vector<16x1xf32>
    %cst_28 = arith.constant 3.200000e+01 : f32
    %65 = vector.broadcast %cst_28 : f32 to vector<16x1xf32>
    %66 = arith.divf %64, %65 : vector<16x1xf32>
    %67 = vector.broadcast %66 : vector<16x1xf32> to vector<16x32xf32>
    %68 = arith.subf %60, %67 : vector<16x32xf32>
    %69 = arith.mulf %68, %68 : vector<16x32xf32>
    %cst_29 = arith.constant dense<0.000000e+00> : vector<16xf32>
    %70 = vector.multi_reduction <add>, %69, %cst_29 [1] : vector<16x32xf32> to vector<16xf32>
    %71 = vector.shape_cast %70 : vector<16xf32> to vector<16x1xf32>
    %cst_30 = arith.constant 3.100000e+01 : f32
    %72 = vector.broadcast %cst_30 : f32 to vector<16x1xf32>
    %73 = arith.divf %71, %72 : vector<16x1xf32>
    %74 = math.sqrt %73 : vector<16x1xf32>
    %75 = vector.broadcast %66 : vector<16x1xf32> to vector<16x32xf32>
    %76 = arith.subf %60, %75 : vector<16x32xf32>
    %77 = vector.broadcast %61 : vector<1x32xf32> to vector<16x32xf32>
    %78 = arith.mulf %77, %76 : vector<16x32xf32>
    %cst_31 = arith.constant 9.99999997E-7 : f32
    %79 = vector.broadcast %cst_31 : f32 to vector<16x1xf32>
    %80 = arith.addf %74, %79 : vector<16x1xf32>
    %81 = vector.broadcast %80 : vector<16x1xf32> to vector<16x32xf32>
    %82 = arith.divf %78, %81 : vector<16x32xf32>
    %83 = vector.broadcast %62 : vector<1x32xf32> to vector<16x32xf32>
    %84 = arith.addf %82, %83 : vector<16x32xf32>
    %c0_32 = arith.constant 0 : index
    %c0_33 = arith.constant 0 : index
    %85 = vector.load %arg6[%c0_32, %c0_33] : memref<32x64xf32, #tpu.memory_space<vmem>>, vector<32x64xf32>
    %cst_34 = arith.constant dense<0.000000e+00> : vector<16x64xf32>
    %86 = tpu.matmul %84, %85, %cst_34 {dimension_numbers = #tpu.dot_dimension_numbers<[1], [0], [0], [1], [0, 0, 1, 1], [], []>, precision = #tpu.contract_precision<fp32>} : vector<16x32xf32>, vector<32x64xf32>, vector<16x64xf32> -> vector<16x64xf32>
    %c0_35 = arith.constant 0 : index
    %c0_36 = arith.constant 0 : index
    %87 = vector.load %arg7[%c0_35, %c0_36] : memref<1x64xf32, #tpu.memory_space<vmem>>, vector<1x64xf32>
    %88 = vector.broadcast %87 : vector<1x64xf32> to vector<16x64xf32>
    %89 = arith.addf %86, %88 : vector<16x64xf32>
    %cst_37 = arith.constant 0.000000e+00 : f32
    %90 = vector.broadcast %cst_37 : f32 to vector<16x64xf32>
    %91 = arith.maximumf %89, %90 : vector<16x64xf32>
    %c0_38 = arith.constant 0 : index
    %c0_39 = arith.constant 0 : index
    %92 = vector.load %arg8[%c0_38, %c0_39] : memref<64x32xf32, #tpu.memory_space<vmem>>, vector<64x32xf32>
    %cst_40 = arith.constant dense<0.000000e+00> : vector<16x32xf32>
    %93 = tpu.matmul %91, %92, %cst_40 {dimension_numbers = #tpu.dot_dimension_numbers<[1], [0], [0], [1], [0, 0, 1, 1], [], []>, precision = #tpu.contract_precision<fp32>} : vector<16x64xf32>, vector<64x32xf32>, vector<16x32xf32> -> vector<16x32xf32>
    %c3 = arith.constant 3 : index
    %c0_41 = arith.constant 0 : index
    %94 = vector.load %arg9[%c3, %c0_41] : memref<6x32xf32, #tpu.memory_space<vmem>>, vector<1x32xf32>
    %95 = vector.broadcast %94 : vector<1x32xf32> to vector<16x32xf32>
    %96 = arith.addf %93, %95 : vector<16x32xf32>
    %97 = arith.addf %84, %96 : vector<16x32xf32>
    %c4 = arith.constant 4 : index
    %c0_42 = arith.constant 0 : index
    %98 = vector.load %arg9[%c4, %c0_42] : memref<6x32xf32, #tpu.memory_space<vmem>>, vector<1x32xf32>
    %c5 = arith.constant 5 : index
    %c0_43 = arith.constant 0 : index
    %99 = vector.load %arg9[%c5, %c0_43] : memref<6x32xf32, #tpu.memory_space<vmem>>, vector<1x32xf32>
    %cst_44 = arith.constant dense<0.000000e+00> : vector<16xf32>
    %100 = vector.multi_reduction <add>, %97, %cst_44 [1] : vector<16x32xf32> to vector<16xf32>
    %101 = vector.shape_cast %100 : vector<16xf32> to vector<16x1xf32>
    %cst_45 = arith.constant 3.200000e+01 : f32
    %102 = vector.broadcast %cst_45 : f32 to vector<16x1xf32>
    %103 = arith.divf %101, %102 : vector<16x1xf32>
    %104 = vector.broadcast %103 : vector<16x1xf32> to vector<16x32xf32>
    %105 = arith.subf %97, %104 : vector<16x32xf32>
    %106 = arith.mulf %105, %105 : vector<16x32xf32>
    %cst_46 = arith.constant dense<0.000000e+00> : vector<16xf32>
    %107 = vector.multi_reduction <add>, %106, %cst_46 [1] : vector<16x32xf32> to vector<16xf32>
    %108 = vector.shape_cast %107 : vector<16xf32> to vector<16x1xf32>
    %cst_47 = arith.constant 3.100000e+01 : f32
    %109 = vector.broadcast %cst_47 : f32 to vector<16x1xf32>
    %110 = arith.divf %108, %109 : vector<16x1xf32>
    %111 = math.sqrt %110 : vector<16x1xf32>
    %112 = vector.broadcast %103 : vector<16x1xf32> to vector<16x32xf32>
    %113 = arith.subf %97, %112 : vector<16x32xf32>
    %114 = vector.broadcast %98 : vector<1x32xf32> to vector<16x32xf32>
    %115 = arith.mulf %114, %113 : vector<16x32xf32>
    %cst_48 = arith.constant 9.99999997E-7 : f32
    %116 = vector.broadcast %cst_48 : f32 to vector<16x1xf32>
    %117 = arith.addf %111, %116 : vector<16x1xf32>
    %118 = vector.broadcast %117 : vector<16x1xf32> to vector<16x32xf32>
    %119 = arith.divf %115, %118 : vector<16x32xf32>
    %120 = vector.broadcast %99 : vector<1x32xf32> to vector<16x32xf32>
    %121 = arith.addf %119, %120 : vector<16x32xf32>
    %122 = vector.shape_cast %121 : vector<16x32xf32> to vector<2x8x32xf32>
    %c0_49 = arith.constant 0 : index
    %c0_50 = arith.constant 0 : index
    %c0_51 = arith.constant 0 : index
    %123 = vector.load %arg10[%c0_49, %c0_50, %c0_51] : memref<2x8x32xf32, #tpu.memory_space<vmem>>, vector<2x8x32xf32>
    tpu.vector_store %arg10[%c0_49, %c0_50, %c0_51], %122 {strides = array<i32>} : memref<2x8x32xf32, #tpu.memory_space<vmem>>, vector<2x8x32xf32>,
    return
  }
  func.func @transform_0(%arg0: i32) -> (i32, i32, i32, i32) {
    %c0_i32 = arith.constant 0 : i32
    %c0_i32_0 = arith.constant 0 : i32
    %c0_i32_1 = arith.constant 0 : i32
    %c0_i32_2 = arith.constant 0 : i32
    return %arg0, %c0_i32, %c0_i32_0, %c0_i32_1 : i32, i32, i32, i32
  }
  func.func @transform_1(%arg0: i32) -> (i32, i32, i32) {
    %c0_i32 = arith.constant 0 : i32
    %c0_i32_0 = arith.constant 0 : i32
    %c0_i32_1 = arith.constant 0 : i32
    return %arg0, %c0_i32, %c0_i32_0 : i32, i32, i32
  }
  func.func @transform_2(%arg0: i32) -> (i32, i32, i32) {
    %c0_i32 = arith.constant 0 : i32
    %c0_i32_0 = arith.constant 0 : i32
    %c0_i32_1 = arith.constant 0 : i32
    %c0_i32_2 = arith.constant 0 : i32
    return %c0_i32, %c0_i32_0, %c0_i32_1 : i32, i32, i32
  }
  func.func @transform_3(%arg0: i32) -> (i32, i32, i32) {
    %c0_i32 = arith.constant 0 : i32
    %c0_i32_0 = arith.constant 0 : i32
    %c0_i32_1 = arith.constant 0 : i32
    %c0_i32_2 = arith.constant 0 : i32
    return %c0_i32, %c0_i32_0, %c0_i32_1 : i32, i32, i32
  }
  func.func @transform_4(%arg0: i32) -> (i32, i32, i32) {
    %c0_i32 = arith.constant 0 : i32
    %c0_i32_0 = arith.constant 0 : i32
    %c0_i32_1 = arith.constant 0 : i32
    %c0_i32_2 = arith.constant 0 : i32
    return %c0_i32, %c0_i32_0, %c0_i32_1 : i32, i32, i32
  }
  func.func @transform_5(%arg0: i32) -> (i32, i32) {
    %c0_i32 = arith.constant 0 : i32
    %c0_i32_0 = arith.constant 0 : i32
    %c0_i32_1 = arith.constant 0 : i32
    return %c0_i32, %c0_i32_0 : i32, i32
  }
  func.func @transform_6(%arg0: i32) -> (i32, i32) {
    %c0_i32 = arith.constant 0 : i32
    %c0_i32_0 = arith.constant 0 : i32
    %c0_i32_1 = arith.constant 0 : i32
    return %c0_i32, %c0_i32_0 : i32, i32
  }
  func.func @transform_7(%arg0: i32) -> (i32, i32) {
    %c0_i32 = arith.constant 0 : i32
    %c0_i32_0 = arith.constant 0 : i32
    %c0_i32_1 = arith.constant 0 : i32
    return %c0_i32, %c0_i32_0 : i32, i32
  }
  func.func @transform_8(%arg0: i32) -> (i32, i32) {
    %c0_i32 = arith.constant 0 : i32
    %c0_i32_0 = arith.constant 0 : i32
    %c0_i32_1 = arith.constant 0 : i32
    return %c0_i32, %c0_i32_0 : i32, i32
  }
  func.func @transform_9(%arg0: i32) -> (i32, i32, i32) {
    %c0_i32 = arith.constant 0 : i32
    %c0_i32_0 = arith.constant 0 : i32
    %c0_i32_1 = arith.constant 0 : i32
    return %arg0, %c0_i32, %c0_i32_0 : i32, i32, i32
  }
}

</mosaic_0001>

<bundles_post_ra>
// kernel: tpu_custom_call.1
= control target key start
LH: loop header
LB: loop body
LE: loop exit
PB: predicated region body
PF: predicated region fallthrough
CT: control target
= control target key end

     0   :  { %14 = vsyncpa [#allocation3], 0  ;;  %s21430_s0 = inlined_call_operand.vmem [shape: f32[4,1,1,8], index: 0, kind: input, shape index: {}]   ;;  %s21431_s1 = inlined_call_operand.vmem [shape: f32[4,8,32], index: 1, kind: input, shape index: {}]   ;;  %s21432_s2 = inlined_call_operand.vmem [shape: f32[4,32,24], index: 2, kind: input, shape index: {}]   ;;  %s21433_s3 = inlined_call_operand.vmem [shape: f32[4,1,24], index: 3, kind: input, shape index: {}]   ;;  %s21434_s4 = inlined_call_operand.vmem [shape: f32[4,8,32], index: 4, kind: input, shape index: {}]   ;;  %s21435_s5 = inlined_call_operand.vmem [shape: f32[32,64], index: 5, kind: input, shape index: {}]   ;;  %s21436_s6 = inlined_call_operand.vmem [shape: f32[1,64], index: 6, kind: input, shape index: {}]   ;;  %s21437_s7 = inlined_call_operand.vmem [shape: f32[64,32], index: 7, kind: input, shape index: {}]   ;;  %s21438_s8 = inlined_call_operand.vmem [shape: f32[6,32], index: 8, kind: input, shape index: {}]   ;;  %s21439_s9 = inlined_call_operand.hbm [shape: f32[4,8,32], index: 9, kind: output, shape index: {}]  }
   0x1   :  { %16 = vsyncpa [#allocation3 + $0x1], 0  ;;  %s19604_s30 = smov 0   ;;  %s19606_s10 = smov 0  }
   0x2   :  { %s19608_s11 = smov 0   ;;  %s19610_s12 = smov 0  }
   0x3 LB: > { %s19625_s13 = sadd.s32 4294967295, %s19543_s12   ;;  %s16604_s14 = sadd.s32 4294967294, %s19543_s12   ;;  %s19543_s12 = sphi %s19610_s12, %s21445_s12   ;;  %s19539_s11 = sphi %s19608_s11, %s21444_s11   ;;  %s19535_s10 = sphi %s19606_s10, %s21443_s10   ;;  %s19531_s30 = sphi %s19604_s30, %s21442_s30  }
   0x4   : > { %s19629_s15 = sadd.s32 1, %s19543_s12   ;;  %s228_s16 = sadd.s32 1, %s19539_s11 }
   0x5   : > { %s225_s17 = ssub.s32 %s19543_s12, %s19629_s15  ;;  %p238_p0 = scmp.ne.s32.totalorder %s19539_s11, %s19535_s10 }
   0x6   : > { %p226_p1 = scmp.eq.s32.totalorder %s225_s17, 0  ;;  %p239_p2 = scmp.eq.s32.totalorder %s19625_s13, 1 }
   0x7   : > { %p244_p3 = scmp.ne.s32.totalorder %s19535_s10, %s19531_s30  ;;  %p245_p4 = scmp.eq.s32.totalorder %s16604_s14, 1 }
   0x8   : > { %s19640_s18 = scalar_select %p226_p1, %s19539_s11, %s228_s16  }
   0x9   : > { %p19642_p5 = por %p239_p2, %p238_p0  ;;  %p19646_p6 = por %p245_p4, %p244_p3 }
   0xa   : > { %p16607_p7 = scmp.ge.s32.totalorder %s19543_s12, 1  ;;  %p301_p8 = scmp.lt.s32.totalorder %s19543_s12, 3 }
   0xc   : > { %p302_p9 = pnand %p16607_p7, %p301_p8 }
   0xd   : > { %v355_v0 = vld [vmem:[%s21432_s2] sm:$0xff] (!%p302_p9)  ;;  %v356_v1 = vld [vmem:[%s21432_s2 + $0x8] sm:$0xff] (!%p302_p9)  ;;  %v19545_v3 = vmov (!%p302_p9), 0.0|0.0   ;;  %v357_v8 = vld [vmem:[%s21432_s2 + $0x10] sm:$0xff] (!%p302_p9)  ;;  %vm19546_vm0 = vmmov (!%p302_p9), 0   ;;  %v19547_v15 = vmov (!%p302_p9), 0.0  }
   0xe   : > { %305 = sbr.rel (%p302_p9) target bundleno = 2893 (0xb4d), region = 56  ;;  %v19661_v2 = vld [vmem:[%s21432_s2 + $0x20] sm:$0xff] (!%p302_p9)  ;;  %18681 = vmatprep.subr.bf16.mxu0 (!%p302_p9), %v19545_v3  ;;  %v404_v4 = vand.u32 (!%p302_p9), 4294901760, %v355_v0  ;;  %v407_v5 = vand.u32 (!%p302_p9), 4294901760, %v356_v1  ;;  %18723 = vmatprep.subr.bf16.mxu1 (!%p302_p9), %v19545_v3  ;;  %v19668_v6 = vld [vmem:[%s21432_s2 + $0x28] sm:$0xff] (!%p302_p9)  ;;  %v358_v9 = vld [vmem:[%s21432_s2 + $0x18] sm:$0xff] (!%p302_p9) }
   0xf   : > { %v889_v7 = vand.u32 (!%p302_p9), 4294901760, %v19661_v2  ;;  %v892_v10 = vand.u32 (!%p302_p9), 4294901760, %v19668_v6  ;;  %v410_v11 = vand.u32 (!%p302_p9), 4294901760, %v357_v8  ;;  %v413_v12 = vand.u32 (!%p302_p9), 4294901760, %v358_v9  ;;  %v19681_v13 = vld [vmem:[%s21432_s2 + $0x30] sm:$0xff] (!%p302_p9)  ;;  %v19686_v14 = vld [vmem:[%s21432_s2 + $0x38] sm:$0xff] (!%p302_p9)  ;;  %17261 = vmatprep.mubr.msk.f32.mxu0 (!%p302_p9), %vm19546_vm0, %v19547_v15  ;;  %17338 = vmatprep.mubr.msk.f32.mxu1 (!%p302_p9), %vm19546_vm0, %v19547_v15 }
  0x10   : > { %s16609_s25 = sshll.u32 (!%p302_p9), %s19625_s13, 1  ;;  %v19693_v16 = vpack.c.bf16 (!%p302_p9), %v407_v5, %v404_v4  ;;  %v895_v18 = vand.u32 (!%p302_p9), 4294901760, %v19681_v13  ;;  %v898_v19 = vand.u32 (!%p302_p9), 4294901760, %v19686_v14  ;;  %vm399_vm1 = vcmask (!%p302_p9), 261120   ;;  %s19548_s27 = smov (!%p302_p9), 120  }
  0x11   : > { %v19698_v17 = vsub.f32 (!%p302_p9), %v19661_v2, %v889_v7  ;;  %p342_p10 = scmp.lt.s32.totalorder (!%p302_p9), %s16609_s25, 3  ;;  %v19705_v20 = vsub.f32 (!%p302_p9), %v19668_v6, %v892_v10  ;;  %v19709_v22 = vpack.c.bf16 (!%p302_p9), %v413_v12, %v410_v11  ;;  %v19725_v26 = vsub.f32 (!%p302_p9), %v355_v0, %v404_v4  ;;  %s338_s24 = sand.u32 (!%p302_p9), 1, %s19535_s10  }
  0x12   : > { %18683 = vmatpush3.bf16.msra.mxu0 (!%p302_p9), %v19693_v16  ;;  %v19714_v23 = vsub.f32 (!%p302_p9), %v19681_v13, %v895_v18  ;;  %v19719_v24 = vsub.f32 (!%p302_p9), %v19686_v14, %v898_v19  ;;  %v19727_v27 = vsub.f32 (!%p302_p9), %v356_v1, %v407_v5  ;;  %v19735_v31 = vsub.f32 (!%p302_p9), %v357_v8, %v410_v11  ;;  %v368_v8 = vld [vmem:[%s21432_s2 + $0x68] sm:$0xff] (!%p302_p9)  ;;  %v370_v13 = vld [vmem:[%s21432_s2 + $0x78] sm:$0xff] (!%p302_p9)  ;;  %s19551_s23 = smov (!%p302_p9), [#allocation2]  }
  0x13   : > { %v970_v21 = vand.u32 (!%p302_p9), 4294901760, %v19698_v17  ;;  %v977_v25 = vand.u32 (!%p302_p9), 4294901760, %v19705_v20  ;;  %18684 = vmatprep.subr.bf16.mxu0 (!%p302_p9), %v19545_v3  ;;  %v485_v33 = vand.u32 (!%p302_p9), 4294901760, %v19725_v26  ;;  %v19747_v35 = vsub.f32 (!%p302_p9), %v358_v9, %v413_v12  ;;  %v369_v12 = vld [vmem:[%s21432_s2 + $0x70] sm:$0xff] (!%p302_p9) }
  0x14   : > { %v984_v29 = vand.u32 (!%p302_p9), 4294901760, %v19714_v23  ;;  %v991_v30 = vand.u32 (!%p302_p9), 4294901760, %v19719_v24  ;;  %v492_v34 = vand.u32 (!%p302_p9), 4294901760, %v19727_v27  ;;  %v499_v40 = vand.u32 (!%p302_p9), 4294901760, %v19735_v31 }
  0x15   : > { %s21447_s25 = smov (!%p342_p10, %s16609_s25), 3  ;;  %v971_v28 = vsub.f32 %v19698_v17, %v970_v21  ;;  %v978_v32 = vsub.f32 %v19705_v20, %v977_v25  ;;  %v486_v43 = vsub.f32 %v19725_v26, %v485_v33  ;;  %v506_v49 = vand.u32 4294901760, %v19747_v35 }
  0x16   : > { %s16611_s26 = sshll.u32 %s21447_s25, 3  ;;  %18686 = vmatpush3.bf16.msra.mxu0 %v19709_v22  ;;  %v985_v37 = vsub.f32 %v19714_v23, %v984_v29  ;;  %v992_v38 = vsub.f32 %v19719_v24, %v991_v30  ;;  %v493_v44 = vsub.f32 %v19727_v27, %v492_v34  ;;  %v500_v51 = vsub.f32 %v19735_v31, %v499_v40 }
  0x17   : > { %s19743_s29 = scalar_lea.vmem %s21431_s1, %s16611_s26  ;;  %v972_v36 = vand.u32 4294901760, %v971_v28  ;;  %v979_v41 = vand.u32 4294901760, %v978_v32  ;;  %18687 = vmatprep.subr.bf16.mxu0 %v19545_v3  ;;  %v487_v53 = vand.u32 4294901760, %v486_v43  ;;  %v507_v55 = vsub.f32 %v19747_v35, %v506_v49  ;;  %v363_v32 = vld [vmem:[%s21432_s2 + $0x40] sm:$0xff]  ;;  %s20599_s26 = scalar_lea.vmem %s21430_s0, %s21447_s25 }
  0x18   : > { %v353_v39 = vld [vmem:[%s19743_s29] sm:$0xff]  ;;  %v986_v45 = vand.u32 4294901760, %v985_v37  ;;  %v993_v46 = vand.u32 4294901760, %v992_v38  ;;  %v494_v54 = vand.u32 4294901760, %v493_v44  ;;  %v19794_v59 = vpack.c.bf16 %v19705_v20, %v19698_v17  ;;  %s19550_s25 = smov 112  }
  0x19   : > { %v401_v42 = vsel %vm399_vm1, %v353_v39, 0  ;;  %v19768_v48 = vpack.c.bf16 %v979_v41, %v972_v36  ;;  %v501_v60 = vand.u32 4294901760, %v500_v51  ;;  %v508_v61 = vand.u32 4294901760, %v507_v55  ;;  %v365_v41 = vld [vmem:[%s21432_s2 + $0x50] sm:$0xff] }
  0x1a   : > { %v19766_v47 = vand.u32 4294901760, %v401_v42  ;;  %v19778_v52 = vpack.c.bf16 %v993_v46, %v986_v45  ;;  %v19790_v58 = vpack.c.bf16 %v494_v54, %v487_v53  ;;  %v19807_v0 = vpack.c.bf16 %v19719_v24, %v19714_v23 }
  0x1b   : > { %18725 = vmatpush3.bf16.msra.mxu1 %v19768_v48  ;;  %v19803_v63 = vpack.c.bf16 %v508_v61, %v501_v60  ;;  %v19819_v1 = vpack.c.bf16 %v892_v10, %v889_v7  ;;  %v19825_v4 = vpack.c.bf16 %v19727_v27, %v19725_v26  ;;  %v19835_v2 = vpack.c.bf16 %v898_v19, %v895_v18  ;;  %v367_v7 = vld [vmem:[%s21432_s2 + $0x60] sm:$0xff] }
  0x1c   : > { %v19772_v50 = vsub.f32 %v401_v42, %v19766_v47  ;;  %18726 = vmatprep.subr.bf16.mxu1 %v19545_v3  ;;  %v19841_v5 = vpack.c.bf16 %v19747_v35, %v19735_v31  ;;  %v19855_v6 = vpack.c.bf16 %v977_v25, %v970_v21  ;;  %v19873_v9 = vpack.c.bf16 %v991_v30, %v984_v29  ;;  %v366_v42 = vld [vmem:[%s21432_s2 + $0x58] sm:$0xff] }
  0x1d   : > { %v1859_v10 = vand.u32 4294901760, %v367_v7  ;;  %v1862_v11 = vand.u32 4294901760, %v368_v8  ;;  %v19891_v14 = vpack.c.bf16 %v492_v34, %v485_v33  ;;  %v1865_v17 = vand.u32 4294901760, %v369_v12  ;;  %v364_v33 = vld [vmem:[%s21432_s2 + $0x48] sm:$0xff] }
  0x1e   : > { %v19785_v56 = vand.u32 4294901760, %v19772_v50  ;;  %v1868_v18 = vand.u32 4294901760, %v370_v13  ;;  %v19907_v21 = vpack.c.bf16 %v506_v49, %v499_v40  ;;  %v1374_v35 = vand.u32 4294901760, %v363_v32 }
  0x1f   : > { %18728 = vmatpush3.bf16.msra.mxu1 %v19778_v52  ;;  %v19895_v19 = vsub.f32 %v367_v7, %v1859_v10  ;;  %v19897_v20 = vsub.f32 %v368_v8, %v1862_v11  ;;  %v19913_v25 = vsub.f32 %v369_v12, %v1865_v17  ;;  %v19923_v27 = vpack.c.bf16 %v1862_v11, %v1859_v10 }
  0x20   : > { %v475_v57 = vsub.f32 %v19772_v50, %v19785_v56  ;;  %18729 = vmatprep.subr.bf16.mxu1 %v19545_v3  ;;  %v19915_v26 = vsub.f32 %v370_v13, %v1868_v18  ;;  %v19945_v34 = vpack.c.bf16 %v1868_v18, %v1865_v17  ;;  %v1377_v36 = vand.u32 4294901760, %v364_v33 }
  0x21   : > { %v1940_v23 = vand.u32 4294901760, %v19895_v19  ;;  %v1947_v24 = vand.u32 4294901760, %v19897_v20  ;;  %v1954_v30 = vand.u32 4294901760, %v19913_v25  ;;  %v1380_v43 = vand.u32 4294901760, %v365_v41 }
  0x22   : > { %v19796_v62 = vand.u32 4294901760, %v475_v57  ;;  %17339 = vmatmul.mubr.f32.vlgmr.msra.gmra.mrb[0].mxu1 %v19766_v47  ;;  %v1961_v31 = vand.u32 4294901760, %v19915_v26  ;;  %v1383_v44 = vand.u32 4294901760, %v366_v42  ;;  %v19967_v45 = vsub.f32 %v363_v32, %v1374_v35 }
  0x23   : > { %18731 = vmatpush3.bf16.msra.mxu1 %v19794_v59  ;;  %17349 = vmatprep.mubr.msk.f32.mxu1 %vm19546_vm0, %v19547_v15  ;;  %v1941_v28 = vsub.f32 %v19895_v19, %v1940_v23  ;;  %v1948_v29 = vsub.f32 %v19897_v20, %v1947_v24  ;;  %v1955_v39 = vsub.f32 %v19913_v25, %v1954_v30  ;;  %vm4289_vm2 = vcmask 64512  }
  0x24   : > { %17262 = vmatmul.mubr.f32.vlgmr.msra.gmra.mrb[0].mxu0 %v19796_v62  ;;  %18732 = vmatprep.subr.bf16.mxu1 %v19545_v3  ;;  %v1962_v40 = vsub.f32 %v19915_v26, %v1961_v31  ;;  %v19973_v53 = vsub.f32 %v364_v33, %v1377_v36  ;;  %v19979_v54 = vsub.f32 %v365_v41, %v1380_v43  ;;  %v1455_v57 = vand.u32 4294901760, %v19967_v45 }
  0x25   : > { %18689 = vmatpush3.bf16.msra.mxu0 %v19790_v58  ;;  %17272 = vmatprep.mubr.msk.f32.mxu0 %vm19546_vm0, %v19547_v15  ;;  %v1942_v37 = vand.u32 4294901760, %v1941_v28  ;;  %v1949_v38 = vand.u32 4294901760, %v1948_v29  ;;  %v1956_v49 = vand.u32 4294901760, %v1955_v39  ;;  %v19987_v61 = vsub.f32 %v366_v42, %v1383_v44 }
  0x26   : > { %18690 = vmatprep.subr.bf16.mxu0 %v19545_v3  ;;  %v1963_v51 = vand.u32 4294901760, %v1962_v40  ;;  %v1462_v60 = vand.u32 4294901760, %v19973_v53  ;;  %v19995_v7 = vpack.c.bf16 %v1377_v36, %v1374_v35  ;;  %v19999_v8 = vpack.c.bf16 %v19897_v20, %v19895_v19  ;;  %v354_v40 = vld [vmem:[%s19743_s29 + $0x8] sm:$0xff] }
  0x27   : > { %18734 = vmatpush3.bf16.msra.mxu1 %v19807_v0  ;;  %v19971_v46 = vpack.c.bf16 %v1949_v38, %v1942_v37  ;;  %v1456_v10 = vsub.f32 %v19967_v45, %v1455_v57  ;;  %v1469_v12 = vand.u32 4294901760, %v19979_v54  ;;  %v1476_v13 = vand.u32 4294901760, %v19987_v61 }
  0x28   : > { %18735 = vmatprep.subr.bf16.mxu1 %v19545_v3  ;;  %v19983_v55 = vpack.c.bf16 %v1963_v51, %v1956_v49  ;;  %v1463_v11 = vsub.f32 %v19973_v53, %v1462_v60  ;;  %v20015_v17 = vpack.c.bf16 %v1383_v44, %v1380_v43  ;;  %v20019_v18 = vpack.c.bf16 %v19915_v26, %v19913_v25 }
  0x29   : > { %18692 = vmatpush3.bf16.msra.mxu0 %v19803_v63  ;;  %v1457_v28 = vand.u32 4294901760, %v1456_v10  ;;  %v1470_v32 = vsub.f32 %v19979_v54, %v1469_v12  ;;  %v1477_v33 = vsub.f32 %v19987_v61, %v1476_v13  ;;  %v20063_v39 = vpack.c.bf16 %v1947_v24, %v1940_v23 }
  0x2a   : > { %18693 = vmatprep.subr.bf16.mxu0 %v19545_v3  ;;  %17350 = vmatmul.mubr.f32.vlgmr.msra.gmra.mrb[0].mxu1 %v19772_v50  ;;  %v1464_v29 = vand.u32 4294901760, %v1463_v11  ;;  %v20074_v19 = vpack.c.bf16 %v19987_v61, %v19979_v54  ;;  %v20080_v20 = vpack.c.bf16 %v1961_v31, %v1954_v30  ;;  %v2344_v23 = vsel %vm399_vm1, %v354_v40, 0 }
  0x2b   : > { %18737 = vmatpush3.bf16.msra.mxu1 %v19819_v1  ;;  %17360 = vmatprep.mubr.msk.f32.mxu1 %vm19546_vm0, %v19547_v15  ;;  %v1471_v36 = vand.u32 4294901760, %v1470_v32  ;;  %v1478_v37 = vand.u32 4294901760, %v1477_v33  ;;  %v20089_v24 = vand.u32 4294901760, %v2344_v23  ;;  %v20117_v26 = vpack.c.bf16 %v1462_v60, %v1455_v57 }
  0x2c   : > { %17273 = vmatmul.mubr.f32.vlgmr.msra.gmra.mrb[0].mxu0 %v19766_v47  ;;  %18738 = vmatprep.subr.bf16.mxu1 %v19545_v3  ;;  %v20037_v35 = vpack.c.bf16 %v1464_v29, %v1457_v28  ;;  %v20131_v31 = vpack.c.bf16 %v1476_v13, %v1469_v12  ;;  %vm15874_vm11 = vcmask 523264  }
  0x2d   : > { %18695 = vmatpush3.bf16.msra.mxu0 %v19825_v4  ;;  %17283 = vmatprep.mubr.msk.f32.mxu0 %vm19546_vm0, %v19547_v15  ;;  %v20045_v38 = vpack.c.bf16 %v1478_v37, %v1471_v36  ;;  %v20098_v25 = vsub.f32 %v2344_v23, %v20089_v24 }
  0x2e   : > { %18696 = vmatprep.subr.bf16.mxu0 %v19545_v3 }
  0x2f   : > { %18740 = vmatpush3.bf16.msra.mxu1 %v19835_v2 }
  0x30   : > { %18741 = vmatprep.subr.bf16.mxu1 %v19545_v3 }
  0x31   : > { %18698 = vmatpush3.bf16.msra.mxu0 %v19841_v5 }
  0x32   : > { %18699 = vmatprep.subr.bf16.mxu0 %v19545_v3  ;;  %17361 = vmatmul.mubr.f32.vlgmr.msra.gmra.mrb[0].mxu1 %v19785_v56 }
  0x33   : > { %18743 = vmatpush3.bf16.msra.mxu1 %v19855_v6  ;;  %17371 = vmatprep.mubr.msk.f32.mxu1 %vm19546_vm0, %v19547_v15 }
  0x34   : > { %17284 = vmatmul.mubr.f32.vlgmr.msra.gmra.mrb[0].mxu0 %v19772_v50  ;;  %18744 = vmatprep.subr.bf16.mxu1 %v19545_v3 }
  0x35   : > { %18701 = vmatpush3.bf16.msra.mxu0 %v19693_v16  ;;  %17294 = vmatprep.mubr.msk.f32.mxu0 %vm19546_vm0, %v19547_v15 }
  0x36   : > { %18702 = vmatprep.subr.bf16.mxu0 %v19545_v3 }
  0x37   : > { %18746 = vmatpush3.bf16.msra.mxu1 %v19873_v9 }
  0x38   : > { %18747 = vmatprep.subr.bf16.mxu1 %v19545_v3 }
  0x39   : > { %18704 = vmatpush3.bf16.msra.mxu0 %v19709_v22 }
  0x3a   : > { %18705 = vmatprep.subr.bf16.mxu0 %v19545_v3  ;;  %17372 = vmatmul.mubr.f32.vlgmr.msra.gmra.mrb[0].mxu1 %v19766_v47 }
  0x3b   : > { %18749 = vmatpush3.bf16.msra.mxu1 %v19819_v1  ;;  %17382 = vmatprep.mubr.msk.f32.mxu1 %vm19546_vm0, %v19547_v15 }
  0x3c   : > { %17295 = vmatmul.mubr.f32.vlgmr.msra.gmra.mrb[0].mxu0 %v19785_v56  ;;  %18750 = vmatprep.subr.bf16.mxu1 %v19545_v3 }
  0x3d   : > { %18707 = vmatpush3.bf16.msra.mxu0 %v19891_v14  ;;  %17305 = vmatprep.mubr.msk.f32.mxu0 %vm19546_vm0, %v19547_v15 }
  0x3e   : > { %18708 = vmatprep.subr.bf16.mxu0 %v19545_v3 }
  0x3f   : > { %18752 = vmatpush3.bf16.msra.mxu1 %v19835_v2 }
  0x40   : > { %18789 = vmatprep.subr.bf16.mxu1 %v19545_v3 }
  0x41   : > { %18710 = vmatpush3.bf16.msra.mxu0 %v19907_v21 }
  0x42   : > { %18711 = vmatprep.subr.bf16.mxu0 %v19545_v3  ;;  %17383 = vmatmul.mubr.f32.vlgmr.msra.gmra.mrb[0].mxu1 %v19766_v47 }
  0x43   : > { %18791 = vmatpush3.bf16.msra.mxu1 %v19923_v27  ;;  %17459 = vmatprep.mubr.msk.f32.mxu1 %vm19546_vm0, %v19547_v15 }
  0x44   : > { %17306 = vmatmul.mubr.f32.vlgmr.msra.gmra.mrb[0].mxu0 %v19766_v47  ;;  %18792 = vmatprep.subr.bf16.mxu1 %v19545_v3 }
  0x45   : > { %18713 = vmatpush3.bf16.msra.mxu0 %v19693_v16  ;;  %17316 = vmatprep.mubr.msk.f32.mxu0 %vm19546_vm0, %v19547_v15 }
  0x46   : > { %18714 = vmatprep.subr.bf16.mxu0 %v19545_v3 }
  0x47   : > { %18794 = vmatpush3.bf16.msra.mxu1 %v19945_v34 }
  0x48   : > { %18795 = vmatprep.subr.bf16.mxu1 %v19545_v3 }
  0x49   : > { %18716 = vmatpush3.bf16.msra.mxu0 %v19709_v22 }
  0x4a   : > { %18717 = vmatprep.subr.bf16.mxu0 %v19545_v3  ;;  %17460 = vmatmul.mubr.f32.vlgmr.msra.gmra.mrb[2].mxu1 %v19796_v62 }
  0x4b   : > { %18797 = vmatpush3.bf16.msra.mxu1 %v19971_v46  ;;  %17470 = vmatprep.mubr.msk.f32.mxu1 %vm19546_vm0, %v19547_v15 }
  0x4c   : > { %17317 = vmatmul.mubr.f32.vlgmr.msra.gmra.mrb[0].mxu0 %v19766_v47  ;;  %18798 = vmatprep.subr.bf16.mxu1 %v19545_v3 }
  0x4d   : > { %18719 = vmatpush3.bf16.msra.mxu0 %v19819_v1  ;;  %17327 = vmatprep.mubr.msk.f32.mxu0 %vm19546_vm0, %v19547_v15 }
  0x4e   : > { %18720 = vmatprep.subr.bf16.mxu0 %v19545_v3 }
  0x4f   : > { %18800 = vmatpush3.bf16.msra.mxu1 %v19983_v55 }
  0x50   : > { %18801 = vmatprep.subr.bf16.mxu1 %v19545_v3 }
  0x51   : > { %18722 = vmatpush3.bf16.msra.mxu0 %v19835_v2 }
  0x52   : > { %18753 = vmatprep.subr.bf16.mxu0 %v19545_v3  ;;  %17471 = vmatmul.mubr.f32.vlgmr.msra.gmra.mrb[2].mxu1 %v19766_v47 }
  0x53   : > { %18803 = vmatpush3.bf16.msra.mxu1 %v19999_v8  ;;  %17481 = vmatprep.mubr.msk.f32.mxu1 %vm19546_vm0, %v19547_v15 }
  0x54   : > { %17328 = vmatmul.mubr.f32.vlgmr.msra.gmra.mrb[2].mxu0 %v19796_v62  ;;  %18804 = vmatprep.subr.bf16.mxu1 %v19545_v3 }
  0x55   : > { %18755 = vmatpush3.bf16.msra.mxu0 %v19995_v7  ;;  %17393 = vmatprep.mubr.msk.f32.mxu0 %vm19546_vm0, %v19547_v15 }
  0x56   : > { %18756 = vmatprep.subr.bf16.mxu0 %v19545_v3 }
  0x57   : > { %18806 = vmatpush3.bf16.msra.mxu1 %v20019_v18 }
  0x58   : > { %18807 = vmatprep.subr.bf16.mxu1 %v19545_v3 }
  0x59   : > { %18758 = vmatpush3.bf16.msra.mxu0 %v20015_v17 }
  0x5a   : > { %18759 = vmatprep.subr.bf16.mxu0 %v19545_v3  ;;  %17482 = vmatmul.mubr.f32.vlgmr.msra.gmra.mrb[2].mxu1 %v19772_v50 }
  0x5b   : > { %18809 = vmatpush3.bf16.msra.mxu1 %v19923_v27  ;;  %17492 = vmatprep.mubr.msk.f32.mxu1 %vm19546_vm0, %v19547_v15 }
  0x5c   : > { %17394 = vmatmul.mubr.f32.vlgmr.msra.gmra.mrb[4].mxu0 %v19796_v62  ;;  %18810 = vmatprep.subr.bf16.mxu1 %v19545_v3  ;;  %v20057_v62 = vpack.c.bf16 %v19973_v53, %v19967_v45 }
  0x5d   : > { %18761 = vmatpush3.bf16.msra.mxu0 %v20037_v35  ;;  %17404 = vmatprep.mubr.msk.f32.mxu0 %vm19546_vm0, %v19547_v15 }
  0x5e   : > { %18762 = vmatprep.subr.bf16.mxu0 %v19545_v3 }
  0x5f   : > { %18812 = vmatpush3.bf16.msra.mxu1 %v19945_v34 }
  0x60   : > { %18813 = vmatprep.subr.bf16.mxu1 %v19545_v3 }
  0x61   : > { %18764 = vmatpush3.bf16.msra.mxu0 %v20045_v38 }
  0x62   : > { %18765 = vmatprep.subr.bf16.mxu0 %v19545_v3  ;;  %17493 = vmatmul.mubr.f32.vlgmr.msra.gmra.mrb[2].mxu1 %v19785_v56 }
  0x63   : > { %18815 = vmatpush3.bf16.msra.mxu1 %v20063_v39  ;;  %17503 = vmatprep.mubr.msk.f32.mxu1 %vm19546_vm0, %v19547_v15 }
  0x64   : > { %17405 = vmatmul.mubr.f32.vlgmr.msra.gmra.mrb[4].mxu0 %v19766_v47  ;;  %18816 = vmatprep.subr.bf16.mxu1 %v19545_v3 }
  0x65   : > { %18767 = vmatpush3.bf16.msra.mxu0 %v20057_v62  ;;  %17415 = vmatprep.mubr.msk.f32.mxu0 %vm19546_vm0, %v19547_v15 }
  0x66   : > { %18768 = vmatprep.subr.bf16.mxu0 %v19545_v3 }
  0x67   : > { %18818 = vmatpush3.bf16.msra.mxu1 %v20080_v20 }
  0x68   : > { %18819 = vmatprep.subr.bf16.mxu1 %v19545_v3 }
  0x69   : > { %18770 = vmatpush3.bf16.msra.mxu0 %v20074_v19 }
  0x6a   : > { %18771 = vmatprep.subr.bf16.mxu0 %v19545_v3  ;;  %17504 = vmatmul.mubr.f32.vlgmr.msra.gmra.mrb[2].mxu1 %v19766_v47 }
  0x6b   : > { %18821 = vmatpush3.bf16.msra.mxu1 %v19923_v27  ;;  %17514 = vmatprep.mubr.msk.f32.mxu1 %vm19546_vm0, %v19547_v15 }
  0x6c   : > { %17416 = vmatmul.mubr.f32.vlgmr.msra.gmra.mrb[4].mxu0 %v19772_v50  ;;  %18822 = vmatprep.subr.bf16.mxu1 %v19545_v3  ;;  %v20109_v50 = vand.u32 4294901760, %v20098_v25 }
  0x6d   : > { %18773 = vmatpush3.bf16.msra.mxu0 %v19995_v7  ;;  %17426 = vmatprep.mubr.msk.f32.mxu0 %vm19546_vm0, %v19547_v15 }
  0x6e   : > { %18774 = vmatprep.subr.bf16.mxu0 %v19545_v3  ;;  %v2418_v30 = vsub.f32 %v20098_v25, %v20109_v50 }
  0x6f   : > { %18824 = vmatpush3.bf16.msra.mxu1 %v19945_v34 }
  0x70   : > { %18861 = vmatprep.subr.bf16.mxu1 %v19545_v3 }
  0x71   : > { %18776 = vmatpush3.bf16.msra.mxu0 %v20015_v17 }
  0x72   : > { %18777 = vmatprep.subr.bf16.mxu0 %v19545_v3  ;;  %17515 = vmatmul.mubr.f32.vlgmr.msra.gmra.mrb[2].mxu1 %v19766_v47 }
  0x73   : > { %18863 = vmatpush3.bf16.msra.mxu1 %v19819_v1  ;;  %17591 = vmatprep.mubr.msk.f32.mxu1 %vm19546_vm0, %v19547_v15 }
  0x74   : > { %17427 = vmatmul.mubr.f32.vlgmr.msra.gmra.mrb[4].mxu0 %v19785_v56  ;;  %18864 = vmatprep.subr.bf16.mxu1 %v19545_v3  ;;  %v20139_v56 = vand.u32 4294901760, %v2418_v30 }
  0x75   : > { %18779 = vmatpush3.bf16.msra.mxu0 %v20117_v26  ;;  %17437 = vmatprep.mubr.msk.f32.mxu0 %vm19546_vm0, %v19547_v15 }
  0x76   : > { %18780 = vmatprep.subr.bf16.mxu0 %v19545_v3 }
  0x77   : > { %18866 = vmatpush3.bf16.msra.mxu1 %v19835_v2 }
  0x78   : > { %18867 = vmatprep.subr.bf16.mxu1 %v19545_v3 }
  0x79   : > { %18782 = vmatpush3.bf16.msra.mxu0 %v20131_v31 }
  0x7a   : > { %18783 = vmatprep.subr.bf16.mxu0 %v19545_v3  ;;  %17592 = vmatmul.mubr.f32.vlgmr.msra.gmra.mrb[4].mxu1 %v20139_v56 }
  0x7b   : > { %18869 = vmatpush3.bf16.msra.mxu1 %v19768_v48  ;;  %17602 = vmatprep.mubr.msk.f32.mxu1 %vm19546_vm0, %v19547_v15 }
  0x7c   : > { %17438 = vmatmul.mubr.f32.vlgmr.msra.gmra.mrb[4].mxu0 %v19766_v47  ;;  %18870 = vmatprep.subr.bf16.mxu1 %v19545_v3 }
  0x7d   : > { %18785 = vmatpush3.bf16.msra.mxu0 %v19995_v7  ;;  %17448 = vmatprep.mubr.msk.f32.mxu0 %vm19546_vm0, %v19547_v15 }
  0x7e   : > { %18786 = vmatprep.subr.bf16.mxu0 %v19545_v3 }
  0x7f   : > { %18872 = vmatpush3.bf16.msra.mxu1 %v19778_v52 }
  0x80   : > { %18873 = vmatprep.subr.bf16.mxu1 %v19545_v3 }
  0x81   : > { %18788 = vmatpush3.bf16.msra.mxu0 %v20015_v17 }
  0x82   : > { %18825 = vmatprep.subr.bf16.mxu0 %v19545_v3  ;;  %17603 = vmatmul.mubr.f32.vlgmr.msra.gmra.mrb[4].mxu1 %v20089_v24 }
  0x83   : > { %18875 = vmatpush3.bf16.msra.mxu1 %v19794_v59  ;;  %17613 = vmatprep.mubr.msk.f32.mxu1 %vm19546_vm0, %v19547_v15 }
  0x84   : > { %17449 = vmatmul.mubr.f32.vlgmr.msra.gmra.mrb[4].mxu0 %v19766_v47  ;;  %18876 = vmatprep.subr.bf16.mxu1 %v19545_v3  ;;  %v16612_v47 = vld [vmem:[%s21433_s3] ss:$0 sm:$0xff] }
  0x85   : > { %18827 = vmatpush3.bf16.msra.mxu0 %v19693_v16  ;;  %17525 = vmatprep.mubr.msk.f32.mxu0 %vm19546_vm0, %v19547_v15 }
  0x86   : > { %18828 = vmatprep.subr.bf16.mxu0 %v19545_v3 }
  0x87   : > { %18878 = vmatpush3.bf16.msra.mxu1 %v19807_v0 }
  0x88   : > { %18879 = vmatprep.subr.bf16.mxu1 %v19545_v3 }
  0x89   : > { %18830 = vmatpush3.bf16.msra.mxu0 %v19709_v22 }
  0x8a   : > { %18831 = vmatprep.subr.bf16.mxu0 %v19545_v3  ;;  %17614 = vmatmul.mubr.f32.vlgmr.msra.gmra.mrb[4].mxu1 %v20098_v25 }
  0x8b   : > { %18881 = vmatpush3.bf16.msra.mxu1 %v19819_v1  ;;  %17624 = vmatprep.mubr.msk.f32.mxu1 %vm19546_vm0, %v19547_v15 }
  0x8c   : > { %17526 = vmatmul.mubr.f32.vlgmr.msra.gmra.mrb[6].mxu0 %v20139_v56  ;;  %18882 = vmatprep.subr.bf16.mxu1 %v19545_v3 }
  0x8d   : > { %18833 = vmatpush3.bf16.msra.mxu0 %v19790_v58  ;;  %17536 = vmatprep.mubr.msk.f32.mxu0 %vm19546_vm0, %v19547_v15 }
  0x8e   : > { %18834 = vmatprep.subr.bf16.mxu0 %v19545_v3 }
  0x8f   : > { %18884 = vmatpush3.bf16.msra.mxu1 %v19835_v2 }
  0x90   : > { %18885 = vmatprep.subr.bf16.mxu1 %v19545_v3 }
  0x91   : > { %18836 = vmatpush3.bf16.msra.mxu0 %v19803_v63 }
  0x92   : > { %18837 = vmatprep.subr.bf16.mxu0 %v19545_v3  ;;  %17625 = vmatmul.mubr.f32.vlgmr.msra.gmra.mrb[4].mxu1 %v20109_v50 }
  0x93   : > { %18887 = vmatpush3.bf16.msra.mxu1 %v19855_v6  ;;  %17635 = vmatprep.mubr.msk.f32.mxu1 %vm19546_vm0, %v19547_v15 }
  0x94   : > { %17537 = vmatmul.mubr.f32.vlgmr.msra.gmra.mrb[6].mxu0 %v20089_v24  ;;  %18888 = vmatprep.subr.bf16.mxu1 %v19545_v3 }
  0x95   : > { %18839 = vmatpush3.bf16.msra.mxu0 %v19825_v4  ;;  %17547 = vmatprep.mubr.msk.f32.mxu0 %vm19546_vm0, %v19547_v15 }
  0x96   : > { %18840 = vmatprep.subr.bf16.mxu0 %v19545_v3 }
  0x97   : > { %18890 = vmatpush3.bf16.msra.mxu1 %v19873_v9 }
  0x98   : > { %18891 = vmatprep.subr.bf16.mxu1 %v19545_v3 }
  0x99   : > { %18842 = vmatpush3.bf16.msra.mxu0 %v19841_v5  ;;  %v20336_v5 = vld [vmem:[%s21433_s3 + $0x2] ss:$0 sm:$0xff] }
  0x9a   : > { %18843 = vmatprep.subr.bf16.mxu0 %v19545_v3  ;;  %17636 = vmatmul.mubr.f32.vlgmr.msra.gmra.mrb[4].mxu1 %v20089_v24 }
  0x9b   : > { %18893 = vmatpush3.bf16.msra.mxu1 %v19819_v1  ;;  %17646 = vmatprep.mubr.msk.f32.mxu1 %vm19546_vm0, %v19547_v15 }
  0x9c   : > { %17548 = vmatmul.mubr.f32.vlgmr.msra.gmra.mrb[6].mxu0 %v20098_v25  ;;  %18894 = vmatprep.subr.bf16.mxu1 %v19545_v3 }
  0x9d   : > { %18845 = vmatpush3.bf16.msra.mxu0 %v19693_v16  ;;  %17558 = vmatprep.mubr.msk.f32.mxu0 %vm19546_vm0, %v19547_v15 }
  0x9e   : > { %18846 = vmatprep.subr.bf16.mxu0 %v19545_v3 }
  0x9f   : > { %18896 = vmatpush3.bf16.msra.mxu1 %v19835_v2 }
  0xa0   : > { %18933 = vmatprep.subr.bf16.mxu1 %v19545_v3 }
  0xa1   : > { %18848 = vmatpush3.bf16.msra.mxu0 %v19709_v22 }
  0xa2   : > { %18849 = vmatprep.subr.bf16.mxu0 %v19545_v3  ;;  %17647 = vmatmul.mubr.f32.vlgmr.msra.gmra.mrb[4].mxu1 %v20089_v24 }
  0xa3   : > { %18935 = vmatpush3.bf16.msra.mxu1 %v19923_v27  ;;  %17723 = vmatprep.mubr.msk.f32.mxu1 %vm19546_vm0, %v19547_v15 }
  0xa4   : > { %17559 = vmatmul.mubr.f32.vlgmr.msra.gmra.mrb[6].mxu0 %v20109_v50  ;;  %18936 = vmatprep.subr.bf16.mxu1 %v19545_v3 }
  0xa5   : > { %18851 = vmatpush3.bf16.msra.mxu0 %v19891_v14  ;;  %17569 = vmatprep.mubr.msk.f32.mxu0 %vm19546_vm0, %v19547_v15 }
  0xa6   : > { %18852 = vmatprep.subr.bf16.mxu0 %v19545_v3 }
  0xa7   : > { %18938 = vmatpush3.bf16.msra.mxu1 %v19945_v34 }
  0xa8   : > { %18939 = vmatprep.subr.bf16.mxu1 %v19545_v3 }
  0xa9   : > { %18854 = vmatpush3.bf16.msra.mxu0 %v19907_v21  ;;  %v16615_v21 = vld [vmem:[%s21433_s3 + $0x3] ss:$0 sm:$0xff] }
  0xaa   : > { %18855 = vmatprep.subr.bf16.mxu0 %v19545_v3  ;;  %17724 = vmatmul.mubr.f32.vlgmr.msra.gmra.mrb[6].mxu1 %v20139_v56 }
  0xab   : > { %18941 = vmatpush3.bf16.msra.mxu1 %v19971_v46  ;;  %17734 = vmatprep.mubr.msk.f32.mxu1 %vm19546_vm0, %v19547_v15 }
  0xac   : > { %17570 = vmatmul.mubr.f32.vlgmr.msra.gmra.mrb[6].mxu0 %v20089_v24  ;;  %18942 = vmatprep.subr.bf16.mxu1 %v19545_v3 }
  0xad   : > { %18857 = vmatpush3.bf16.msra.mxu0 %v19693_v16  ;;  %17580 = vmatprep.mubr.msk.f32.mxu0 %vm19546_vm0, %v19547_v15 }
  0xae   : > { %18858 = vmatprep.subr.bf16.mxu0 %v19545_v3 }
  0xaf   : > { %18944 = vmatpush3.bf16.msra.mxu1 %v19983_v55 }
  0xb0   : > { %18945 = vmatprep.subr.bf16.mxu1 %v19545_v3 }
  0xb1   : > { %18860 = vmatpush3.bf16.msra.mxu0 %v19709_v22 }
  0xb2   : > { %18897 = vmatprep.subr.bf16.mxu0 %v19545_v3  ;;  %17735 = vmatmul.mubr.f32.vlgmr.msra.gmra.mrb[6].mxu1 %v20089_v24 }
  0xb3   : > { %18947 = vmatpush3.bf16.msra.mxu1 %v19999_v8  ;;  %17745 = vmatprep.mubr.msk.f32.mxu1 %vm19546_vm0, %v19547_v15 }
  0xb4   : > { %17581 = vmatmul.mubr.f32.vlgmr.msra.gmra.mrb[6].mxu0 %v20089_v24  ;;  %18948 = vmatprep.subr.bf16.mxu1 %v19545_v3 }
  0xb5   : > { %18899 = vmatpush3.bf16.msra.mxu0 %v19995_v7  ;;  %17657 = vmatprep.mubr.msk.f32.mxu0 %vm19546_vm0, %v19547_v15 }
  0xb6   : > { %18900 = vmatprep.subr.bf16.mxu0 %v19545_v3 }
  0xb7   : > { %18950 = vmatpush3.bf16.msra.mxu1 %v20019_v18 }
  0xb8   : > { %18951 = vmatprep.subr.bf16.mxu1 %v19545_v3 }
  0xb9   : > { %18902 = vmatpush3.bf16.msra.mxu0 %v20015_v17 }
  0xba   : > { %18903 = vmatprep.subr.bf16.mxu0 %v19545_v3  ;;  %17746 = vmatmul.mubr.f32.vlgmr.msra.gmra.mrb[6].mxu1 %v20098_v25 }
  0xbb   : > { %18953 = vmatpush3.bf16.msra.mxu1 %v19923_v27  ;;  %17756 = vmatprep.mubr.msk.f32.mxu1 %vm19546_vm0, %v19547_v15 }
  0xbc   : > { %17658 = vmatmul.mubr.f32.vlgmr.msra.gmra.mrb[8].mxu0 %v20139_v56  ;;  %18954 = vmatprep.subr.bf16.mxu1 %v19545_v3 }
  0xbd   : > { %18905 = vmatpush3.bf16.msra.mxu0 %v20037_v35  ;;  %17668 = vmatprep.mubr.msk.f32.mxu0 %vm19546_vm0, %v19547_v15 }
  0xbe   : > { %18906 = vmatprep.subr.bf16.mxu0 %v19545_v3 }
  0xbf   : > { %18956 = vmatpush3.bf16.msra.mxu1 %v19945_v34 }
  0xc0   : > { %18957 = vmatprep.subr.bf16.mxu1 %v19545_v3 }
  0xc1   : > { %18908 = vmatpush3.bf16.msra.mxu0 %v20045_v38 }
  0xc2   : > { %18909 = vmatprep.subr.bf16.mxu0 %v19545_v3  ;;  %17757 = vmatmul.mubr.f32.vlgmr.msra.gmra.mrb[6].mxu1 %v20109_v50 }
  0xc3   : > { %18959 = vmatpush3.bf16.msra.mxu1 %v20063_v39  ;;  %17767 = vmatprep.mubr.msk.f32.mxu1 %vm19546_vm0, %v19547_v15 }
  0xc4   : > { %17669 = vmatmul.mubr.f32.vlgmr.msra.gmra.mrb[8].mxu0 %v20089_v24  ;;  %18960 = vmatprep.subr.bf16.mxu1 %v19545_v3 }
  0xc5   : > { %18911 = vmatpush3.bf16.msra.mxu0 %v20057_v62  ;;  %17679 = vmatprep.mubr.msk.f32.mxu0 %vm19546_vm0, %v19547_v15 }
  0xc6   : > { %18912 = vmatprep.subr.bf16.mxu0 %v19545_v3 }
  0xc7   : > { %18962 = vmatpush3.bf16.msra.mxu1 %v20080_v20 }
  0xc8   : > { %18963 = vmatprep.subr.bf16.mxu1 %v19545_v3 }
  0xc9   : > { %18914 = vmatpush3.bf16.msra.mxu0 %v20074_v19 }
  0xca   : > { %18915 = vmatprep.subr.bf16.mxu0 %v19545_v3  ;;  %17768 = vmatmul.mubr.f32.vlgmr.msra.gmra.mrb[6].mxu1 %v20089_v24 }
  0xcb   : > { %18965 = vmatpush3.bf16.msra.mxu1 %v19923_v27  ;;  %17778 = vmatprep.mubr.msk.f32.mxu1 %vm19546_vm0, %v19547_v15 }
  0xcc   : > { %17680 = vmatmul.mubr.f32.vlgmr.msra.gmra.mrb[8].mxu0 %v20098_v25  ;;  %18966 = vmatprep.subr.bf16.mxu1 %v19545_v3 }
  0xcd   : > { %18917 = vmatpush3.bf16.msra.mxu0 %v19995_v7  ;;  %17690 = vmatprep.mubr.msk.f32.mxu0 %vm19546_vm0, %v19547_v15 }
  0xce   : > { %18918 = vmatprep.subr.bf16.mxu0 %v19545_v3 }
  0xcf   : > { %18968 = vmatpush3.bf16.msra.mxu1 %v19945_v34 }
  0xd0   : > { %17811 = vmatprep.subr.mxu1 %v19547_v15 }
  0xd1   : > { %18920 = vmatpush3.bf16.msra.mxu0 %v20015_v17 }
  0xd2   : > { %18921 = vmatprep.subr.bf16.mxu0 %v19545_v3  ;;  %17779 = vmatmul.mubr.f32.vlgmr.msra.gmra.mrb[6].mxu1 %v20089_v24 }
  0xd3   : > { %17813 = vmatprep.mubr.msk.f32.mxu1 %vm19546_vm0, %v19547_v15 }
  0xd4   : > { %17691 = vmatmul.mubr.f32.vlgmr.msra.gmra.mrb[8].mxu0 %v20109_v50 }
  0xd5   : > { %18923 = vmatpush3.bf16.msra.mxu0 %v20117_v26  ;;  %17701 = vmatprep.mubr.msk.f32.mxu0 %vm19546_vm0, %v19547_v15 }
  0xd6   : > { %18924 = vmatprep.subr.bf16.mxu0 %v19545_v3 }
  0xd9   : > { %18926 = vmatpush3.bf16.msra.mxu0 %v20131_v31 }
  0xda   : > { %18927 = vmatprep.subr.bf16.mxu0 %v19545_v3 }
  0xdc   : > { %17702 = vmatmul.mubr.f32.vlgmr.msra.gmra.mrb[8].mxu0 %v20089_v24 }
  0xdd   : > { %18929 = vmatpush3.bf16.msra.mxu0 %v19995_v7  ;;  %17712 = vmatprep.mubr.msk.f32.mxu0 %vm19546_vm0, %v19547_v15 }
  0xde   : > { %18930 = vmatprep.subr.bf16.mxu0 %v19545_v3  ;;  %v16613_v3 = vld [vmem:[%s21433_s3 + $0x1] ss:$0 sm:$0xff] }
  0xe1   : > { %18932 = vmatpush3.bf16.msra.mxu0 %v20015_v17 }
  0xe2   : > { %17781 = vmatprep.subr.mxu0 %v19547_v15 }
  0xe4   : > { %17713 = vmatmul.mubr.f32.vlgmr.msra.gmra.mrb[8].mxu0 %v20089_v24 }
  0xe5   : > { %17783 = vmatprep.mubr.msk.f32.mxu0 %vm19546_vm0, %v19547_v15 }
 0x115   : > { %v1369_v16 = vpop.f32.mrb[0].mxu1 }
 0x116   : > { %v17384_v22 = vpop.f32.mrb[1].mxu1 }
 0x11f   : > { %v884_v48 = vpop.f32.mrb[0].mxu0 }
 0x120   : > { %v20322_v52 = vadd.f32 %v16612_v47, %v884_v48  ;;  %v17318_v58 = vpop.f32.mrb[1].mxu0 }
 0x122   : > { %4287 = vrot.lane.b32.xlu0 %v20322_v52, %s19548_s27  ;;  %v4290_v43 = vsel %vm4289_vm2, %v20322_v52, 0 }
 0x123   : > { %v20358_v49 = vand.u32 4294901760, %v4290_v43 }
 0x125   : > { %v4361_v51 = vsub.f32 %v4290_v43, %v20358_v49 }
 0x127   : > { %v963_v59 = vpop.f32.mrb[2].mxu0  ;;  %v4362_v54 = vand.u32 4294901760, %v4361_v51 }
 0x128   : > { %v964_v63 = vadd.f32 %v16613_v3, %v963_v59  ;;  %v17329_v0 = vpop.f32.mrb[3].mxu0 }
 0x129   : > { %v4363_v61 = vsub.f32 %v4361_v51, %v4362_v54 }
 0x12a   : > { %v20329_v1 = vadd.f32 %v1369_v16, %v964_v63 }
 0x12b   : > { %v4364_v11 = vand.u32 4294901760, %v4363_v61 }
 0x12c   : > { %4741 = vrot.lane.b32.xlu0 %v20329_v1, %s19548_s27  ;;  %v4743_v53 = vsel %vm4289_vm2, %v20329_v1, 0 }
 0x12d   : > { %v20365_v55 = vand.u32 4294901760, %v4743_v53 }
 0x12f   : > { %v4814_v8 = vsub.f32 %v4743_v53, %v20365_v55 }
 0x131   : > { %v4815_v13 = vand.u32 4294901760, %v4814_v8 }
 0x133   : > { %v4816_v32 = vsub.f32 %v4814_v8, %v4815_v13 }
 0x135   : > { %v4817_v36 = vand.u32 4294901760, %v4816_v32 }
 0x145   : > { %v2339_v4 = vpop.f32.mrb[2].mxu1 }
 0x146   : > { %v17516_v2 = vpop.f32.mrb[3].mxu1  ;;  %v20346_v27 = vadd.f32 %v16615_v21, %v2339_v4 }
 0x148   : > { %v5649_v26 = vsel %vm4289_vm2, %v20346_v27, 0 }
 0x149   : > { %v20420_v30 = vand.u32 4294901760, %v5649_v26 }
 0x14b   : > { %v5720_v56 = vsub.f32 %v5649_v26, %v20420_v30 }
 0x14d   : > { %v5721_v58 = vand.u32 4294901760, %v5720_v56 }
 0x14f   : > { %v5722_v2 = vsub.f32 %v5720_v56, %v5721_v58 }
 0x157   : > { %v1854_v6 = vpop.f32.mrb[4].mxu0 }
 0x158   : > { %v20339_v9 = vadd.f32 %v20336_v5, %v1854_v6  ;;  %v17450_v14 = vpop.f32.mrb[5].mxu0 }
 0x15a   : > { %5194 = vrot.lane.b32.xlu1 %v20339_v9, %s19548_s27  ;;  %v5196_v25 = vsel %vm4289_vm2, %v20339_v9, 0 }
 0x15b   : > { %v20413_v50 = vand.u32 4294901760, %v5196_v25 }
 0x15d   : > { %v5267_v31 = vsub.f32 %v5196_v25, %v20413_v50 }
 0x15e   : > { %5647 = vrot.lane.b32.xlu1 %v20346_v27, %s19548_s27 }
 0x15f   : > { %v5268_v16 = vand.u32 4294901760, %v5267_v31 }
 0x161   : > { %v5269_v48 = vsub.f32 %v5267_v31, %v5268_v16 }
 0x163   : > { %v5270_v4 = vand.u32 4294901760, %v5269_v48 }
 0x175   : > { %v3312_v34 = vpop.f32.mrb[4].mxu1 }
 0x176   : > { %v20350_v41 = vadd.f32 %v16613_v3, %v3312_v34  ;;  %v17648_v42 = vpop.f32.mrb[5].mxu1  ;;  %v5723_v34 = vand.u32 4294901760, %v5722_v2 }
 0x178   : > { %6553 = vrot.lane.b32.xlu1 %v20350_v41, %s19548_s27 }
 0x187   : > { %v2827_v44 = vpop.f32.mrb[6].mxu0 }
 0x188   : > { %v20356_v45 = vadd.f32 %v16612_v47, %v2827_v44  ;;  %v17582_v46 = vpop.f32.mrb[7].mxu0 }
 0x18a   : > { %6100 = vrot.lane.b32.xlu0 %v20356_v45, %s19548_s27  ;;  %v6102_v53 = vsel %vm4289_vm2, %v20356_v45, 0 }
 0x194   : > { %v4288_v57 = vpop.permute.xlu0 %4287 }
 0x195   : > { %v4292_v60 = vsel %vm4289_vm2, %v4288_v57, 0  ;;  %v20467_v57 = vand.u32 4294901760, %v6102_v53 }
 0x196   : > { %v4295_v7 = vand.u32 4294901760, %v4292_v60 }
 0x198   : > { %v4372_v10 = vsub.f32 %v4292_v60, %v4295_v7  ;;  %17782 = vmatpush3.xpose.msra.mxu0 %v4295_v7 }
 0x199   : > { %17786 = vmatprep.subr.mxu0 %v19547_v15 }
 0x19a   : > { %v4373_v12 = vand.u32 4294901760, %v4372_v10 }
 0x19b   : > { %17784 = vmatmul.mubr.f32.vlgmr.msra.gmra.mrb[10].mxu0 %v4364_v11 }
 0x19c   : > { %v4374_v17 = vsub.f32 %v4372_v10, %v4373_v12  ;;  %17788 = vmatprep.mubr.msk.f32.mxu0 %vm19546_vm0, %v19547_v15 }
 0x19e   : > { %v4375_v18 = vand.u32 4294901760, %v4374_v17  ;;  %v4742_v28 = vpop.permute.xlu0 %4741 }
 0x19f   : > { %v4745_v29 = vsel %vm4289_vm2, %v4742_v28, 0 }
 0x1a0   : > { %v4748_v33 = vand.u32 4294901760, %v4745_v29  ;;  %17787 = vmatpush3.xpose.msra.mxu0 %v4375_v18 }
 0x1a1   : > { %17791 = vmatprep.subr.mxu0 %v19547_v15 }
 0x1a2   : > { %v4825_v35 = vsub.f32 %v4745_v29, %v4748_v33  ;;  %17812 = vmatpush3.xpose.msra.mxu1 %v4748_v33 }
 0x1a3   : > { %17789 = vmatmul.mubr.f32.vlgmr.msra.gmra.mrb[10].mxu0 %v20358_v49  ;;  %17816 = vmatprep.subr.mxu1 %v19547_v15 }
 0x1a4   : > { %v4826_v37 = vand.u32 4294901760, %v4825_v35  ;;  %17792 = vmatpush3.xpose.msra.mxu0 %v4372_v10  ;;  %17793 = vmatprep.mubr.msk.f32.mxu0 %vm19546_vm0, %v19547_v15 }
 0x1a5   : > { %17814 = vmatmul.mubr.f32.vlgmr.msra.gmra.mrb[8].mxu1 %v4817_v36  ;;  %17796 = vmatprep.subr.mxu0 %v19547_v15  ;;  %v4282_v62 = vpop.f32.mrb[6].mxu1 }
 0x1a6   : > { %v4827_v38 = vsub.f32 %v4825_v35, %v4826_v37  ;;  %17818 = vmatprep.mubr.msk.f32.mxu1 %vm19546_vm0, %v19547_v15  ;;  %v20381_v40 = vadd.f32 %v16615_v21, %v4282_v62  ;;  %v17780_v19 = vpop.f32.mrb[7].mxu1 }
 0x1a8   : > { %v4828_v39 = vand.u32 4294901760, %v4827_v38  ;;  %7459 = vrot.lane.b32.xlu1 %v20381_v40, %s19548_s27  ;;  %v7461_v19 = vsel %vm4289_vm2, %v20381_v40, 0 }
 0x1aa   : > { %17817 = vmatpush3.xpose.msra.mxu1 %v4828_v39 }
 0x1ab   : > { %17794 = vmatmul.mubr.f32.vlgmr.msra.gmra.mrb[10].mxu0 %v4361_v51  ;;  %17821 = vmatprep.subr.mxu1 %v19547_v15  ;;  %v6555_v51 = vsel %vm4289_vm2, %v20350_v41, 0 }
 0x1ac   : > { %17797 = vmatpush3.xpose.msra.mxu0 %v4295_v7  ;;  %17798 = vmatprep.mubr.msk.f32.mxu0 %vm19546_vm0, %v19547_v15 }
 0x1ad   : > { %17819 = vmatmul.mubr.f32.vlgmr.msra.gmra.mrb[8].mxu1 %v20365_v55  ;;  %17801 = vmatprep.subr.mxu0 %v19547_v15 }
 0x1ae   : > { %17822 = vmatpush3.xpose.msra.mxu1 %v4825_v35  ;;  %17823 = vmatprep.mubr.msk.f32.mxu1 %vm19546_vm0, %v19547_v15 }
 0x1af   : > { %17826 = vmatprep.subr.mxu1 %v19547_v15 }
 0x1b3   : > { %17799 = vmatmul.mubr.f32.vlgmr.msra.gmra.mrb[10].mxu0 %v4362_v54 }
 0x1b4   : > { %17802 = vmatpush3.xpose.msra.mxu0 %v4373_v12  ;;  %17803 = vmatprep.mubr.msk.f32.mxu0 %vm19546_vm0, %v19547_v15 }
 0x1b5   : > { %17824 = vmatmul.mubr.f32.vlgmr.msra.gmra.mrb[8].mxu1 %v4814_v8  ;;  %17806 = vmatprep.subr.mxu0 %v19547_v15 }
 0x1b6   : > { %17827 = vmatpush3.xpose.msra.mxu1 %v4748_v33  ;;  %17828 = vmatprep.mubr.msk.f32.mxu1 %vm19546_vm0, %v19547_v15 }
 0x1b7   : > { %v3797_v20 = vpop.f32.mrb[8].mxu0  ;;  %17831 = vmatprep.subr.mxu1 %v19547_v15 }
 0x1b8   : > { %v20400_v23 = vadd.f32 %v20336_v5, %v3797_v20  ;;  %v17714_v24 = vpop.f32.mrb[9].mxu0 }
 0x1b9   : > { %v20516_v24 = vand.u32 4294901760, %v7461_v19 }
 0x1ba   : > { %7006 = vrot.lane.b32.xlu0 %v20400_v23, %s19548_s27  ;;  %s16628_s27 = sshll.u32 %s19625_s13, 8  ;;  %s21389_s13 = scalar_lea.sflag [#allocation3], %s338_s24 }
 0x1bb   : > { %17804 = vmatmul.mubr.f32.vlgmr.msra.gmra.mrb[10].mxu0 %v20358_v49  ;;  %s21384_s21 = scalar_lea.hbm %s21439_s9, %s16628_s27 }
 0x1bc   : > { %17807 = vmatpush3.xpose.msra.mxu0 %v4295_v7  ;;  %17808 = vmatprep.mubr.msk.f32.mxu0 %vm19546_vm0, %v19547_v15  ;;  %v6173_v7 = vsub.f32 %v6102_v53, %v20467_v57 }
 0x1bd   : > { %17829 = vmatmul.mubr.f32.vlgmr.msra.gmra.mrb[8].mxu1 %v4815_v13  ;;  %17841 = vmatprep.subr.mxu0 %v19547_v15 }
 0x1be   : > { %17832 = vmatpush3.xpose.msra.mxu1 %v4826_v37  ;;  %17833 = vmatprep.mubr.msk.f32.mxu1 %vm19546_vm0, %v19547_v15  ;;  %v6174_v10 = vand.u32 4294901760, %v6173_v7 }
 0x1bf   : > { %17836 = vmatprep.subr.mxu1 %v19547_v15 }
 0x1c0   : > { %v6175_v18 = vsub.f32 %v6173_v7, %v6174_v10 }
 0x1c2   : > { %v6176_v35 = vand.u32 4294901760, %v6175_v18 }
 0x1c3   : > { %17809 = vmatmul.mubr.f32.vlgmr.msra.gmra.mrb[10].mxu0 %v20358_v49 }
 0x1c4   : > { %17843 = vmatprep.mubr.msk.f32.mxu0 %vm19546_vm0, %v19547_v15 }
 0x1c5   : > { %17834 = vmatmul.mubr.f32.vlgmr.msra.gmra.mrb[8].mxu1 %v20365_v55 }
 0x1c6   : > { %17837 = vmatpush3.xpose.msra.mxu1 %v4748_v33  ;;  %17838 = vmatprep.mubr.msk.f32.mxu1 %vm19546_vm0, %v19547_v15 }
 0x1c7   : > { %17871 = vmatprep.subr.mxu1 %v19547_v15 }
 0x1cc   : > { %v5195_v22 = vpop.permute.xlu1 %5194 }
 0x1cd   : > { %v5198_v47 = vsel %vm4289_vm2, %v5195_v22, 0  ;;  %17839 = vmatmul.mubr.f32.vlgmr.msra.gmra.mrb[8].mxu1 %v20365_v55  ;;  %v20465_v55 = vand.u32 4294901760, %v6555_v51 }
 0x1ce   : > { %v5201_v3 = vand.u32 4294901760, %v5198_v47  ;;  %17873 = vmatprep.mubr.msk.f32.mxu1 %vm19546_vm0, %v19547_v15 }
 0x1cf   : > { %v6626_v61 = vsub.f32 %v6555_v51, %v20465_v55  ;;  %v19549_v51 = vmov 0  }
 0x1d0   : > { %v5278_v59 = vsub.f32 %v5198_v47, %v5201_v3  ;;  %17842 = vmatpush3.xpose.msra.mxu0 %v5201_v3  ;;  %v5648_v63 = vpop.permute.xlu1 %5647 }
 0x1d1   : > { %v5651_v0 = vsel %vm4289_vm2, %v5648_v63, 0  ;;  %17846 = vmatprep.subr.mxu0 %v19547_v15  ;;  %v6627_v11 = vand.u32 4294901760, %v6626_v61 }
 0x1d2   : > { %v5279_v5 = vand.u32 4294901760, %v5278_v59  ;;  %v5654_v6 = vand.u32 4294901760, %v5651_v0 }
 0x1d3   : > { %17844 = vmatmul.mubr.f32.vlgmr.msra.gmra.mrb[12].mxu0 %v5270_v4  ;;  %v6628_v28 = vsub.f32 %v6626_v61, %v6627_v11 }
 0x1d4   : > { %v5280_v14 = vsub.f32 %v5278_v59, %v5279_v5  ;;  %v5731_v21 = vsub.f32 %v5651_v0, %v5654_v6  ;;  %17872 = vmatpush3.xpose.msra.mxu1 %v5654_v6  ;;  %17848 = vmatprep.mubr.msk.f32.mxu0 %vm19546_vm0, %v19547_v15 }
 0x1d5   : > { %17876 = vmatprep.subr.mxu1 %v19547_v15  ;;  %v6629_v36 = vand.u32 4294901760, %v6628_v28 }
 0x1d6   : > { %v5281_v42 = vand.u32 4294901760, %v5280_v14  ;;  %v5732_v43 = vand.u32 4294901760, %v5731_v21 }
 0x1d7   : > { %17874 = vmatmul.mubr.f32.vlgmr.msra.gmra.mrb[10].mxu1 %v5723_v34 }
 0x1d8   : > { %v5733_v44 = vsub.f32 %v5731_v21, %v5732_v43  ;;  %17847 = vmatpush3.xpose.msra.mxu0 %v5281_v42  ;;  %17878 = vmatprep.mubr.msk.f32.mxu1 %vm19546_vm0, %v19547_v15 }
 0x1d9   : > { %17851 = vmatprep.subr.mxu0 %v19547_v15 }
 0x1da   : > { %v5734_v46 = vand.u32 4294901760, %v5733_v44  ;;  %v7919_v44 = vld [vmem:[%s20599_s26] sm:$0x1] }
 0x1db   : > { %17849 = vmatmul.mubr.f32.vlgmr.msra.gmra.mrb[12].mxu0 %v20413_v50  ;;  %vm7921_vm3 = vcmp.gt.f32.partialorder %v7919_v44, 0.5 }
 0x1dc   : > { %17852 = vmatpush3.xpose.msra.mxu0 %v5278_v59  ;;  %17877 = vmatpush3.xpose.msra.mxu1 %v5734_v46  ;;  %v7923_v53 = vsel %vm7921_vm3, 1, %v19549_v51 }
 0x1dd   : > { %17881 = vmatprep.subr.mxu1 %v19547_v15  ;;  %17853 = vmatprep.mubr.msk.f32.mxu0 %vm19546_vm0, %v19547_v15 }
 0x1de   : > { %17856 = vmatprep.subr.mxu0 %v19547_v15 }
 0x1df   : > { %17879 = vmatmul.mubr.f32.vlgmr.msra.gmra.mrb[10].mxu1 %v20420_v30 }
 0x1e0   : > { %17882 = vmatpush3.xpose.msra.mxu1 %v5731_v21  ;;  %17883 = vmatprep.mubr.msk.f32.mxu1 %vm19546_vm0, %v19547_v15 }
 0x1e1   : > { %17886 = vmatprep.subr.mxu1 %v19547_v15 }
 0x1e3   : > { %17854 = vmatmul.mubr.f32.vlgmr.msra.gmra.mrb[12].mxu0 %v5267_v31 }
 0x1e4   : > { %17857 = vmatpush3.xpose.msra.mxu0 %v5201_v3  ;;  %17858 = vmatprep.mubr.msk.f32.mxu0 %vm19546_vm0, %v19547_v15 }
 0x1e5   : > { %17861 = vmatprep.subr.mxu0 %v19547_v15 }
 0x1e7   : > { %17884 = vmatmul.mubr.f32.vlgmr.msra.gmra.mrb[10].mxu1 %v5720_v56 }
 0x1e8   : > { %17887 = vmatpush3.xpose.msra.mxu1 %v5654_v6  ;;  %17888 = vmatprep.mubr.msk.f32.mxu1 %vm19546_vm0, %v19547_v15 }
 0x1e9   : > { %17891 = vmatprep.subr.mxu1 %v19547_v15 }
 0x1ea   : > { %v6554_v49 = vpop.permute.xlu1 %6553 }
 0x1eb   : > { %17859 = vmatmul.mubr.f32.vlgmr.msra.gmra.mrb[12].mxu0 %v5268_v16  ;;  %v6557_v54 = vsel %vm4289_vm2, %v6554_v49, 0 }
 0x1ec   : > { %17862 = vmatpush3.xpose.msra.mxu0 %v5279_v5  ;;  %17863 = vmatprep.mubr.msk.f32.mxu0 %vm19546_vm0, %v19547_v15  ;;  %v20470_v60 = vand.u32 4294901760, %v6557_v54 }
 0x1ed   : > { %17866 = vmatprep.subr.mxu0 %v19547_v15 }
 0x1ee   : > { %v6637_v8 = vsub.f32 %v6557_v54, %v20470_v60 }
 0x1ef   : > { %17889 = vmatmul.mubr.f32.vlgmr.msra.gmra.mrb[10].mxu1 %v5721_v58 }
 0x1f0   : > { %17892 = vmatpush3.xpose.msra.mxu1 %v5732_v43  ;;  %17893 = vmatprep.mubr.msk.f32.mxu1 %vm19546_vm0, %v19547_v15  ;;  %v6638_v12 = vand.u32 4294901760, %v6637_v8  ;;  %v7925_v43 = vlaneseq }
 0x1f1   : > { %17896 = vmatprep.subr.mxu1 %v19547_v15 }
 0x1f2   : > { %v6639_v29 = vsub.f32 %v6637_v8, %v6638_v12  ;;  %v7926_v46 = vshrl.u32 %v7925_v43, 7 }
 0x1f3   : > { %17864 = vmatmul.mubr.f32.vlgmr.msra.gmra.mrb[12].mxu0 %v20413_v50 }
 0x1f4   : > { %17867 = vmatpush3.xpose.msra.mxu0 %v5201_v3  ;;  %17868 = vmatprep.mubr.msk.f32.mxu0 %vm19546_vm0, %v19547_v15  ;;  %v6640_v37 = vand.u32 4294901760, %v6639_v29  ;;  %v7927_v49 = vsub.s32 0, %v7926_v46 }
 0x1f5   : > { %17901 = vmatprep.subr.mxu0 %v19547_v15 }
 0x1f6   : > { %v7928_v54 = vrot.slane %v7923_v53, %v7927_v49 }
 0x1f7   : > { %17894 = vmatmul.mubr.f32.vlgmr.msra.gmra.mrb[10].mxu1 %v20420_v30 }
 0x1f8   : > { %17897 = vmatpush3.xpose.msra.mxu1 %v5654_v6  ;;  %17898 = vmatprep.mubr.msk.f32.mxu1 %vm19546_vm0, %v19547_v15  ;;  %vm7933_vm4 = vcmp.eq.s32.totalorder %v7928_v54, 1 }
 0x1f9   : > { %17931 = vmatprep.subr.mxu1 %v19547_v15 }
 0x1fb   : > { %17869 = vmatmul.mubr.f32.vlgmr.msra.gmra.mrb[12].mxu0 %v20413_v50  ;;  %v7008_v50 = vsel %vm4289_vm2, %v20400_v23, 0 }
 0x1fc   : > { %v6101_v13 = vpop.permute.xlu0 %6100  ;;  %17903 = vmatprep.mubr.msk.f32.mxu0 %vm19546_vm0, %v19547_v15  ;;  %v20530_v31 = vand.u32 4294901760, %v7008_v50 }
 0x1fd   : > { %v6104_v17 = vsel %vm4289_vm2, %v6101_v13, 0 }
 0x1fe   : > { %v6107_v32 = vand.u32 4294901760, %v6104_v17  ;;  %v7079_v16 = vsub.f32 %v7008_v50, %v20530_v31 }
 0x1ff   : > { %17899 = vmatmul.mubr.f32.vlgmr.msra.gmra.mrb[10].mxu1 %v20420_v30  ;;  %v7532_v30 = vsub.f32 %v7461_v19, %v20516_v24 }
 0x200   : > { %v6184_v33 = vsub.f32 %v6104_v17, %v6107_v32  ;;  %17932 = vmatpush3.xpose.msra.mxu1 %v20470_v60  ;;  %17902 = vmatpush3.xpose.msra.mxu0 %v6107_v32  ;;  %v7080_v58 = vand.u32 4294901760, %v7079_v16 }
 0x201   : > { %17933 = vmatprep.mubr.msk.f32.mxu1 %vm19546_vm0, %v19547_v15  ;;  %17936 = vmatprep.subr.mxu1 %v19547_v15  ;;  %v7533_v22 = vand.u32 4294901760, %v7532_v30 }
 0x202   : > { %v6185_v38 = vand.u32 4294901760, %v6184_v33  ;;  %17906 = vmatprep.subr.mxu0 %v19547_v15  ;;  %v7081_v4 = vsub.f32 %v7079_v16, %v7080_v58 }
 0x203   : > { %17904 = vmatmul.mubr.f32.vlgmr.msra.gmra.mrb[14].mxu0 %v6176_v35  ;;  %17934 = vmatmul.mubr.f32.vlgmr.msra.gmra.mrb[12].mxu1 %v6629_v36  ;;  %v7534_v48 = vsub.f32 %v7532_v30, %v7533_v22 }
 0x204   : > { %v6186_v62 = vsub.f32 %v6184_v33, %v6185_v38  ;;  %17937 = vmatpush3.xpose.msra.mxu1 %v6640_v37  ;;  %17908 = vmatprep.mubr.msk.f32.mxu0 %vm19546_vm0, %v19547_v15  ;;  %v7082_v14 = vand.u32 4294901760, %v7081_v4 }
 0x205   : > { %17938 = vmatprep.mubr.msk.f32.mxu1 %vm19546_vm0, %v19547_v15  ;;  %17941 = vmatprep.subr.mxu1 %v19547_v15  ;;  %v7535_v0 = vand.u32 4294901760, %v7534_v48 }
 0x206   : > { %v6187_v39 = vand.u32 4294901760, %v6186_v62  ;;  %v7920_v62 = vld [vmem:[%s20599_s26 + $0x1] sm:$0x1]  ;;  %s16608_s26 = sshll.u32 %s338_s24, 4 }
 0x207   : > { %vm7922_vm5 = vcmp.gt.f32.partialorder %v7920_v62, 0.5  ;;  %s340_s28 = scalar_lea.vmem [#allocation2], %s16608_s26  ;;  %s19485_s26 = sshll.u32 %s19551_s23, 4  ;;  %s19486_s26 = int_to_ptr.vmem [resolvable:$false] %s19485_s26 }
 0x208   : > { %17907 = vmatpush3.xpose.msra.mxu0 %v6187_v39  ;;  %v7924_v39 = vsel %vm7922_vm5, 1, %v19549_v51  ;;  %s16533_s14 = sshll.u32 %s340_s28, 4  ;;  %s21386_s14 = int_to_ptr.vmem [resolvable:$true] %s16533_s14 }
 0x209   : > { %17911 = vmatprep.subr.mxu0 %v19547_v15  ;;  %v7932_v19 = vrot.slane %v7924_v39, %v7927_v49  ;;  %s19481_s22 = scalar_lea.vmem %s21386_s14, 256  ;;  %p19488_p0 = scmp.lt.s32.totalorder %s21386_s14, %s19486_s26 }
 0x20a   : > { %p19482_p11 = scmp.ne.s32.totalorder %s21386_s14, %s19481_s22 }
 0x20b   : > { %17909 = vmatmul.mubr.f32.vlgmr.msra.gmra.mrb[14].mxu0 %v20467_v57  ;;  %17939 = vmatmul.mubr.f32.vlgmr.msra.gmra.mrb[12].mxu1 %v20465_v55  ;;  %vm7934_vm6 = vcmp.eq.s32.totalorder %v7932_v19, 1 }
 0x20c   : > { %17942 = vmatpush3.xpose.msra.mxu1 %v6637_v8  ;;  %17912 = vmatpush3.xpose.msra.mxu0 %v6184_v33  ;;  %p19483_p12 = pnand %p19482_p11, %p19642_p5 }
 0x20d   : > { %17913 = vmatprep.mubr.msk.f32.mxu0 %vm19546_vm0, %v19547_v15  ;;  %17916 = vmatprep.subr.mxu0 %v19547_v15 }
 0x20e   : > { %17943 = vmatprep.mubr.msk.f32.mxu1 %vm19546_vm0, %v19547_v15  ;;  %17946 = vmatprep.subr.mxu1 %v19547_v15  ;;  %p19484_p13 = pneg %p19483_p12 }
 0x213   : > { %17914 = vmatmul.mubr.f32.vlgmr.msra.gmra.mrb[14].mxu0 %v6173_v7  ;;  %17944 = vmatmul.mubr.f32.vlgmr.msra.gmra.mrb[12].mxu1 %v6626_v61 }
 0x214   : > { %17917 = vmatpush3.xpose.msra.mxu0 %v6107_v32  ;;  %17947 = vmatpush3.xpose.msra.mxu1 %v20470_v60 }
 0x215   : > { %17918 = vmatprep.mubr.msk.f32.mxu0 %vm19546_vm0, %v19547_v15  ;;  %17921 = vmatprep.subr.mxu0 %v19547_v15 }
 0x216   : > { %17948 = vmatprep.mubr.msk.f32.mxu1 %vm19546_vm0, %v19547_v15  ;;  %17951 = vmatprep.subr.mxu1 %v19547_v15 }
 0x21a   : > { %v7460_v20 = vpop.permute.xlu1 %7459 }
 0x21b   : > { %17919 = vmatmul.mubr.f32.vlgmr.msra.gmra.mrb[14].mxu0 %v6174_v10  ;;  %17949 = vmatmul.mubr.f32.vlgmr.msra.gmra.mrb[12].mxu1 %v6627_v11  ;;  %v7463_v25 = vsel %vm4289_vm2, %v7460_v20, 0 }
 0x21c   : > { %17922 = vmatpush3.xpose.msra.mxu0 %v6185_v38  ;;  %17952 = vmatpush3.xpose.msra.mxu1 %v6638_v12  ;;  %v20524_v26 = vand.u32 4294901760, %v7463_v25 }
 0x21d   : > { %17923 = vmatprep.mubr.msk.f32.mxu0 %vm19546_vm0, %v19547_v15  ;;  %17926 = vmatprep.subr.mxu0 %v19547_v15 }
 0x21e   : > { %17953 = vmatprep.mubr.msk.f32.mxu1 %vm19546_vm0, %v19547_v15  ;;  %17956 = vmatprep.subr.mxu1 %v19547_v15  ;;  %v7543_v56 = vsub.f32 %v7463_v25, %v20524_v26 }
 0x220   : > { %v7544_v47 = vand.u32 4294901760, %v7543_v56 }
 0x222   : > { %v7545_v3 = vsub.f32 %v7543_v56, %v7544_v47 }
 0x223   : > { %17924 = vmatmul.mubr.f32.vlgmr.msra.gmra.mrb[14].mxu0 %v20467_v57  ;;  %17954 = vmatmul.mubr.f32.vlgmr.msra.gmra.mrb[12].mxu1 %v20465_v55 }
 0x224   : > { %17927 = vmatpush3.xpose.msra.mxu0 %v6107_v32  ;;  %17957 = vmatpush3.xpose.msra.mxu1 %v20470_v60  ;;  %v7546_v2 = vand.u32 4294901760, %v7545_v3 }
 0x225   : > { %17928 = vmatprep.mubr.msk.f32.mxu0 %vm19546_vm0, %v19547_v15  ;;  %17958 = vmatprep.mubr.msk.f32.mxu1 %vm19546_vm0, %v19547_v15 }
 0x226   : > { %17991 = vmatprep.subr.mxu1 %v19547_v15  ;;  %17961 = vmatprep.subr.mxu0 %v19547_v15 }
 0x22b   : > { %17929 = vmatmul.mubr.f32.vlgmr.msra.gmra.mrb[14].mxu0 %v20467_v57  ;;  %17959 = vmatmul.mubr.f32.vlgmr.msra.gmra.mrb[12].mxu1 %v20465_v55 }
 0x22c   : > { %17992 = vmatpush3.xpose.msra.mxu1 %v20524_v26  ;;  %v7007_v59 = vpop.permute.xlu0 %7006  ;;  %17993 = vmatprep.mubr.msk.f32.mxu1 %vm19546_vm0, %v19547_v15 }
 0x22d   : > { %v7010_v63 = vsel %vm4289_vm2, %v7007_v59, 0  ;;  %17996 = vmatprep.subr.mxu1 %v19547_v15  ;;  %17963 = vmatprep.mubr.msk.f32.mxu0 %vm19546_vm0, %v19547_v15 }
 0x22e   : > { %v7013_v5 = vand.u32 4294901760, %v7010_v63 }
 0x22f   : > { %17994 = vmatmul.mubr.f32.vlgmr.msra.gmra.mrb[14].mxu1 %v7535_v0 }
 0x230   : > { %v7090_v6 = vsub.f32 %v7010_v63, %v7013_v5  ;;  %17997 = vmatpush3.xpose.msra.mxu1 %v7546_v2  ;;  %17962 = vmatpush3.xpose.msra.mxu0 %v7013_v5 }
 0x231   : > { %17998 = vmatprep.mubr.msk.f32.mxu1 %vm19546_vm0, %v19547_v15  ;;  %18001 = vmatprep.subr.mxu1 %v19547_v15 }
 0x232   : > { %v7091_v21 = vand.u32 4294901760, %v7090_v6  ;;  %17966 = vmatprep.subr.mxu0 %v19547_v15 }
 0x233   : > { %17964 = vmatmul.mubr.f32.vlgmr.msra.gmra.mrb[16].mxu0 %v7082_v14 }
 0x234   : > { %v7092_v34 = vsub.f32 %v7090_v6, %v7091_v21  ;;  %17968 = vmatprep.mubr.msk.f32.mxu0 %vm19546_vm0, %v19547_v15 }
 0x236   : > { %v7093_v42 = vand.u32 4294901760, %v7092_v34 }
 0x237   : > { %17999 = vmatmul.mubr.f32.vlgmr.msra.gmra.mrb[14].mxu1 %v20516_v24 }
 0x238   : > { %18002 = vmatpush3.xpose.msra.mxu1 %v7543_v56  ;;  %17967 = vmatpush3.xpose.msra.mxu0 %v7093_v42 }
 0x239   : > { %17971 = vmatprep.subr.mxu0 %v19547_v15  ;;  %18003 = vmatprep.mubr.msk.f32.mxu1 %vm19546_vm0, %v19547_v15 }
 0x23a   : > { %18006 = vmatprep.subr.mxu1 %v19547_v15 }
 0x23b   : > { %17969 = vmatmul.mubr.f32.vlgmr.msra.gmra.mrb[16].mxu0 %v20530_v31 }
 0x23c   : > { %17972 = vmatpush3.xpose.msra.mxu0 %v7090_v6  ;;  %17973 = vmatprep.mubr.msk.f32.mxu0 %vm19546_vm0, %v19547_v15 }
 0x23d   : > { %17976 = vmatprep.subr.mxu0 %v19547_v15 }
 0x23f   : > { %18004 = vmatmul.mubr.f32.vlgmr.msra.gmra.mrb[14].mxu1 %v7532_v30 }
 0x240   : > { %18007 = vmatpush3.xpose.msra.mxu1 %v20524_v26  ;;  %18008 = vmatprep.mubr.msk.f32.mxu1 %vm19546_vm0, %v19547_v15 }
 0x241   : > { %18011 = vmatprep.subr.mxu1 %v19547_v15 }
 0x243   : > { %17974 = vmatmul.mubr.f32.vlgmr.msra.gmra.mrb[16].mxu0 %v7079_v16 }
 0x244   : > { %17977 = vmatpush3.xpose.msra.mxu0 %v7013_v5  ;;  %17978 = vmatprep.mubr.msk.f32.mxu0 %vm19546_vm0, %v19547_v15 }
 0x245   : > { %17981 = vmatprep.subr.mxu0 %v19547_v15 }
 0x247   : > { %18009 = vmatmul.mubr.f32.vlgmr.msra.gmra.mrb[14].mxu1 %v7533_v22 }
 0x248   : > { %18012 = vmatpush3.xpose.msra.mxu1 %v7544_v47  ;;  %18013 = vmatprep.mubr.msk.f32.mxu1 %vm19546_vm0, %v19547_v15 }
 0x249   : > { %18016 = vmatprep.subr.mxu1 %v19547_v15 }
 0x24b   : > { %17979 = vmatmul.mubr.f32.vlgmr.msra.gmra.mrb[16].mxu0 %v7080_v58 }
 0x24c   : > { %17982 = vmatpush3.xpose.msra.mxu0 %v7091_v21  ;;  %17983 = vmatprep.mubr.msk.f32.mxu0 %vm19546_vm0, %v19547_v15 }
 0x24d   : > { %17986 = vmatprep.subr.mxu0 %v19547_v15 }
 0x24f   : > { %18014 = vmatmul.mubr.f32.vlgmr.msra.gmra.mrb[14].mxu1 %v20516_v24 }
 0x250   : > { %18017 = vmatpush3.xpose.msra.mxu1 %v20524_v26  ;;  %18018 = vmatprep.mubr.msk.f32.mxu1 %vm19546_vm0, %v19547_v15 }
 0x251   : > { %18051 = vmatprep.subr.mxu1 %v19547_v15 }
 0x253   : > { %17984 = vmatmul.mubr.f32.vlgmr.msra.gmra.mrb[16].mxu0 %v20530_v31 }
 0x254   : > { %17987 = vmatpush3.xpose.msra.mxu0 %v7013_v5  ;;  %17988 = vmatprep.mubr.msk.f32.mxu0 %vm19546_vm0, %v19547_v15 }
 0x255   : > { %18021 = vmatprep.subr.mxu0 %v19547_v15 }
 0x257   : > { %18019 = vmatmul.mubr.f32.vlgmr.msra.gmra.mrb[14].mxu1 %v20516_v24 }
 0x258   : > { %18053 = vmatprep.mubr.msk.f32.mxu1 %vm19546_vm0, %v19547_v15 }
 0x25b   : > { %17989 = vmatmul.mubr.f32.vlgmr.msra.gmra.mrb[16].mxu0 %v20530_v31 }
 0x25c   : > { %18023 = vmatprep.mubr.msk.f32.mxu0 %vm19546_vm0, %v19547_v15 }
 0x296   : > { %v4736_v55 = vpop.f32.mrb[10].mxu0 }
 0x297   : > { %v7911_v57 = vmul.f32 0.35355338, %v4736_v55  ;;  %v17810_v60 = vpop.f32.mrb[11].mxu0 }
 0x299   : > { %v7935_v61 = vsel %vm7933_vm4, -1e+09, %v7911_v57 }
 0x29a   : > { %v7943_v7 = vsel %vm4289_vm2, %v7935_v61, -inf }
 0x29b   : > { %7944 = vmax.xlane.f32.xlu0 %v7943_v7 }
 0x2a0   : > { %v5189_v8 = vpop.f32.mrb[8].mxu1 }
 0x2a1   : > { %v7912_v10 = vmul.f32 0.35355338, %v5189_v8  ;;  %v17840_v11 = vpop.f32.mrb[9].mxu1 }
 0x2a3   : > { %v7936_v12 = vsel %vm7933_vm4, -1e+09, %v7912_v10 }
 0x2a4   : > { %v7946_v13 = vsel %vm4289_vm2, %v7936_v12, -inf }
 0x2a5   : > { %7947 = vmax.xlane.f32.xlu1 %v7946_v13 }
 0x2ce   : > { %v5642_v17 = vpop.f32.mrb[12].mxu0 }
 0x2cf   : > { %v7913_v18 = vmul.f32 0.35355338, %v5642_v17  ;;  %v17870_v28 = vpop.f32.mrb[13].mxu0 }
 0x2d1   : > { %v7937_v29 = vsel %vm7933_vm4, -1e+09, %v7913_v18 }
 0x2d2   : > { %v6095_v32 = vpop.f32.mrb[10].mxu1  ;;  %v7949_v33 = vsel %vm4289_vm2, %v7937_v29, -inf }
 0x2d3   : > { %v7914_v35 = vmul.f32 0.35355338, %v6095_v32  ;;  %v17900_v36 = vpop.f32.mrb[11].mxu1  ;;  %7950 = vmax.xlane.f32.xlu0 %v7949_v33 }
 0x2d5   : > { %v7938_v37 = vsel %vm7933_vm4, -1e+09, %v7914_v35 }
 0x2d6   : > { %v7952_v38 = vsel %vm4289_vm2, %v7938_v37, -inf }
 0x2d7   : > { %7953 = vmax.xlane.f32.xlu0 %v7952_v38 }
 0x2fe   : > { %v6548_v20 = vpop.f32.mrb[14].mxu0  ;;  %v7001_v24 = vpop.f32.mrb[12].mxu1 }
 0x2ff   : > { %v7915_v25 = vmul.f32 0.35355338, %v6548_v20  ;;  %v7916_v50 = vmul.f32 0.35355338, %v7001_v24  ;;  %v17930_v26 = vpop.f32.mrb[15].mxu0  ;;  %v17960_v30 = vpop.f32.mrb[13].mxu1 }
 0x301   : > { %v7940_v31 = vsel %vm7934_vm6, -1e+09, %v7916_v50  ;;  %v7939_v16 = vsel %vm7934_vm6, -1e+09, %v7915_v25 }
 0x302   : > { %v7958_v56 = vsel %vm4289_vm2, %v7940_v31, -inf  ;;  %v7955_v22 = vsel %vm4289_vm2, %v7939_v16, -inf }
 0x303   : > { %7959 = vmax.xlane.f32.xlu1 %v7958_v56 }
 0x307   : > { %7956 = vmax.xlane.f32.xlu1 %v7955_v22 }
 0x318   : > { %8031 = vrot.lane.b32.xlu1 %v20322_v52, %s19550_s25 }
 0x328   : > { %v7945_v47 = vpop.xlane.xlu0 %7944 }
 0x329   : > { %v7967_v48 = vsub.f32 %v7935_v61, %v7945_v47 }
 0x32a   : > { %v7907_v58 = vpop.f32.mrb[14].mxu1 }
 0x32b   : > { %v7975_v3 = vmul.f32 1.442695, %v7967_v48  ;;  %v18020_v59 = vpop.f32.mrb[15].mxu1  ;;  %v7918_v21 = vmul.f32 0.35355338, %v7907_v58 }
 0x32d   : > { %19431 = vpow2.f32 %v7975_v3  ;;  %v7942_v43 = vsel %vm7934_vm6, -1e+09, %v7918_v21 }
 0x32e   : > { %v7454_v63 = vpop.f32.mrb[16].mxu0  ;;  %v7964_v44 = vsel %vm4289_vm2, %v7942_v43, -inf }
 0x32f   : > { %v7917_v0 = vmul.f32 0.35355338, %v7454_v63  ;;  %v17990_v4 = vpop.f32.mrb[17].mxu0 }
 0x331   : > { %v20618_v2 = vsel %vm7934_vm6, -1e+09, %v7917_v0 }
 0x332   : > { %v7948_v5 = vpop.xlane.xlu1 %7947  ;;  %v7961_v6 = vsel %vm4289_vm2, %v20618_v2, -inf }
 0x333   : > { %v7968_v14 = vsub.f32 %v7936_v12, %v7948_v5  ;;  %7962 = vmax.xlane.f32.xlu0 %v7961_v6 }
 0x335   : > { %v7977_v52 = vmul.f32 1.442695, %v7968_v14 }
 0x337   : > { %v19432_v34 = vpop.eup %19431  ;;  %19433 = vpow2.f32 %v7977_v52 }
 0x338   : > { %v7991_v42 = vsel %vm4289_vm2, %v19432_v34, 0.0 }
 0x339   : > { %7992 = vadd.xlane.f32.xlu0 %v7991_v42 }
 0x33c   : > { %7965 = vmax.xlane.f32.xlu1 %v7964_v44 }
 0x341   : > { %v20625_v46 = vpop.eup %19433 }
 0x342   : > { %v7994_v49 = vsel %vm4289_vm2, %v20625_v46, 0.0 }
 0x343   : > { %7995 = vadd.xlane.f32.xlu0 %v7994_v49 }
 0x34d   : > { %8935 = vrot.lane.b32.xlu1 %v20339_v9, %s19550_s25 }
 0x359   : > { %8483 = vrot.lane.b32.xlu0 %v20329_v1, %s19550_s25 }
 0x360   : > { %v7951_v51 = vpop.xlane.xlu0 %7950 }
 0x361   : > { %v7969_v55 = vsub.f32 %v7937_v29, %v7951_v51 }
 0x363   : > { %v7979_v60 = vmul.f32 1.442695, %v7969_v55 }
 0x364   : > { %v7954_v53 = vpop.xlane.xlu0 %7953 }
 0x365   : > { %v7970_v54 = vsub.f32 %v7938_v37, %v7954_v53 }
 0x367   : > { %v7981_v57 = vmul.f32 1.442695, %v7970_v54 }
 0x369   : > { %19435 = vpow2.f32 %v7981_v57 }
 0x36a   : > { %19437 = vpow2.f32 %v7979_v60 }
 0x373   : > { %v20633_v61 = vpop.eup %19435 }
 0x374   : > { %v8000_v7 = vsel %vm4289_vm2, %v20633_v61, 0.0  ;;  %v20637_v8 = vpop.eup %19437 }
 0x375   : > { %v7997_v9 = vsel %vm4289_vm2, %v20637_v8, 0.0 }
 0x378   : > { %8001 = vadd.xlane.f32.xlu0 %v8000_v7 }
 0x37c   : > { %7998 = vadd.xlane.f32.xlu0 %v7997_v9 }
 0x390   : > { %v7960_v1 = vpop.xlane.xlu1 %7959 }
 0x391   : > { %v7972_v10 = vsub.f32 %v7940_v31, %v7960_v1 }
 0x392   : > { %9387 = vrot.lane.b32.xlu0 %v20346_v27, %s19550_s25 }
 0x393   : > { %v7985_v11 = vmul.f32 1.442695, %v7972_v10 }
 0x394   : > { %v7957_v12 = vpop.xlane.xlu1 %7956 }
 0x395   : > { %19439 = vpow2.f32 %v7985_v11  ;;  %v7971_v18 = vsub.f32 %v7939_v16, %v7957_v12 }
 0x397   : > { %v7983_v29 = vmul.f32 1.442695, %v7971_v18 }
 0x398   : > { %v8032_v13 = vpop.permute.xlu1 %8031 }
 0x399   : > { %v20643_v17 = vand.u32 4294901760, %v8032_v13  ;;  %19441 = vpow2.f32 %v7983_v29 }
 0x39b   : > { %18022 = vmatpush3.msra.mxu0 %v20643_v17  ;;  %v8115_v24 = vsub.f32 %v8032_v13, %v20643_v17 }
 0x39c   : > { %18026 = vmatprep.subr.mxu0 %v19547_v15 }
 0x39d   : > { %v8116_v31 = vand.u32 4294901760, %v8115_v24 }
 0x39f   : > { %v20647_v28 = vpop.eup %19439  ;;  %v8117_v48 = vsub.f32 %v8115_v24, %v8116_v31 }
 0x3a0   : > { %v8006_v32 = vsel %vm4289_vm2, %v20647_v28, 0.0 }
 0x3a1   : > { %8007 = vadd.xlane.f32.xlu1 %v8006_v32  ;;  %v8118_v4 = vand.u32 4294901760, %v8117_v48 }
 0x3a3   : > { %v20651_v27 = vpop.eup %19441 }
 0x3a4   : > { %v8003_v33 = vsel %vm4289_vm2, %v20651_v27, 0.0 }
 0x3b1   : > { %8004 = vadd.xlane.f32.xlu0 %v8003_v33 }
 0x3b2   : > { %10291 = vrot.lane.b32.xlu1 %v20350_v41, %s19550_s25 }
 0x3c0   : > { %v7963_v35 = vpop.xlane.xlu0 %7962 }
 0x3c1   : > { %v7973_v39 = vsub.f32 %v20618_v2, %v7963_v35 }
 0x3c3   : > { %v7987_v50 = vmul.f32 1.442695, %v7973_v39 }
 0x3c6   : > { %v7993_v36 = vpop.xlane.xlu0 %7992 }
 0x3c7   : > { %9839 = vrot.lane.b32.xlu0 %v20356_v45, %s19550_s25  ;;  %19443 = vrcp.f32 %v7993_v36 }
 0x3c9   : > { %v7966_v37 = vpop.xlane.xlu1 %7965 }
 0x3ca   : > { %v7974_v38 = vsub.f32 %v7942_v43, %v7966_v37 }
 0x3cc   : > { %v7989_v62 = vmul.f32 1.442695, %v7974_v38 }
 0x3cd   : > { %v8936_v49 = vpop.permute.xlu1 %8935 }
 0x3ce   : > { %19445 = vpow2.f32 %v7989_v62  ;;  %v20720_v51 = vand.u32 4294901760, %v8936_v49 }
 0x3d0   : > { %v7996_v19 = vpop.xlane.xlu0 %7995  ;;  %v9019_v10 = vsub.f32 %v8936_v49, %v20720_v51 }
 0x3d1   : > { %v19444_v20 = vpop.eup %19443  ;;  %19447 = vrcp.f32 %v7996_v19 }
 0x3d2   : > { %v8016_v25 = vmul.f32 %v19444_v20, %v19432_v34  ;;  %19449 = vpow2.f32 %v7987_v50  ;;  %v9020_v29 = vand.u32 4294901760, %v9019_v10 }
 0x3d4   : > { %v8484_v41 = vpop.permute.xlu0 %8483  ;;  %v8035_v26 = vsel %vm4289_vm2, %v8016_v25, 0  ;;  %v9021_v38 = vsub.f32 %v9019_v10, %v9020_v29 }
 0x3d5   : > { %v20662_v30 = vand.u32 4294901760, %v8484_v41  ;;  %v20664_v45 = vand.u32 4294901760, %v8035_v26 }
 0x3d6   : > { %v9022_v19 = vand.u32 4294901760, %v9021_v38 }
 0x3d7   : > { %18052 = vmatpush3.msra.mxu1 %v20662_v30  ;;  %v8104_v56 = vsub.f32 %v8035_v26, %v20664_v45  ;;  %v8567_v63 = vsub.f32 %v8484_v41, %v20662_v30 }
 0x3d8   : > { %v20668_v16 = vpop.eup %19445  ;;  %18056 = vmatprep.subr.mxu1 %v19547_v15 }
 0x3d9   : > { %v8012_v22 = vsel %vm4289_vm2, %v20668_v16, 0.0  ;;  %v8105_v47 = vand.u32 4294901760, %v8104_v56  ;;  %v8568_v6 = vand.u32 4294901760, %v8567_v63 }
 0x3da   : > { %8013 = vadd.xlane.f32.xlu1 %v8012_v22 }
 0x3db   : > { %v19448_v58 = vpop.eup %19447  ;;  %v8106_v3 = vsub.f32 %v8104_v56, %v8105_v47  ;;  %v8569_v34 = vsub.f32 %v8567_v63, %v8568_v6 }
 0x3dc   : > { %v8018_v59 = vmul.f32 %v19448_v58, %v20625_v46  ;;  %v20682_v21 = vpop.eup %19449 }
 0x3dd   : > { %v8107_v0 = vand.u32 4294901760, %v8106_v3  ;;  %v8009_v42 = vsel %vm4289_vm2, %v20682_v21, 0.0  ;;  %v8570_v46 = vand.u32 4294901760, %v8569_v34 }
 0x3de   : > { %v8487_v2 = vsel %vm4289_vm2, %v8018_v59, 0 }
 0x3df   : > { %18024 = vmatmul.mubr.f32.vlgmr.msra.gmra.mrb[18].mxu0 %v8107_v0  ;;  %v20676_v5 = vand.u32 4294901760, %v8487_v2 }
 0x3e0   : > { %18027 = vmatpush3.msra.mxu0 %v8118_v4  ;;  %18028 = vmatprep.mubr.msk.f32.mxu0 %vm19546_vm0, %v19547_v15 }
 0x3e1   : > { %18031 = vmatprep.subr.mxu0 %v19547_v15  ;;  %v8556_v14 = vsub.f32 %v8487_v2, %v20676_v5 }
 0x3e3   : > { %v8557_v52 = vand.u32 4294901760, %v8556_v14 }
 0x3e5   : > { %v8558_v43 = vsub.f32 %v8556_v14, %v8557_v52 }
 0x3e6   : > { %8010 = vadd.xlane.f32.xlu0 %v8009_v42 }
 0x3e7   : > { %18029 = vmatmul.mubr.f32.vlgmr.msra.gmra.mrb[18].mxu0 %v20664_v45  ;;  %v8559_v44 = vand.u32 4294901760, %v8558_v43 }
 0x3e8   : > { %18032 = vmatpush3.msra.mxu0 %v8115_v24  ;;  %18033 = vmatprep.mubr.msk.f32.mxu0 %vm19546_vm0, %v19547_v15 }
 0x3e9   : > { %18054 = vmatmul.mubr.f32.vlgmr.msra.gmra.mrb[16].mxu1 %v8559_v44  ;;  %18036 = vmatprep.subr.mxu0 %v19547_v15 }
 0x3ea   : > { %18057 = vmatpush3.msra.mxu1 %v8570_v46  ;;  %18058 = vmatprep.mubr.msk.f32.mxu1 %vm19546_vm0, %v19547_v15 }
 0x3eb   : > { %18061 = vmatprep.subr.mxu1 %v19547_v15 }
 0x3ef   : > { %18034 = vmatmul.mubr.f32.vlgmr.msra.gmra.mrb[18].mxu0 %v8104_v56 }
 0x3f0   : > { %18037 = vmatpush3.msra.mxu0 %v20643_v17  ;;  %18038 = vmatprep.mubr.msk.f32.mxu0 %vm19546_vm0, %v19547_v15 }
 0x3f1   : > { %18059 = vmatmul.mubr.f32.vlgmr.msra.gmra.mrb[16].mxu1 %v20676_v5  ;;  %18041 = vmatprep.subr.mxu0 %v19547_v15 }
 0x3f2   : > { %18062 = vmatpush3.msra.mxu1 %v8567_v63  ;;  %18063 = vmatprep.mubr.msk.f32.mxu1 %vm19546_vm0, %v19547_v15 }
 0x3f3   : > { %18066 = vmatprep.subr.mxu1 %v19547_v15 }
 0x3f7   : > { %18039 = vmatmul.mubr.f32.vlgmr.msra.gmra.mrb[18].mxu0 %v8105_v47 }
 0x3f8   : > { %18042 = vmatpush3.msra.mxu0 %v8116_v31  ;;  %18043 = vmatprep.mubr.msk.f32.mxu0 %vm19546_vm0, %v19547_v15 }
 0x3f9   : > { %18064 = vmatmul.mubr.f32.vlgmr.msra.gmra.mrb[16].mxu1 %v8556_v14  ;;  %18046 = vmatprep.subr.mxu0 %v19547_v15 }
 0x3fa   : > { %18067 = vmatpush3.msra.mxu1 %v20662_v30  ;;  %18068 = vmatprep.mubr.msk.f32.mxu1 %vm19546_vm0, %v19547_v15 }
 0x3fb   : > { %18071 = vmatprep.subr.mxu1 %v19547_v15 }
 0x3fc   : > { %10743 = vrot.lane.b32.xlu0 %v20400_v23, %s19550_s25 }
 0x3ff   : > { %18044 = vmatmul.mubr.f32.vlgmr.msra.gmra.mrb[18].mxu0 %v20664_v45 }
 0x400   : > { %11195 = vrot.lane.b32.xlu0 %v20381_v40, %s19550_s25  ;;  %18047 = vmatpush3.msra.mxu0 %v20643_v17 }
 0x401   : > { %18069 = vmatmul.mubr.f32.vlgmr.msra.gmra.mrb[16].mxu1 %v8557_v52  ;;  %18048 = vmatprep.mubr.msk.f32.mxu0 %vm19546_vm0, %v19547_v15 }
 0x402   : > { %18072 = vmatpush3.msra.mxu1 %v8568_v6  ;;  %18081 = vmatprep.subr.mxu0 %v19547_v15 }
 0x403   : > { %18073 = vmatprep.mubr.msk.f32.mxu1 %vm19546_vm0, %v19547_v15  ;;  %18076 = vmatprep.subr.mxu1 %v19547_v15 }
 0x405   : > { %v8002_v23 = vpop.xlane.xlu0 %8001 }
 0x406   : > { %19451 = vrcp.f32 %v8002_v23 }
 0x407   : > { %18049 = vmatmul.mubr.f32.vlgmr.msra.gmra.mrb[18].mxu0 %v20664_v45 }
 0x408   : > { %18082 = vmatpush3.msra.mxu0 %v20720_v51  ;;  %18083 = vmatprep.mubr.msk.f32.mxu0 %vm19546_vm0, %v19547_v15 }
 0x409   : > { %18074 = vmatmul.mubr.f32.vlgmr.msra.gmra.mrb[16].mxu1 %v20676_v5  ;;  %v7999_v40 = vpop.xlane.xlu0 %7998  ;;  %18086 = vmatprep.subr.mxu0 %v19547_v15 }
 0x40a   : > { %18077 = vmatpush3.msra.mxu1 %v20662_v30  ;;  %19453 = vrcp.f32 %v7999_v40  ;;  %18078 = vmatprep.mubr.msk.f32.mxu1 %vm19546_vm0, %v19547_v15 }
 0x40b   : > { %18111 = vmatprep.subr.mxu1 %v19547_v15 }
 0x40d   : > { %v9388_v53 = vpop.permute.xlu0 %9387 }
 0x40e   : > { %v20732_v54 = vand.u32 4294901760, %v9388_v53 }
 0x410   : > { %v19452_v55 = vpop.eup %19451  ;;  %v9471_v60 = vsub.f32 %v9388_v53, %v20732_v54 }
 0x411   : > { %v8022_v57 = vmul.f32 %v19452_v55, %v20633_v61  ;;  %18079 = vmatmul.mubr.f32.vlgmr.msra.gmra.mrb[16].mxu1 %v20676_v5 }
 0x412   : > { %18112 = vmatpush3.msra.mxu1 %v20732_v54  ;;  %18113 = vmatprep.mubr.msk.f32.mxu1 %vm19546_vm0, %v19547_v15  ;;  %v9472_v11 = vand.u32 4294901760, %v9471_v60 }
 0x413   : > { %18116 = vmatprep.subr.mxu1 %v19547_v15  ;;  %v9391_v7 = vsel %vm4289_vm2, %v8022_v57, 0 }
 0x414   : > { %v19454_v9 = vpop.eup %19453  ;;  %v20742_v1 = vand.u32 4294901760, %v9391_v7  ;;  %v9473_v32 = vsub.f32 %v9471_v60, %v9472_v11 }
 0x415   : > { %v8020_v61 = vmul.f32 %v19454_v9, %v20637_v8 }
 0x416   : > { %v9460_v12 = vsub.f32 %v9391_v7, %v20742_v1  ;;  %v9474_v62 = vand.u32 4294901760, %v9473_v32 }
 0x417   : > { %v8939_v13 = vsel %vm4289_vm2, %v8020_v61, 0 }
 0x418   : > { %v9461_v17 = vand.u32 4294901760, %v9460_v12  ;;  %v20748_v18 = vand.u32 4294901760, %v8939_v13 }
 0x41a   : > { %v9462_v33 = vsub.f32 %v9460_v12, %v9461_v17  ;;  %v9008_v35 = vsub.f32 %v8939_v13, %v20748_v18 }
 0x41c   : > { %v9463_v36 = vand.u32 4294901760, %v9462_v33  ;;  %v9009_v37 = vand.u32 4294901760, %v9008_v35 }
 0x41e   : > { %18114 = vmatmul.mubr.f32.vlgmr.msra.gmra.mrb[18].mxu1 %v9463_v36  ;;  %v9010_v39 = vsub.f32 %v9008_v35, %v9009_v37 }
 0x41f   : > { %18117 = vmatpush3.msra.mxu1 %v9474_v62  ;;  %18118 = vmatprep.mubr.msk.f32.mxu1 %vm19546_vm0, %v19547_v15 }
 0x420   : > { %v9011_v8 = vand.u32 4294901760, %v9010_v39  ;;  %18121 = vmatprep.subr.mxu1 %v19547_v15  ;;  %v11647_v39 = vld [vmem:[%s21434_s4] sm:$0xff] }
 0x422   : > { %18084 = vmatmul.mubr.f32.vlgmr.msra.gmra.mrb[20].mxu0 %v9011_v8  ;;  %v20890_v8 = vand.u32 4294901760, %v11647_v39 }
 0x423   : > { %18087 = vmatpush3.msra.mxu0 %v9022_v19  ;;  %18088 = vmatprep.mubr.msk.f32.mxu0 %vm19546_vm0, %v19547_v15 }
 0x424   : > { %18091 = vmatprep.subr.mxu0 %v19547_v15  ;;  %v20896_v19 = vsub.f32 %v11647_v39, %v20890_v8 }
 0x426   : > { %18119 = vmatmul.mubr.f32.vlgmr.msra.gmra.mrb[18].mxu1 %v20742_v1 }
 0x427   : > { %18122 = vmatpush3.msra.mxu1 %v9471_v60  ;;  %18123 = vmatprep.mubr.msk.f32.mxu1 %vm19546_vm0, %v19547_v15 }
 0x428   : > { %18126 = vmatprep.subr.mxu1 %v19547_v15 }
 0x42a   : > { %18089 = vmatmul.mubr.f32.vlgmr.msra.gmra.mrb[20].mxu0 %v20748_v18 }
 0x42b   : > { %18092 = vmatpush3.msra.mxu0 %v9019_v10  ;;  %18093 = vmatprep.mubr.msk.f32.mxu0 %vm19546_vm0, %v19547_v15 }
 0x42c   : > { %18096 = vmatprep.subr.mxu0 %v19547_v15 }
 0x42e   : > { %v8008_v20 = vpop.xlane.xlu1 %8007  ;;  %18124 = vmatmul.mubr.f32.vlgmr.msra.gmra.mrb[18].mxu1 %v9460_v12 }
 0x42f   : > { %19455 = vrcp.f32 %v8008_v20  ;;  %18127 = vmatpush3.msra.mxu1 %v20732_v54  ;;  %18128 = vmatprep.mubr.msk.f32.mxu1 %vm19546_vm0, %v19547_v15  ;;  %v20903_v20 = vand.u32 4294901760, %v20896_v19 }
 0x430   : > { %18131 = vmatprep.subr.mxu1 %v19547_v15 }
 0x432   : > { %18094 = vmatmul.mubr.f32.vlgmr.msra.gmra.mrb[20].mxu0 %v9008_v35  ;;  %v10292_v24 = vpop.permute.xlu1 %10291 }
 0x433   : > { %18097 = vmatpush3.msra.mxu0 %v20720_v51  ;;  %18098 = vmatprep.mubr.msk.f32.mxu0 %vm19546_vm0, %v19547_v15  ;;  %v20776_v50 = vand.u32 4294901760, %v10292_v24 }
 0x434   : > { %18101 = vmatprep.subr.mxu0 %v19547_v15 }
 0x435   : > { %v10375_v30 = vsub.f32 %v10292_v24, %v20776_v50  ;;  %v11734_v24 = vsub.f32 %v20896_v19, %v20903_v20 }
 0x436   : > { %18129 = vmatmul.mubr.f32.vlgmr.msra.gmra.mrb[18].mxu1 %v9461_v17 }
 0x437   : > { %18132 = vmatpush3.msra.mxu1 %v9472_v11  ;;  %18133 = vmatprep.mubr.msk.f32.mxu1 %vm19546_vm0, %v19547_v15  ;;  %v10376_v56 = vand.u32 4294901760, %v10375_v30 }
 0x438   : > { %18136 = vmatprep.subr.mxu1 %v19547_v15 }
 0x439   : > { %v19456_v25 = vpop.eup %19455  ;;  %v10377_v58 = vsub.f32 %v10375_v30, %v10376_v56 }
 0x43a   : > { %v8026_v41 = vmul.f32 %v19456_v25, %v20647_v28  ;;  %18099 = vmatmul.mubr.f32.vlgmr.msra.gmra.mrb[20].mxu0 %v9009_v37  ;;  %v20914_v25 = vand.u32 4294901760, %v11734_v24 }
 0x43b   : > { %18102 = vmatpush3.msra.mxu0 %v9020_v29  ;;  %18103 = vmatprep.mubr.msk.f32.mxu0 %vm19546_vm0, %v19547_v15  ;;  %v10378_v0 = vand.u32 4294901760, %v10377_v58 }
 0x43c   : > { %18106 = vmatprep.subr.mxu0 %v19547_v15  ;;  %v10295_v26 = vsel %vm4289_vm2, %v8026_v41, 0 }
 0x43d   : > { %v20784_v45 = vand.u32 4294901760, %v10295_v26 }
 0x43e   : > { %18134 = vmatmul.mubr.f32.vlgmr.msra.gmra.mrb[18].mxu1 %v20742_v1  ;;  %v8005_v31 = vpop.xlane.xlu0 %8004 }
 0x43f   : > { %18137 = vmatpush3.msra.mxu1 %v20732_v54  ;;  %19457 = vrcp.f32 %v8005_v31  ;;  %18138 = vmatprep.mubr.msk.f32.mxu1 %vm19546_vm0, %v19547_v15  ;;  %v10364_v28 = vsub.f32 %v10295_v26, %v20784_v45 }
 0x440   : > { %18171 = vmatprep.subr.mxu1 %v19547_v15 }
 0x441   : > { %v10365_v22 = vand.u32 4294901760, %v10364_v28 }
 0x442   : > { %18104 = vmatmul.mubr.f32.vlgmr.msra.gmra.mrb[20].mxu0 %v20748_v18  ;;  %v9840_v47 = vpop.permute.xlu0 %9839 }
 0x443   : > { %18107 = vmatpush3.msra.mxu0 %v20720_v51  ;;  %18108 = vmatprep.mubr.msk.f32.mxu0 %vm19546_vm0, %v19547_v15  ;;  %v10366_v48 = vsub.f32 %v10364_v28, %v10365_v22  ;;  %v20797_v3 = vand.u32 4294901760, %v9840_v47 }
 0x444   : > { %18141 = vmatprep.subr.mxu0 %v19547_v15 }
 0x445   : > { %v10367_v59 = vand.u32 4294901760, %v10366_v48  ;;  %v9923_v2 = vsub.f32 %v9840_v47, %v20797_v3 }
 0x446   : > { %18139 = vmatmul.mubr.f32.vlgmr.msra.gmra.mrb[18].mxu1 %v20742_v1 }
 0x447   : > { %18172 = vmatpush3.msra.mxu1 %v20776_v50  ;;  %18173 = vmatprep.mubr.msk.f32.mxu1 %vm19546_vm0, %v19547_v15  ;;  %v9924_v6 = vand.u32 4294901760, %v9923_v2 }
 0x448   : > { %18176 = vmatprep.subr.mxu1 %v19547_v15 }
 0x449   : > { %v19458_v63 = vpop.eup %19457  ;;  %v9925_v34 = vsub.f32 %v9923_v2, %v9924_v6 }
 0x44a   : > { %v8024_v4 = vmul.f32 %v19458_v63, %v20651_v27  ;;  %18109 = vmatmul.mubr.f32.vlgmr.msra.gmra.mrb[20].mxu0 %v20748_v18  ;;  %18174 = vmatmul.mubr.f32.vlgmr.msra.gmra.mrb[20].mxu1 %v10367_v59 }
 0x44b   : > { %18142 = vmatpush3.msra.mxu0 %v20797_v3  ;;  %18177 = vmatpush3.msra.mxu1 %v10378_v0  ;;  %v9926_v44 = vand.u32 4294901760, %v9925_v34 }
 0x44c   : > { %18178 = vmatprep.mubr.msk.f32.mxu1 %vm19546_vm0, %v19547_v15  ;;  %18181 = vmatprep.subr.mxu1 %v19547_v15  ;;  %v9843_v5 = vsel %vm4289_vm2, %v8024_v4, 0 }
 0x44d   : > { %18143 = vmatprep.mubr.msk.f32.mxu0 %vm19546_vm0, %v19547_v15  ;;  %18146 = vmatprep.subr.mxu0 %v19547_v15  ;;  %v20815_v27 = vand.u32 4294901760, %v9843_v5 }
 0x44f   : > { %v9912_v14 = vsub.f32 %v9843_v5, %v20815_v27 }
 0x451   : > { %v9913_v52 = vand.u32 4294901760, %v9912_v14 }
 0x452   : > { %18179 = vmatmul.mubr.f32.vlgmr.msra.gmra.mrb[20].mxu1 %v20784_v45 }
 0x453   : > { %18182 = vmatpush3.msra.mxu1 %v10375_v30  ;;  %v9914_v42 = vsub.f32 %v9912_v14, %v9913_v52  ;;  %18183 = vmatprep.mubr.msk.f32.mxu1 %vm19546_vm0, %v19547_v15 }
 0x454   : > { %18186 = vmatprep.subr.mxu1 %v19547_v15 }
 0x455   : > { %v9915_v43 = vand.u32 4294901760, %v9914_v42 }
 0x457   : > { %18144 = vmatmul.mubr.f32.vlgmr.msra.gmra.mrb[22].mxu0 %v9915_v43 }
 0x458   : > { %18147 = vmatpush3.msra.mxu0 %v9926_v44  ;;  %18148 = vmatprep.mubr.msk.f32.mxu0 %vm19546_vm0, %v19547_v15 }
 0x459   : > { %18151 = vmatprep.subr.mxu0 %v19547_v15 }
 0x45a   : > { %18184 = vmatmul.mubr.f32.vlgmr.msra.gmra.mrb[20].mxu1 %v10364_v28 }
 0x45b   : > { %18187 = vmatpush3.msra.mxu1 %v20776_v50  ;;  %18188 = vmatprep.mubr.msk.f32.mxu1 %vm19546_vm0, %v19547_v15 }
 0x45c   : > { %18191 = vmatprep.subr.mxu1 %v19547_v15 }
 0x45f   : > { %18149 = vmatmul.mubr.f32.vlgmr.msra.gmra.mrb[22].mxu0 %v20815_v27 }
 0x460   : > { %18152 = vmatpush3.msra.mxu0 %v9923_v2  ;;  %18153 = vmatprep.mubr.msk.f32.mxu0 %vm19546_vm0, %v19547_v15 }
 0x461   : > { %18156 = vmatprep.subr.mxu0 %v19547_v15 }
 0x462   : > { %18189 = vmatmul.mubr.f32.vlgmr.msra.gmra.mrb[20].mxu1 %v10365_v22  ;;  %v11649_v22 = vld [vmem:[%s21434_s4 + $0x10] sm:$0xff] }
 0x463   : > { %18192 = vmatpush3.msra.mxu1 %v10376_v56  ;;  %18193 = vmatprep.mubr.msk.f32.mxu1 %vm19546_vm0, %v19547_v15 }
 0x464   : > { %18196 = vmatprep.subr.mxu1 %v19547_v15 }
 0x467   : > { %v8014_v46 = vpop.xlane.xlu1 %8013  ;;  %18154 = vmatmul.mubr.f32.vlgmr.msra.gmra.mrb[22].mxu0 %v9912_v14 }
 0x468   : > { %19459 = vrcp.f32 %v8014_v46  ;;  %18157 = vmatpush3.msra.mxu0 %v20797_v3  ;;  %18158 = vmatprep.mubr.msk.f32.mxu0 %vm19546_vm0, %v19547_v15 }
 0x469   : > { %18161 = vmatprep.subr.mxu0 %v19547_v15 }
 0x46a   : > { %18194 = vmatmul.mubr.f32.vlgmr.msra.gmra.mrb[20].mxu1 %v20784_v45 }
 0x46b   : > { %18197 = vmatpush3.msra.mxu1 %v20776_v50  ;;  %18198 = vmatprep.mubr.msk.f32.mxu1 %vm19546_vm0, %v19547_v15  ;;  %v11648_v50 = vld [vmem:[%s21434_s4 + $0x8] sm:$0xff] }
 0x46c   : > { %18231 = vmatprep.subr.mxu1 %v19547_v15  ;;  %v20933_v41 = vand.u32 4294901760, %v11648_v50 }
 0x46e   : > { %v20936_v26 = vsub.f32 %v11648_v50, %v20933_v41 }
 0x46f   : > { %18159 = vmatmul.mubr.f32.vlgmr.msra.gmra.mrb[22].mxu0 %v9913_v52 }
 0x470   : > { %18162 = vmatpush3.msra.mxu0 %v9924_v6  ;;  %18163 = vmatprep.mubr.msk.f32.mxu0 %vm19546_vm0, %v19547_v15  ;;  %v20940_v56 = vand.u32 4294901760, %v20936_v26 }
 0x471   : > { %18166 = vmatprep.subr.mxu0 %v19547_v15 }
 0x472   : > { %v19460_v49 = vpop.eup %19459  ;;  %18199 = vmatmul.mubr.f32.vlgmr.msra.gmra.mrb[20].mxu1 %v20784_v45  ;;  %v12183_v58 = vsub.f32 %v20936_v26, %v20940_v56 }
 0x473   : > { %v8030_v23 = vmul.f32 %v19460_v49, %v20668_v16  ;;  %v8011_v51 = vpop.xlane.xlu0 %8010  ;;  %18233 = vmatprep.mubr.msk.f32.mxu1 %vm19546_vm0, %v19547_v15  ;;  %v11650_v49 = vld [vmem:[%s21434_s4 + $0x18] sm:$0xff] }
 0x474   : > { %19461 = vrcp.f32 %v8011_v51  ;;  %v20957_v4 = vand.u32 4294901760, %v12183_v58 }
 0x475   : > { %v11199_v40 = vsel %vm4289_vm2, %v8030_v23, 0  ;;  %v21013_v23 = vand.u32 4294901760, %v11650_v49 }
 0x476   : > { %v20853_v53 = vand.u32 4294901760, %v11199_v40 }
 0x477   : > { %18164 = vmatmul.mubr.f32.vlgmr.msra.gmra.mrb[22].mxu0 %v20815_v27  ;;  %v10744_v54 = vpop.permute.xlu0 %10743 }
 0x478   : > { %18167 = vmatpush3.msra.mxu0 %v20797_v3  ;;  %18168 = vmatprep.mubr.msk.f32.mxu0 %vm19546_vm0, %v19547_v15  ;;  %v11268_v55 = vsub.f32 %v11199_v40, %v20853_v53  ;;  %v20861_v57 = vand.u32 4294901760, %v10744_v54  ;;  %v20951_v3 = vand.u32 4294901760, %v11649_v22 }
 0x479   : > { %18201 = vmatprep.subr.mxu0 %v19547_v15 }
 0x47a   : > { %v11269_v16 = vand.u32 4294901760, %v11268_v55  ;;  %v10827_v12 = vsub.f32 %v10744_v54, %v20861_v57  ;;  %v20960_v2 = vsub.f32 %v11649_v22, %v20951_v3 }
 0x47b   : > { %v11196_v60 = vpop.permute.xlu0 %11195 }
 0x47c   : > { %v11202_v7 = vand.u32 4294901760, %v11196_v60  ;;  %v11270_v9 = vsub.f32 %v11268_v55, %v11269_v16  ;;  %v10828_v29 = vand.u32 4294901760, %v10827_v12  ;;  %v20970_v52 = vand.u32 4294901760, %v20960_v2 }
 0x47e   : > { %v19462_v1 = vpop.eup %19461  ;;  %v11279_v10 = vsub.f32 %v11196_v60, %v11202_v7  ;;  %18232 = vmatpush3.msra.mxu1 %v11202_v7  ;;  %v11271_v61 = vand.u32 4294901760, %v11270_v9  ;;  %v10829_v36 = vsub.f32 %v10827_v12, %v10828_v29  ;;  %v12632_v43 = vsub.f32 %v20960_v2, %v20970_v52 }
 0x47f   : > { %v8028_v11 = vmul.f32 %v19462_v1, %v20682_v21  ;;  %18169 = vmatmul.mubr.f32.vlgmr.msra.gmra.mrb[22].mxu0 %v20815_v27  ;;  %18236 = vmatprep.subr.mxu1 %v19547_v15 }
 0x480   : > { %v11280_v13 = vand.u32 4294901760, %v11279_v10  ;;  %18202 = vmatpush3.msra.mxu0 %v20861_v57  ;;  %18234 = vmatmul.mubr.f32.vlgmr.msra.gmra.mrb[22].mxu1 %v11271_v61  ;;  %v10830_v62 = vand.u32 4294901760, %v10829_v36  ;;  %v20990_v46 = vand.u32 4294901760, %v12632_v43 }
 0x481   : > { %18238 = vmatprep.mubr.msk.f32.mxu1 %vm19546_vm0, %v19547_v15  ;;  %18203 = vmatprep.mubr.msk.f32.mxu0 %vm19546_vm0, %v19547_v15  ;;  %v10747_v17 = vsel %vm4289_vm2, %v8028_v11, 0 }
 0x482   : > { %v11281_v18 = vsub.f32 %v11279_v10, %v11280_v13  ;;  %18206 = vmatprep.subr.mxu0 %v19547_v15  ;;  %v10815_v21 = vand.u32 4294901760, %v10747_v17 }
 0x484   : > { %v11282_v32 = vand.u32 4294901760, %v11281_v18  ;;  %v10816_v33 = vsub.f32 %v10747_v17, %v10815_v21 }
 0x486   : > { %18237 = vmatpush3.msra.mxu1 %v11282_v32  ;;  %v10817_v35 = vand.u32 4294901760, %v10816_v33 }
 0x487   : > { %18241 = vmatprep.subr.mxu1 %v19547_v15 }
 0x488   : > { %18239 = vmatmul.mubr.f32.vlgmr.msra.gmra.mrb[22].mxu1 %v20853_v53  ;;  %v10818_v37 = vsub.f32 %v10816_v33, %v10817_v35 }
 0x489   : > { %18242 = vmatpush3.msra.mxu1 %v11279_v10  ;;  %18243 = vmatprep.mubr.msk.f32.mxu1 %vm19546_vm0, %v19547_v15 }
 0x48a   : > { %v10819_v38 = vand.u32 4294901760, %v10818_v37  ;;  %18246 = vmatprep.subr.mxu1 %v19547_v15 }
 0x48c   : > { %18204 = vmatmul.mubr.f32.vlgmr.msra.gmra.mrb[24].mxu0 %v10819_v38 }
 0x48d   : > { %18207 = vmatpush3.msra.mxu0 %v10830_v62  ;;  %18208 = vmatprep.mubr.msk.f32.mxu0 %vm19546_vm0, %v19547_v15 }
 0x48e   : > { %18211 = vmatprep.subr.mxu0 %v19547_v15 }
 0x490   : > { %18244 = vmatmul.mubr.f32.vlgmr.msra.gmra.mrb[22].mxu1 %v11268_v55 }
 0x491   : > { %18247 = vmatpush3.msra.mxu1 %v11202_v7  ;;  %18248 = vmatprep.mubr.msk.f32.mxu1 %vm19546_vm0, %v19547_v15 }
 0x492   : > { %18251 = vmatprep.subr.mxu1 %v19547_v15 }
 0x494   : > { %18209 = vmatmul.mubr.f32.vlgmr.msra.gmra.mrb[24].mxu0 %v10815_v21 }
 0x495   : > { %18212 = vmatpush3.msra.mxu0 %v10827_v12  ;;  %18213 = vmatprep.mubr.msk.f32.mxu0 %vm19546_vm0, %v19547_v15 }
 0x496   : > { %18216 = vmatprep.subr.mxu0 %v19547_v15 }
 0x498   : > { %18249 = vmatmul.mubr.f32.vlgmr.msra.gmra.mrb[22].mxu1 %v11269_v16 }
 0x499   : > { %18252 = vmatpush3.msra.mxu1 %v11280_v13  ;;  %18253 = vmatprep.mubr.msk.f32.mxu1 %vm19546_vm0, %v19547_v15 }
 0x49a   : > { %18256 = vmatprep.subr.mxu1 %v19547_v15 }
 0x49c   : > { %18214 = vmatmul.mubr.f32.vlgmr.msra.gmra.mrb[24].mxu0 %v10816_v33 }
 0x49d   : > { %18217 = vmatpush3.msra.mxu0 %v20861_v57  ;;  %18218 = vmatprep.mubr.msk.f32.mxu0 %vm19546_vm0, %v19547_v15 }
 0x49e   : > { %18221 = vmatprep.subr.mxu0 %v19547_v15 }
 0x4a0   : > { %18254 = vmatmul.mubr.f32.vlgmr.msra.gmra.mrb[22].mxu1 %v20853_v53 }
 0x4a1   : > { %18257 = vmatpush3.msra.mxu1 %v11202_v7  ;;  %18258 = vmatprep.mubr.msk.f32.mxu1 %vm19546_vm0, %v19547_v15 }
 0x4a2   : > { %18266 = vmatprep.subr.mxu1 %v19547_v15 }
 0x4a4   : > { %18219 = vmatmul.mubr.f32.vlgmr.msra.gmra.mrb[24].mxu0 %v10817_v35 }
 0x4a5   : > { %18222 = vmatpush3.msra.mxu0 %v10828_v29  ;;  %18223 = vmatprep.mubr.msk.f32.mxu0 %vm19546_vm0, %v19547_v15 }
 0x4a6   : > { %18226 = vmatprep.subr.mxu0 %v19547_v15 }
 0x4a8   : > { %18259 = vmatmul.mubr.f32.vlgmr.msra.gmra.mrb[22].mxu1 %v20853_v53  ;;  %v21016_v53 = vsub.f32 %v11650_v49, %v21013_v23 }
 0x4a9   : > { %18267 = vmatpush3.msra.mxu1 %v20914_v25  ;;  %18268 = vmatprep.mubr.msk.f32.mxu1 %vm19546_vm0, %v19547_v15 }
 0x4aa   : > { %18276 = vmatprep.subr.mxu1 %v19547_v15  ;;  %v21020_v60 = vand.u32 4294901760, %v21016_v53 }
 0x4ac   : > { %18224 = vmatmul.mubr.f32.vlgmr.msra.gmra.mrb[24].mxu0 %v10815_v21  ;;  %v13081_v61 = vsub.f32 %v21016_v53, %v21020_v60 }
 0x4ad   : > { %18227 = vmatpush3.msra.mxu0 %v20861_v57  ;;  %18228 = vmatprep.mubr.msk.f32.mxu0 %vm19546_vm0, %v19547_v15 }
 0x4ae   : > { %18261 = vmatprep.subr.mxu0 %v19547_v15  ;;  %v21033_v17 = vand.u32 4294901760, %v13081_v61 }
 0x4b4   : > { %18229 = vmatmul.mubr.f32.vlgmr.msra.gmra.mrb[24].mxu0 %v10815_v21 }
 0x4b5   : > { %18262 = vmatpush3.msra.mxu0 %v20890_v8  ;;  %18263 = vmatprep.mubr.msk.f32.mxu0 %vm19546_vm0, %v19547_v15 }
 0x4b6   : > { %18271 = vmatprep.subr.mxu0 %v19547_v15 }
 0x4da   : > { %v8479_v30 = vpop.f32.mrb[18].mxu0 }
 0x4db   : > { %v11652_v45 = vsel %vm4289_vm2, %v8479_v30, 0  ;;  %v18050_v31 = vpop.f32.mrb[19].mxu0 }
 0x4dc   : > { %v11720_v28 = vand.u32 4294901760, %v11652_v45 }
 0x4de   : > { %v11721_v47 = vsub.f32 %v11652_v45, %v11720_v28  ;;  %18269 = vmatmul.mubr.f32.vlgmr.msra.gmra.mrb[24].mxu1 %v11720_v28 }
 0x4df   : > { %18277 = vmatpush3.msra.mxu1 %v20890_v8  ;;  %18278 = vmatprep.mubr.msk.f32.mxu1 %vm19546_vm0, %v19547_v15 }
 0x4e0   : > { %v11722_v48 = vand.u32 4294901760, %v11721_v47  ;;  %18286 = vmatprep.subr.mxu1 %v19547_v15 }
 0x4e2   : > { %v11723_v59 = vsub.f32 %v11721_v47, %v11722_v48  ;;  %18279 = vmatmul.mubr.f32.vlgmr.msra.gmra.mrb[26].mxu1 %v11722_v48 }
 0x4e3   : > { %18287 = vmatpush3.msra.mxu1 %v20890_v8  ;;  %18288 = vmatprep.mubr.msk.f32.mxu1 %vm19546_vm0, %v19547_v15 }
 0x4e4   : > { %v11724_v63 = vand.u32 4294901760, %v11723_v59  ;;  %v8931_v0 = vpop.f32.mrb[16].mxu1  ;;  %18296 = vmatprep.subr.mxu1 %v19547_v15 }
 0x4e5   : > { %v12101_v5 = vsel %vm4289_vm2, %v8931_v0, 0  ;;  %v18080_v27 = vpop.f32.mrb[17].mxu1 }
 0x4e6   : > { %v12169_v6 = vand.u32 4294901760, %v12101_v5  ;;  %18264 = vmatmul.mubr.f32.vlgmr.msra.gmra.mrb[26].mxu0 %v11724_v63  ;;  %18289 = vmatmul.mubr.f32.vlgmr.msra.gmra.mrb[28].mxu1 %v11720_v28 }
 0x4e7   : > { %18272 = vmatpush3.msra.mxu0 %v20896_v19  ;;  %18273 = vmatprep.mubr.msk.f32.mxu0 %vm19546_vm0, %v19547_v15 }
 0x4e8   : > { %v12170_v14 = vsub.f32 %v12101_v5, %v12169_v6  ;;  %18297 = vmatpush3.msra.mxu1 %v20957_v4  ;;  %18298 = vmatprep.mubr.msk.f32.mxu1 %vm19546_vm0, %v19547_v15 }
 0x4e9   : > { %18281 = vmatprep.subr.mxu0 %v19547_v15  ;;  %18306 = vmatprep.subr.mxu1 %v19547_v15 }
 0x4ea   : > { %v12171_v34 = vand.u32 4294901760, %v12170_v14  ;;  %18274 = vmatmul.mubr.f32.vlgmr.msra.gmra.mrb[28].mxu0 %v11721_v47  ;;  %18299 = vmatmul.mubr.f32.vlgmr.msra.gmra.mrb[30].mxu1 %v12169_v6 }
 0x4eb   : > { %18282 = vmatpush3.msra.mxu0 %v20903_v20  ;;  %18283 = vmatprep.mubr.msk.f32.mxu0 %vm19546_vm0, %v19547_v15 }
 0x4ec   : > { %v12172_v42 = vsub.f32 %v12170_v14, %v12171_v34  ;;  %18307 = vmatpush3.msra.mxu1 %v20933_v41  ;;  %18308 = vmatprep.mubr.msk.f32.mxu1 %vm19546_vm0, %v19547_v15 }
 0x4ed   : > { %18291 = vmatprep.subr.mxu0 %v19547_v15  ;;  %18316 = vmatprep.subr.mxu1 %v19547_v15 }
 0x4ee   : > { %18284 = vmatmul.mubr.f32.vlgmr.msra.gmra.mrb[30].mxu0 %v11720_v28  ;;  %18309 = vmatmul.mubr.f32.vlgmr.msra.gmra.mrb[32].mxu1 %v12171_v34  ;;  %v12173_v44 = vand.u32 4294901760, %v12172_v42 }
 0x4ef   : > { %18292 = vmatpush3.msra.mxu0 %v20933_v41  ;;  %18293 = vmatprep.mubr.msk.f32.mxu0 %vm19546_vm0, %v19547_v15 }
 0x4f0   : > { %18317 = vmatpush3.msra.mxu1 %v20933_v41  ;;  %18318 = vmatprep.mubr.msk.f32.mxu1 %vm19546_vm0, %v19547_v15 }
 0x4f1   : > { %18301 = vmatprep.subr.mxu0 %v19547_v15  ;;  %18326 = vmatprep.subr.mxu1 %v19547_v15 }
 0x4f2   : > { %18294 = vmatmul.mubr.f32.vlgmr.msra.gmra.mrb[32].mxu0 %v12173_v44  ;;  %18319 = vmatmul.mubr.f32.vlgmr.msra.gmra.mrb[34].mxu1 %v12169_v6 }
 0x4f3   : > { %18302 = vmatpush3.msra.mxu0 %v20936_v26  ;;  %18303 = vmatprep.mubr.msk.f32.mxu0 %vm19546_vm0, %v19547_v15 }
 0x4f4   : > { %18311 = vmatprep.subr.mxu0 %v19547_v15  ;;  %18327 = vmatpush3.msra.mxu1 %v20990_v46 }
 0x4f5   : > { %18328 = vmatprep.mubr.msk.f32.mxu1 %vm19546_vm0, %v19547_v15  ;;  %18336 = vmatprep.subr.mxu1 %v19547_v15 }
 0x4f6   : > { %18304 = vmatmul.mubr.f32.vlgmr.msra.gmra.mrb[34].mxu0 %v12170_v14 }
 0x4f7   : > { %18312 = vmatpush3.msra.mxu0 %v20940_v56  ;;  %18313 = vmatprep.mubr.msk.f32.mxu0 %vm19546_vm0, %v19547_v15 }
 0x4f8   : > { %18321 = vmatprep.subr.mxu0 %v19547_v15 }
 0x4fa   : > { %18314 = vmatmul.mubr.f32.vlgmr.msra.gmra.mrb[36].mxu0 %v12169_v6 }
 0x4fb   : > { %18322 = vmatpush3.msra.mxu0 %v20951_v3  ;;  %18323 = vmatprep.mubr.msk.f32.mxu0 %vm19546_vm0, %v19547_v15 }
 0x4fc   : > { %18331 = vmatprep.subr.mxu0 %v19547_v15 }
 0x519   : > { %v9835_v51 = vpop.f32.mrb[18].mxu1 }
 0x51a   : > { %v18140_v40 = vpop.f32.mrb[19].mxu1  ;;  %v12999_v7 = vsel %vm4289_vm2, %v9835_v51, 0 }
 0x51b   : > { %v13067_v1 = vand.u32 4294901760, %v12999_v7 }
 0x51d   : > { %v9383_v54 = vpop.f32.mrb[20].mxu0  ;;  %v13068_v12 = vsub.f32 %v12999_v7, %v13067_v1 }
 0x51e   : > { %v12550_v55 = vsel %vm4289_vm2, %v9383_v54, 0  ;;  %v18110_v16 = vpop.f32.mrb[21].mxu0 }
 0x51f   : > { %v12618_v57 = vand.u32 4294901760, %v12550_v55  ;;  %v13069_v18 = vand.u32 4294901760, %v13068_v12 }
 0x521   : > { %v12619_v9 = vsub.f32 %v12550_v55, %v12618_v57  ;;  %18329 = vmatmul.mubr.f32.vlgmr.msra.gmra.mrb[36].mxu1 %v12618_v57  ;;  %v13070_v21 = vsub.f32 %v13068_v12, %v13069_v18 }
 0x522   : > { %18337 = vmatpush3.msra.mxu1 %v20951_v3  ;;  %18338 = vmatprep.mubr.msk.f32.mxu1 %vm19546_vm0, %v19547_v15 }
 0x523   : > { %v12620_v10 = vand.u32 4294901760, %v12619_v9  ;;  %18346 = vmatprep.subr.mxu1 %v19547_v15  ;;  %v13071_v29 = vand.u32 4294901760, %v13070_v21 }
 0x525   : > { %v12621_v11 = vsub.f32 %v12619_v9, %v12620_v10  ;;  %18339 = vmatmul.mubr.f32.vlgmr.msra.gmra.mrb[38].mxu1 %v12620_v10 }
 0x526   : > { %18347 = vmatpush3.msra.mxu1 %v20951_v3  ;;  %18348 = vmatprep.mubr.msk.f32.mxu1 %vm19546_vm0, %v19547_v15 }
 0x527   : > { %v12622_v13 = vand.u32 4294901760, %v12621_v11  ;;  %18356 = vmatprep.subr.mxu1 %v19547_v15 }
 0x529   : > { %18324 = vmatmul.mubr.f32.vlgmr.msra.gmra.mrb[38].mxu0 %v12622_v13  ;;  %18349 = vmatmul.mubr.f32.vlgmr.msra.gmra.mrb[40].mxu1 %v12618_v57 }
 0x52a   : > { %18332 = vmatpush3.msra.mxu0 %v20960_v2  ;;  %18333 = vmatprep.mubr.msk.f32.mxu0 %vm19546_vm0, %v19547_v15 }
 0x52b   : > { %18357 = vmatpush3.msra.mxu1 %v21033_v17  ;;  %18358 = vmatprep.mubr.msk.f32.mxu1 %vm19546_vm0, %v19547_v15 }
 0x52c   : > { %18341 = vmatprep.subr.mxu0 %v19547_v15  ;;  %18366 = vmatprep.subr.mxu1 %v19547_v15 }
 0x52d   : > { %18334 = vmatmul.mubr.f32.vlgmr.msra.gmra.mrb[40].mxu0 %v12619_v9  ;;  %18359 = vmatmul.mubr.f32.vlgmr.msra.gmra.mrb[42].mxu1 %v13067_v1 }
 0x52e   : > { %18342 = vmatpush3.msra.mxu0 %v20970_v52  ;;  %18343 = vmatprep.mubr.msk.f32.mxu0 %vm19546_vm0, %v19547_v15 }
 0x52f   : > { %18367 = vmatpush3.msra.mxu1 %v21013_v23  ;;  %18368 = vmatprep.mubr.msk.f32.mxu1 %vm19546_vm0, %v19547_v15 }
 0x530   : > { %18351 = vmatprep.subr.mxu0 %v19547_v15  ;;  %18376 = vmatprep.subr.mxu1 %v19547_v15 }
 0x531   : > { %18344 = vmatmul.mubr.f32.vlgmr.msra.gmra.mrb[42].mxu0 %v12618_v57  ;;  %18369 = vmatmul.mubr.f32.vlgmr.msra.gmra.mrb[44].mxu1 %v13069_v18 }
 0x532   : > { %18352 = vmatpush3.msra.mxu0 %v21013_v23  ;;  %18353 = vmatprep.mubr.msk.f32.mxu0 %vm19546_vm0, %v19547_v15 }
 0x533   : > { %18377 = vmatpush3.msra.mxu1 %v21013_v23  ;;  %18378 = vmatprep.mubr.msk.f32.mxu1 %vm19546_vm0, %v19547_v15 }
 0x534   : > { %18361 = vmatprep.subr.mxu0 %v19547_v15  ;;  %18386 = vmatprep.subr.mxu1 %v19547_v15 }
 0x535   : > { %18354 = vmatmul.mubr.f32.vlgmr.msra.gmra.mrb[44].mxu0 %v13071_v29  ;;  %18379 = vmatmul.mubr.f32.vlgmr.msra.gmra.mrb[46].mxu1 %v13067_v1 }
 0x536   : > { %18362 = vmatpush3.msra.mxu0 %v21016_v53  ;;  %18363 = vmatprep.mubr.msk.f32.mxu0 %vm19546_vm0, %v19547_v15 }
 0x537   : > { %18371 = vmatprep.subr.mxu0 %v19547_v15  ;;  %18387 = vmatpush3.msra.mxu1 %v20914_v25 }
 0x538   : > { %18388 = vmatprep.mubr.msk.f32.mxu1 %vm19546_vm0, %v19547_v15  ;;  %18396 = vmatprep.subr.mxu1 %v19547_v15 }
 0x539   : > { %18364 = vmatmul.mubr.f32.vlgmr.msra.gmra.mrb[46].mxu0 %v13068_v12 }
 0x53a   : > { %18372 = vmatpush3.msra.mxu0 %v21020_v60  ;;  %18373 = vmatprep.mubr.msk.f32.mxu0 %vm19546_vm0, %v19547_v15 }
 0x53b   : > { %18381 = vmatprep.subr.mxu0 %v19547_v15 }
 0x53d   : > { %18374 = vmatmul.mubr.f32.vlgmr.msra.gmra.mrb[48].mxu0 %v13067_v1 }
 0x53e   : > { %18382 = vmatpush3.msra.mxu0 %v20890_v8  ;;  %18383 = vmatprep.mubr.msk.f32.mxu0 %vm19546_vm0, %v19547_v15 }
 0x53f   : > { %18391 = vmatprep.subr.mxu0 %v19547_v15 }
 0x545   : > { %v10739_v32 = vpop.f32.mrb[20].mxu1 }
 0x546   : > { %v18200_v33 = vpop.f32.mrb[21].mxu1  ;;  %v13897_v62 = vsel %vm4289_vm2, %v10739_v32, 0 }
 0x547   : > { %v13965_v24 = vand.u32 4294901760, %v13897_v62 }
 0x549   : > { %v13966_v30 = vsub.f32 %v13897_v62, %v13965_v24 }
 0x54b   : > { %v13967_v31 = vand.u32 4294901760, %v13966_v30 }
 0x552   : > { %v10287_v35 = vpop.f32.mrb[22].mxu0 }
 0x553   : > { %v13448_v36 = vsel %vm4289_vm2, %v10287_v35, 0  ;;  %v18170_v37 = vpop.f32.mrb[23].mxu0 }
 0x554   : > { %v13516_v38 = vand.u32 4294901760, %v13448_v36 }
 0x556   : > { %v13517_v39 = vsub.f32 %v13448_v36, %v13516_v38  ;;  %18389 = vmatmul.mubr.f32.vlgmr.msra.gmra.mrb[48].mxu1 %v13516_v38 }
 0x557   : > { %18397 = vmatpush3.msra.mxu1 %v20890_v8  ;;  %18398 = vmatprep.mubr.msk.f32.mxu1 %vm19546_vm0, %v19547_v15 }
 0x558   : > { %v13518_v25 = vand.u32 4294901760, %v13517_v39  ;;  %18406 = vmatprep.subr.mxu1 %v19547_v15 }
 0x55a   : > { %v13519_v50 = vsub.f32 %v13517_v39, %v13518_v25  ;;  %18399 = vmatmul.mubr.f32.vlgmr.msra.gmra.mrb[50].mxu1 %v13518_v25 }
 0x55b   : > { %18407 = vmatpush3.msra.mxu1 %v20890_v8  ;;  %18408 = vmatprep.mubr.msk.f32.mxu1 %vm19546_vm0, %v19547_v15  ;;  %v13968_v8 = vsub.f32 %v13966_v30, %v13967_v31 }
 0x55c   : > { %v13520_v45 = vand.u32 4294901760, %v13519_v50  ;;  %18416 = vmatprep.subr.mxu1 %v19547_v15 }
 0x55e   : > { %18384 = vmatmul.mubr.f32.vlgmr.msra.gmra.mrb[50].mxu0 %v13520_v45  ;;  %18409 = vmatmul.mubr.f32.vlgmr.msra.gmra.mrb[52].mxu1 %v13516_v38 }
 0x55f   : > { %18392 = vmatpush3.msra.mxu0 %v20896_v19  ;;  %18393 = vmatprep.mubr.msk.f32.mxu0 %vm19546_vm0, %v19547_v15  ;;  %v13969_v19 = vand.u32 4294901760, %v13968_v8 }
 0x560   : > { %18417 = vmatpush3.msra.mxu1 %v20957_v4  ;;  %18418 = vmatprep.mubr.msk.f32.mxu1 %vm19546_vm0, %v19547_v15 }
 0x561   : > { %18401 = vmatprep.subr.mxu0 %v19547_v15  ;;  %18426 = vmatprep.subr.mxu1 %v19547_v15 }
 0x562   : > { %18394 = vmatmul.mubr.f32.vlgmr.msra.gmra.mrb[52].mxu0 %v13517_v39  ;;  %18419 = vmatmul.mubr.f32.vlgmr.msra.gmra.mrb[54].mxu1 %v13965_v24 }
 0x563   : > { %18402 = vmatpush3.msra.mxu0 %v20903_v20  ;;  %18403 = vmatprep.mubr.msk.f32.mxu0 %vm19546_vm0, %v19547_v15 }
 0x564   : > { %18427 = vmatpush3.msra.mxu1 %v20933_v41  ;;  %18428 = vmatprep.mubr.msk.f32.mxu1 %vm19546_vm0, %v19547_v15 }
 0x565   : > { %18411 = vmatprep.subr.mxu0 %v19547_v15  ;;  %18436 = vmatprep.subr.mxu1 %v19547_v15 }
 0x566   : > { %18404 = vmatmul.mubr.f32.vlgmr.msra.gmra.mrb[54].mxu0 %v13516_v38  ;;  %18429 = vmatmul.mubr.f32.vlgmr.msra.gmra.mrb[56].mxu1 %v13967_v31 }
 0x567   : > { %18412 = vmatpush3.msra.mxu0 %v20933_v41  ;;  %18413 = vmatprep.mubr.msk.f32.mxu0 %vm19546_vm0, %v19547_v15 }
 0x568   : > { %18437 = vmatpush3.msra.mxu1 %v20933_v41  ;;  %18438 = vmatprep.mubr.msk.f32.mxu1 %vm19546_vm0, %v19547_v15 }
 0x569   : > { %18421 = vmatprep.subr.mxu0 %v19547_v15  ;;  %18446 = vmatprep.subr.mxu1 %v19547_v15 }
 0x56a   : > { %18414 = vmatmul.mubr.f32.vlgmr.msra.gmra.mrb[56].mxu0 %v13969_v19  ;;  %18439 = vmatmul.mubr.f32.vlgmr.msra.gmra.mrb[58].mxu1 %v13965_v24 }
 0x56b   : > { %18422 = vmatpush3.msra.mxu0 %v20936_v26  ;;  %18423 = vmatprep.mubr.msk.f32.mxu0 %vm19546_vm0, %v19547_v15 }
 0x56c   : > { %18431 = vmatprep.subr.mxu0 %v19547_v15  ;;  %18447 = vmatpush3.msra.mxu1 %v20990_v46 }
 0x56d   : > { %18448 = vmatprep.mubr.msk.f32.mxu1 %vm19546_vm0, %v19547_v15  ;;  %18456 = vmatprep.subr.mxu1 %v19547_v15 }
 0x56e   : > { %18424 = vmatmul.mubr.f32.vlgmr.msra.gmra.mrb[58].mxu0 %v13966_v30 }
 0x56f   : > { %18432 = vmatpush3.msra.mxu0 %v20940_v56  ;;  %18433 = vmatprep.mubr.msk.f32.mxu0 %vm19546_vm0, %v19547_v15 }
 0x570   : > { %18441 = vmatprep.subr.mxu0 %v19547_v15 }
 0x572   : > { %18434 = vmatmul.mubr.f32.vlgmr.msra.gmra.mrb[60].mxu0 %v13965_v24 }
 0x573   : > { %18442 = vmatpush3.msra.mxu0 %v20951_v3  ;;  %18443 = vmatprep.mubr.msk.f32.mxu0 %vm19546_vm0, %v19547_v15 }
 0x574   : > { %18451 = vmatprep.subr.mxu0 %v19547_v15 }
 0x57b   : > { %v11643_v20 = vpop.f32.mrb[22].mxu1 }
 0x57c   : > { %v18260_v41 = vpop.f32.mrb[23].mxu1  ;;  %v14795_v47 = vsel %vm4289_vm2, %v11643_v20, 0 }
 0x57d   : > { %v14863_v58 = vand.u32 4294901760, %v14795_v47 }
 0x57f   : > { %v14864_v0 = vsub.f32 %v14795_v47, %v14863_v58 }
 0x581   : > { %v14865_v5 = vand.u32 4294901760, %v14864_v0 }
 0x587   : > { %v11191_v26 = vpop.f32.mrb[24].mxu0 }
 0x588   : > { %v14346_v28 = vsel %vm4289_vm2, %v11191_v26, 0  ;;  %v18230_v22 = vpop.f32.mrb[25].mxu0 }
 0x589   : > { %v14414_v56 = vand.u32 4294901760, %v14346_v28 }
 0x58b   : > { %v14415_v48 = vsub.f32 %v14346_v28, %v14414_v56  ;;  %18449 = vmatmul.mubr.f32.vlgmr.msra.gmra.mrb[60].mxu1 %v14414_v56 }
 0x58c   : > { %18457 = vmatpush3.msra.mxu1 %v20951_v3  ;;  %18458 = vmatprep.mubr.msk.f32.mxu1 %vm19546_vm0, %v19547_v15 }
 0x58d   : > { %v14416_v59 = vand.u32 4294901760, %v14415_v48  ;;  %18466 = vmatprep.subr.mxu1 %v19547_v15 }
 0x58f   : > { %v14417_v63 = vsub.f32 %v14415_v48, %v14416_v59  ;;  %18459 = vmatmul.mubr.f32.vlgmr.msra.gmra.mrb[62].mxu1 %v14416_v59 }
 0x590   : > { %18467 = vmatpush3.msra.mxu1 %v20951_v3  ;;  %18468 = vmatprep.mubr.msk.f32.mxu1 %vm19546_vm0, %v19547_v15  ;;  %v14866_v3 = vsub.f32 %v14864_v0, %v14865_v5 }
 0x591   : > { %v14418_v4 = vand.u32 4294901760, %v14417_v63  ;;  %18476 = vmatprep.subr.mxu1 %v19547_v15 }
 0x593   : > { %18444 = vmatmul.mubr.f32.vlgmr.msra.gmra.mrb[62].mxu0 %v14418_v4  ;;  %18469 = vmatmul.mubr.f32.vlgmr.msra.gmra.mrb[64].mxu1 %v14414_v56 }
 0x594   : > { %18452 = vmatpush3.msra.mxu0 %v20960_v2  ;;  %18453 = vmatprep.mubr.msk.f32.mxu0 %vm19546_vm0, %v19547_v15  ;;  %v14867_v2 = vand.u32 4294901760, %v14866_v3 }
 0x595   : > { %18477 = vmatpush3.msra.mxu1 %v21033_v17  ;;  %18478 = vmatprep.mubr.msk.f32.mxu1 %vm19546_vm0, %v19547_v15 }
 0x596   : > { %18461 = vmatprep.subr.mxu0 %v19547_v15  ;;  %18486 = vmatprep.subr.mxu1 %v19547_v15 }
 0x597   : > { %18454 = vmatmul.mubr.f32.vlgmr.msra.gmra.mrb[64].mxu0 %v14415_v48  ;;  %18479 = vmatmul.mubr.f32.vlgmr.msra.gmra.mrb[66].mxu1 %v14863_v58 }
 0x598   : > { %18462 = vmatpush3.msra.mxu0 %v20970_v52  ;;  %18463 = vmatprep.mubr.msk.f32.mxu0 %vm19546_vm0, %v19547_v15 }
 0x599   : > { %18487 = vmatpush3.msra.mxu1 %v21013_v23  ;;  %18488 = vmatprep.mubr.msk.f32.mxu1 %vm19546_vm0, %v19547_v15 }
 0x59a   : > { %18471 = vmatprep.subr.mxu0 %v19547_v15  ;;  %18496 = vmatprep.subr.mxu1 %v19547_v15 }
 0x59b   : > { %18464 = vmatmul.mubr.f32.vlgmr.msra.gmra.mrb[66].mxu0 %v14414_v56  ;;  %18489 = vmatmul.mubr.f32.vlgmr.msra.gmra.mrb[68].mxu1 %v14865_v5 }
 0x59c   : > { %18472 = vmatpush3.msra.mxu0 %v21013_v23  ;;  %18473 = vmatprep.mubr.msk.f32.mxu0 %vm19546_vm0, %v19547_v15 }
 0x59d   : > { %18497 = vmatpush3.msra.mxu1 %v21013_v23  ;;  %18498 = vmatprep.mubr.msk.f32.mxu1 %vm19546_vm0, %v19547_v15 }
 0x59e   : > { %18481 = vmatprep.subr.mxu0 %v19547_v15 }
 0x59f   : > { %18474 = vmatmul.mubr.f32.vlgmr.msra.gmra.mrb[68].mxu0 %v14867_v2  ;;  %18499 = vmatmul.mubr.f32.vlgmr.msra.gmra.mrb[70].mxu1 %v14863_v58 }
 0x5a0   : > { %18482 = vmatpush3.msra.mxu0 %v21016_v53  ;;  %18483 = vmatprep.mubr.msk.f32.mxu0 %vm19546_vm0, %v19547_v15 }
 0x5a1   : > { %18491 = vmatprep.subr.mxu0 %v19547_v15 }
 0x5a3   : > { %18484 = vmatmul.mubr.f32.vlgmr.msra.gmra.mrb[70].mxu0 %v14864_v0 }
 0x5a4   : > { %18492 = vmatpush3.msra.mxu0 %v21020_v60  ;;  %18493 = vmatprep.mubr.msk.f32.mxu0 %vm19546_vm0, %v19547_v15 }
 0x5a7   : > { %18494 = vmatmul.mubr.f32.vlgmr.msra.gmra.mrb[72].mxu0 %v14863_v58 }
 0x5b1   : > { %v11802_v27 = vpop.f32.mrb[24].mxu1 }
 0x5b2   : > { %v18270_v6 = vpop.f32.mrb[25].mxu1 }
 0x5b5   : > { %v11950_v14 = vpop.f32.mrb[26].mxu1 }
 0x5b6   : > { %v18280_v52 = vpop.f32.mrb[27].mxu1 }
 0x5b9   : > { %v11726_v34 = vpop.f32.mrb[26].mxu0  ;;  %v12096_v42 = vpop.f32.mrb[28].mxu1 }
 0x5ba   : > { %v11803_v43 = vadd.f32 %v11802_v27, %v11726_v34  ;;  %v18265_v44 = vpop.f32.mrb[27].mxu0  ;;  %v18290_v46 = vpop.f32.mrb[29].mxu1 }
 0x5bd   : > { %v11876_v49 = vpop.f32.mrb[28].mxu0  ;;  %v12251_v23 = vpop.f32.mrb[30].mxu1 }
 0x5be   : > { %v11877_v51 = vadd.f32 %v11876_v49, %v11803_v43  ;;  %v18275_v40 = vpop.f32.mrb[29].mxu0  ;;  %v18300_v53 = vpop.f32.mrb[31].mxu1  ;;  %v21168_v43 = vld [vmem:[%s21438_s8] ss:$0 sm:$0xff] }
 0x5bf   : > { %v19479_v49 = vld [vmem:[%s19743_s29] sm:$0xff] }
 0x5c0   : > { %v11951_v54 = vadd.f32 %v11950_v14, %v11877_v51 }
 0x5c1   : > { %v12024_v55 = vpop.f32.mrb[30].mxu0  ;;  %v12399_v16 = vpop.f32.mrb[32].mxu1 }
 0x5c2   : > { %v12025_v57 = vadd.f32 %v12024_v55, %v11951_v54  ;;  %v18285_v15 = vpop.f32.mrb[31].mxu0  ;;  %v18310_v60 = vpop.f32.mrb[33].mxu1 }
 0x5c4   : > { %v12097_v7 = vadd.f32 %v12096_v42, %v12025_v57 }
 0x5c5   : > { %v12175_v9 = vpop.f32.mrb[32].mxu0  ;;  %v12545_v1 = vpop.f32.mrb[34].mxu1 }
 0x5c6   : > { %v12252_v10 = vadd.f32 %v12251_v23, %v12175_v9  ;;  %v18295_v61 = vpop.f32.mrb[33].mxu0  ;;  %v18320_v11 = vpop.f32.mrb[35].mxu1 }
 0x5c9   : > { %v12325_v12 = vpop.f32.mrb[34].mxu0 }
 0x5ca   : > { %v12326_v13 = vadd.f32 %v12325_v12, %v12252_v10  ;;  %v18305_v17 = vpop.f32.mrb[35].mxu0 }
 0x5cc   : > { %v12400_v18 = vadd.f32 %v12399_v16, %v12326_v13 }
 0x5cd   : > { %v12473_v21 = vpop.f32.mrb[36].mxu0 }
 0x5ce   : > { %v12474_v29 = vadd.f32 %v12473_v21, %v12400_v18  ;;  %v18315_v32 = vpop.f32.mrb[37].mxu0 }
 0x5d0   : > { %v12546_v33 = vadd.f32 %v12545_v1, %v12474_v29 }
 0x5d2   : > { %v15243_v35 = vadd.f32 %v12546_v33, %v12097_v7 }
 0x5f4   : > { %v12700_v36 = vpop.f32.mrb[36].mxu1 }
 0x5f5   : > { %v18330_v37 = vpop.f32.mrb[37].mxu1 }
 0x5f8   : > { %v12848_v38 = vpop.f32.mrb[38].mxu1 }
 0x5f9   : > { %v18340_v62 = vpop.f32.mrb[39].mxu1 }
 0x5fc   : > { %v12624_v39 = vpop.f32.mrb[38].mxu0  ;;  %v12994_v24 = vpop.f32.mrb[40].mxu1 }
 0x5fd   : > { %v12701_v25 = vadd.f32 %v12700_v36, %v12624_v39  ;;  %v18325_v50 = vpop.f32.mrb[39].mxu0  ;;  %v18350_v30 = vpop.f32.mrb[41].mxu1 }
 0x600   : > { %v12774_v45 = vpop.f32.mrb[40].mxu0  ;;  %v13149_v31 = vpop.f32.mrb[42].mxu1 }
 0x601   : > { %v12775_v8 = vadd.f32 %v12774_v45, %v12701_v25  ;;  %v18335_v19 = vpop.f32.mrb[41].mxu0  ;;  %v18360_v20 = vpop.f32.mrb[43].mxu1 }
 0x603   : > { %v12849_v41 = vadd.f32 %v12848_v38, %v12775_v8 }
 0x604   : > { %v12922_v26 = vpop.f32.mrb[42].mxu0  ;;  %v13297_v28 = vpop.f32.mrb[44].mxu1 }
 0x605   : > { %v12923_v22 = vadd.f32 %v12922_v26, %v12849_v41  ;;  %v18345_v56 = vpop.f32.mrb[43].mxu0  ;;  %v18370_v47 = vpop.f32.mrb[45].mxu1 }
 0x607   : > { %v12995_v48 = vadd.f32 %v12994_v24, %v12923_v22 }
 0x608   : > { %v13073_v58 = vpop.f32.mrb[44].mxu0  ;;  %v13443_v59 = vpop.f32.mrb[46].mxu1 }
 0x609   : > { %v15245_v63 = vadd.f32 %v15243_v35, %v12995_v48  ;;  %v13150_v0 = vadd.f32 %v13149_v31, %v13073_v58  ;;  %v18355_v4 = vpop.f32.mrb[45].mxu0  ;;  %v18380_v5 = vpop.f32.mrb[47].mxu1 }
 0x60c   : > { %v13223_v3 = vpop.f32.mrb[46].mxu0 }
 0x60d   : > { %v13224_v2 = vadd.f32 %v13223_v3, %v13150_v0  ;;  %v18365_v27 = vpop.f32.mrb[47].mxu0 }
 0x60f   : > { %v13298_v6 = vadd.f32 %v13297_v28, %v13224_v2 }
 0x610   : > { %v13371_v14 = vpop.f32.mrb[48].mxu0 }
 0x611   : > { %v13372_v52 = vadd.f32 %v13371_v14, %v13298_v6  ;;  %v18375_v34 = vpop.f32.mrb[49].mxu0 }
 0x613   : > { %v13444_v42 = vadd.f32 %v13443_v59, %v13372_v52 }
 0x615   : > { %v15247_v44 = vadd.f32 %v15245_v63, %v13444_v42 }
 0x617   : > { %v15254_v46 = vadd.f32 %v21168_v43, %v15247_v44 }
 0x619   : > { %v21172_v23 = vadd.f32 %v19479_v49, %v15254_v46 }
 0x61b   : > { %v15260_v51 = vsel %vm399_vm1, %v21172_v23, 0.0 }
 0x61c   : > { %15261 = vadd.xlane.f32.xlu0 %v15260_v51 }
 0x629   : > { %v13598_v40 = vpop.f32.mrb[48].mxu1 }
 0x62a   : > { %v18390_v53 = vpop.f32.mrb[49].mxu1 }
 0x62d   : > { %v13746_v54 = vpop.f32.mrb[50].mxu1 }
 0x62e   : > { %v18400_v55 = vpop.f32.mrb[51].mxu1 }
 0x631   : > { %v13522_v16 = vpop.f32.mrb[50].mxu0  ;;  %v13892_v57 = vpop.f32.mrb[52].mxu1 }
 0x632   : > { %v13599_v15 = vadd.f32 %v13598_v40, %v13522_v16  ;;  %v18385_v60 = vpop.f32.mrb[51].mxu0  ;;  %v18410_v7 = vpop.f32.mrb[53].mxu1 }
 0x635   : > { %v13672_v9 = vpop.f32.mrb[52].mxu0  ;;  %v14047_v1 = vpop.f32.mrb[54].mxu1 }
 0x636   : > { %v13673_v10 = vadd.f32 %v13672_v9, %v13599_v15  ;;  %v18395_v61 = vpop.f32.mrb[53].mxu0  ;;  %v18420_v11 = vpop.f32.mrb[55].mxu1 }
 0x638   : > { %v13747_v12 = vadd.f32 %v13746_v54, %v13673_v10 }
 0x639   : > { %v13820_v13 = vpop.f32.mrb[54].mxu0  ;;  %v14195_v17 = vpop.f32.mrb[56].mxu1 }
 0x63a   : > { %v13821_v18 = vadd.f32 %v13820_v13, %v13747_v12  ;;  %v18405_v21 = vpop.f32.mrb[55].mxu0  ;;  %v18430_v29 = vpop.f32.mrb[57].mxu1 }
 0x63c   : > { %v13893_v32 = vadd.f32 %v13892_v57, %v13821_v18 }
 0x63d   : > { %v13971_v33 = vpop.f32.mrb[56].mxu0  ;;  %v14341_v35 = vpop.f32.mrb[58].mxu1 }
 0x63e   : > { %v14048_v36 = vadd.f32 %v14047_v1, %v13971_v33  ;;  %v18415_v37 = vpop.f32.mrb[57].mxu0  ;;  %v18440_v38 = vpop.f32.mrb[59].mxu1  ;;  %v19480_v1 = vld [vmem:[%s19743_s29 + $0x8] sm:$0xff]  ;;  %s19487_s29 = scalar_lea.vmem %s19486_s26, 512 }
 0x63f   : > { %p19489_p1 = scmp.lt.s32.totalorder %s19487_s29, %s19481_s22 }
 0x641   : > { %v14121_v62 = vpop.f32.mrb[58].mxu0  ;;  %p19490_p2 = por %p19489_p1, %p19488_p0 }
 0x642   : > { %v14122_v39 = vadd.f32 %v14121_v62, %v14048_v36  ;;  %v18425_v24 = vpop.f32.mrb[59].mxu0  ;;  %v15316_v36 = vld [vmem:[%s21435_s5 + $0x10] sm:$0xff]  ;;  %v15317_v62 = vld [vmem:[%s21435_s5 + $0x18] sm:$0xff] }
 0x643   : > { %p19491_p3 = pnand %p19490_p2, %p19484_p13 }
 0x644   : > { %v14196_v25 = vadd.f32 %v14195_v17, %v14122_v39  ;;  %v15338_v39 = vand.u32 4294901760, %v15316_v36 }
 0x645   : > { %v14269_v50 = vpop.f32.mrb[60].mxu0 }
 0x646   : > { %v14270_v30 = vadd.f32 %v14269_v50, %v14196_v25  ;;  %v18435_v45 = vpop.f32.mrb[61].mxu0  ;;  %v15341_v25 = vand.u32 4294901760, %v15317_v62 }
 0x648   : > { %v14342_v31 = vadd.f32 %v14341_v35, %v14270_v30  ;;  %v15314_v35 = vld [vmem:[%s21435_s5] sm:$0xff]  ;;  %v21200_v45 = vpack.c.bf16 %v15341_v25, %v15338_v39 }
 0x649   : > { %v15332_v37 = vand.u32 4294901760, %v15314_v35 }
 0x64a   : > { %v15244_v8 = vadd.f32 %v14342_v31, %v13893_v32 }
 0x65e   : > { %v14496_v19 = vpop.f32.mrb[60].mxu1 }
 0x65f   : > { %v18450_v20 = vpop.f32.mrb[61].mxu1 }
 0x660   : > { %v15422_v20 = vsub.f32 %v15314_v35, %v15332_v37 }
 0x662   : > { %v14644_v41 = vpop.f32.mrb[62].mxu1 }
 0x663   : > { %v18460_v26 = vpop.f32.mrb[63].mxu1 }
 0x666   : > { %v14420_v28 = vpop.f32.mrb[62].mxu0  ;;  %v14790_v22 = vpop.f32.mrb[64].mxu1 }
 0x667   : > { %v14497_v56 = vadd.f32 %v14496_v19, %v14420_v28  ;;  %v18445_v47 = vpop.f32.mrb[63].mxu0  ;;  %v18470_v48 = vpop.f32.mrb[65].mxu1 }
 0x66a   : > { %v14570_v58 = vpop.f32.mrb[64].mxu0  ;;  %v14945_v59 = vpop.f32.mrb[66].mxu1 }
 0x66b   : > { %v14571_v63 = vadd.f32 %v14570_v58, %v14497_v56  ;;  %v18455_v0 = vpop.f32.mrb[65].mxu0  ;;  %v18480_v4 = vpop.f32.mrb[67].mxu1 }
 0x66d   : > { %v14645_v5 = vadd.f32 %v14644_v41, %v14571_v63  ;;  %v15443_v63 = vsub.f32 %v15317_v62, %v15341_v25 }
 0x66e   : > { %v14718_v3 = vpop.f32.mrb[66].mxu0  ;;  %v15093_v2 = vpop.f32.mrb[68].mxu1 }
 0x66f   : > { %v14719_v27 = vadd.f32 %v14718_v3, %v14645_v5  ;;  %v18465_v6 = vpop.f32.mrb[67].mxu0  ;;  %v18490_v14 = vpop.f32.mrb[69].mxu1  ;;  %v15444_v3 = vand.u32 4294901760, %v15443_v63 }
 0x671   : > { %v14791_v52 = vadd.f32 %v14790_v22, %v14719_v27  ;;  %v15423_v22 = vand.u32 4294901760, %v15422_v20  ;;  %v15445_v6 = vsub.f32 %v15443_v63, %v15444_v3 }
 0x672   : > { %v14869_v34 = vpop.f32.mrb[68].mxu0  ;;  %v15239_v42 = vpop.f32.mrb[70].mxu1 }
 0x673   : > { %v15246_v44 = vadd.f32 %v15244_v8, %v14791_v52  ;;  %v14946_v46 = vadd.f32 %v14945_v59, %v14869_v34  ;;  %v18475_v49 = vpop.f32.mrb[69].mxu0  ;;  %v18500_v51 = vpop.f32.mrb[71].mxu1  ;;  %v15424_v48 = vsub.f32 %v15422_v20, %v15423_v22  ;;  %v15436_v59 = vsub.f32 %v15316_v36, %v15338_v39  ;;  %v16617_v34 = vld [vmem:[%s21438_s8 + $0x1] ss:$0 sm:$0xff] }
 0x674   : > { %v15446_v52 = vand.u32 4294901760, %v15445_v6  ;;  %v16618_v49 = vld [vmem:[%s21438_s8 + $0x2] ss:$0 sm:$0xff] }
 0x675   : > { %v15425_v0 = vand.u32 4294901760, %v15424_v48  ;;  %v15437_v5 = vand.u32 4294901760, %v15436_v59 }
 0x676   : > { %v15019_v40 = vpop.f32.mrb[70].mxu0 }
 0x677   : > { %v15020_v53 = vadd.f32 %v15019_v40, %v14946_v46  ;;  %v18485_v54 = vpop.f32.mrb[71].mxu0  ;;  %v15438_v27 = vsub.f32 %v15436_v59, %v15437_v5 }
 0x678   : > { %v21221_v54 = vpack.c.bf16 %v15443_v63, %v15436_v59 }
 0x679   : > { %v15094_v55 = vadd.f32 %v15093_v2, %v15020_v53  ;;  %v15439_v14 = vand.u32 4294901760, %v15438_v27 }
 0x67a   : > { %v15167_v16 = vpop.f32.mrb[72].mxu0 }
 0x67b   : > { %v15168_v57 = vadd.f32 %v15167_v16, %v15094_v55  ;;  %v18495_v15 = vpop.f32.mrb[73].mxu0 }
 0x67d   : > { %v15240_v60 = vadd.f32 %v15239_v42, %v15168_v57  ;;  %v21212_v42 = vpack.c.bf16 %v15446_v52, %v15439_v14 }
 0x67f   : > { %v15248_v7 = vadd.f32 %v15246_v44, %v15240_v60 }
 0x681   : > { %v15255_v9 = vadd.f32 %v21168_v43, %v15248_v7 }
 0x683   : > { %v15257_v10 = vadd.f32 %v19480_v1, %v15255_v9  ;;  %v21236_v1 = vpack.c.bf16 %v15444_v3, %v15437_v5 }
 0x685   : > { %v15263_v61 = vsel %vm399_vm1, %v15257_v10, 0.0 }
 0x686   : > { %15264 = vadd.xlane.f32.xlu1 %v15263_v61  ;;  %v15862_v61 = vld [vmem:[%s21437_s7 + $0x8] sm:$0xff] }
 0x6a9   : > { %v15262_v11 = vpop.xlane.xlu0 %15261 }
 0x6aa   : > { %v15267_v12 = vmul.f32 0.03125, %v15262_v11  ;;  %v15863_v11 = vld [vmem:[%s21437_s7 + $0x10] sm:$0xff] }
 0x6ac   : > { %v15269_v13 = vsub.f32 %v21172_v23, %v15267_v12  ;;  %v15315_v23 = vld [vmem:[%s21435_s5 + $0x8] sm:$0xff] }
 0x6ad   : > { %v15335_v38 = vand.u32 4294901760, %v15315_v23 }
 0x6ae   : > { %v15271_v17 = vmul.f32 %v15269_v13, %v15269_v13  ;;  %v15300_v44 = vmul.f32 %v16617_v34, %v15269_v13  ;;  %v15885_v13 = vand.u32 4294901760, %v15862_v61 }
 0x6af   : > { %v21198_v30 = vpack.c.bf16 %v15335_v38, %v15332_v37  ;;  %v15429_v41 = vsub.f32 %v15315_v23, %v15335_v38 }
 0x6b0   : > { %v15273_v18 = vsel %vm399_vm1, %v15271_v17, 0.0  ;;  %v15864_v17 = vld [vmem:[%s21437_s7 + $0x18] sm:$0xff] }
 0x6b1   : > { %15274 = vadd.xlane.f32.xlu1 %v15273_v18  ;;  %18970 = vmatprep.subr.bf16.mxu0 %v21198_v30  ;;  %v15430_v56 = vand.u32 4294901760, %v15429_v41  ;;  %v21217_v40 = vpack.c.bf16 %v15429_v41, %v15422_v20  ;;  %v15888_v18 = vand.u32 4294901760, %v15863_v11 }
 0x6b2   : > { %18972 = vmatpush3.bf16.msra.mxu0 %v21198_v30 }
 0x6b3   : > { %18974 = vmatprep.subr.bf16.mxu0 %v21200_v45  ;;  %v15431_v58 = vsub.f32 %v15429_v41, %v15430_v56  ;;  %v21234_v9 = vpack.c.bf16 %v15430_v56, %v15423_v22  ;;  %v21256_v35 = vsub.f32 %v15863_v11, %v15888_v18 }
 0x6b5   : > { %v15432_v4 = vand.u32 4294901760, %v15431_v58  ;;  %v15991_v62 = vand.u32 4294901760, %v21256_v35 }
 0x6b6   : > { %18976 = vmatpush3.bf16.msra.mxu0 %v21200_v45 }
 0x6b7   : > { %v21206_v2 = vpack.c.bf16 %v15432_v4, %v15425_v0 }
 0x6b9   : > { %18978 = vmatprep.subr.bf16.mxu0 %v21206_v2 }
 0x713   : > { %v15265_v21 = vpop.xlane.xlu1 %15264 }
 0x714   : > { %v15268_v29 = vmul.f32 0.03125, %v15265_v21  ;;  %v15891_v21 = vand.u32 4294901760, %v15864_v17 }
 0x716   : > { %v21181_v32 = vsub.f32 %v15257_v10, %v15268_v29  ;;  %v15861_v10 = vld [vmem:[%s21437_s7] sm:$0xff]  ;;  %v21258_v23 = vpack.c.bf16 %v15891_v21, %v15888_v18  ;;  %v21260_v36 = vsub.f32 %v15864_v17, %v15891_v21 }
 0x717   : > { %v15882_v12 = vand.u32 4294901760, %v15861_v10 }
 0x718   : > { %v15272_v43 = vmul.f32 %v21181_v32, %v21181_v32  ;;  %v15998_v39 = vand.u32 4294901760, %v21260_v36  ;;  %v15301_v4 = vmul.f32 %v16617_v34, %v21181_v32  ;;  %v15865_v32 = vld [vmem:[%s21437_s7 + $0x20] sm:$0xff] }
 0x719   : > { %v21250_v29 = vpack.c.bf16 %v15885_v13, %v15882_v12 }
 0x71a   : > { %v15276_v33 = vsel %vm399_vm1, %v15272_v43, 0.0  ;;  %v21252_v43 = vsub.f32 %v15861_v10, %v15882_v12 }
 0x71b   : > { %15277 = vadd.xlane.f32.xlu1 %v15276_v33  ;;  %v21254_v33 = vsub.f32 %v15862_v61, %v15885_v13 }
 0x71c   : > { %v15977_v37 = vand.u32 4294901760, %v21252_v43 }
 0x71d   : > { %v15984_v38 = vand.u32 4294901760, %v21254_v33 }
 0x71f   : > { %v15985_v25 = vsub.f32 %v21254_v33, %v15984_v38 }
 0x73e   : > { %v15275_v24 = vpop.xlane.xlu1 %15274 }
 0x73f   : > { %v15280_v50 = vmul.f32 0.032258064, %v15275_v24  ;;  %v15978_v24 = vsub.f32 %v21252_v43, %v15977_v37 }
 0x741   : > { %19463 = vrsqrt.f32 %v15280_v50  ;;  %vm15284_vm7 = vcmp.eq.f32.partialorder %v15280_v50, inf  ;;  %v15287_v19 = vand.u32 2147483648, %v15280_v50  ;;  %vm15286_vm8 = vcmp.eq.f32.partialorder %v15280_v50, 0.0 }
 0x74b   : > { %v19464_v31 = vpop.eup %19463 }
 0x74c   : > { %v15283_v8 = vmul.f32 %v19464_v31, %v15280_v50  ;;  %v15999_v31 = vsub.f32 %v21260_v36, %v15998_v39 }
 0x74e   : > { %v15285_v26 = vsel %vm15284_vm7, %v15280_v50, %v15283_v8  ;;  %v15992_v50 = vsub.f32 %v21256_v35, %v15991_v62  ;;  %v15979_v8 = vand.u32 4294901760, %v15978_v24  ;;  %v16000_v41 = vand.u32 4294901760, %v15999_v31 }
 0x74f   : > { %v15288_v28 = vsel %vm15286_vm8, %v15287_v19, %v15285_v26  ;;  %v15986_v19 = vand.u32 4294901760, %v15985_v25  ;;  %v19049_v25 = vpack.c.bf16 %v21254_v33, %v21252_v43 }
 0x750   : > { %v15302_v47 = vadd.f32 1e-06, %v15288_v28  ;;  %v15993_v20 = vand.u32 4294901760, %v15992_v50 }
 0x751   : > { %v19033_v26 = vpack.c.bf16 %v15986_v19, %v15979_v8 }
 0x752   : > { %19465 = vrcp.f32 %v15302_v47  ;;  %v19037_v28 = vpack.c.bf16 %v16000_v41, %v15993_v20 }
 0x753   : > { %19034 = vmatprep.subr.bf16.mxu1 %v19033_v26 }
 0x754   : > { %19036 = vmatpush3.bf16.msra.mxu1 %v19033_v26  ;;  %v16619_v26 = vld [vmem:[%s21436_s6] ss:$0 sm:$0xff] }
 0x755   : > { %19038 = vmatprep.subr.bf16.mxu1 %v19037_v28 }
 0x758   : > { %19040 = vmatpush3.bf16.msra.mxu1 %v19037_v28 }
 0x75c   : > { %v19466_v46 = vpop.eup %19465 }
 0x75d   : > { %v15305_v51 = vmul.f32 %v19466_v46, %v15300_v44 }
 0x75f   : > { %v21219_v53 = vadd.f32 %v16618_v49, %v15305_v51 }
 0x761   : > { %v15326_v55 = vsel %vm399_vm1, %v21219_v53, 0 }
 0x762   : > { %v21225_v16 = vand.u32 4294901760, %v15326_v55 }
 0x764   : > { %v21228_v57 = vsub.f32 %v15326_v55, %v21225_v16 }
 0x766   : > { %v15402_v15 = vand.u32 4294901760, %v21228_v57 }
 0x768   : > { %v15403_v60 = vsub.f32 %v21228_v57, %v15402_v15 }
 0x76a   : > { %v15404_v7 = vand.u32 4294901760, %v15403_v60 }
 0x76c   : > { %18509 = vmatprep.mubr.f32.mxu0 %v15404_v7 }
 0x7a8   : > { %v15278_v22 = vpop.xlane.xlu1 %15277 }
 0x7a9   : > { %v15281_v56 = vmul.f32 0.032258064, %v15278_v22 }
 0x7ab   : > { %19467 = vrsqrt.f32 %v15281_v56  ;;  %vm15291_vm9 = vcmp.eq.f32.partialorder %v15281_v56, inf  ;;  %v15294_v58 = vand.u32 2147483648, %v15281_v56  ;;  %vm15293_vm10 = vcmp.eq.f32.partialorder %v15281_v56, 0.0 }
 0x7b5   : > { %v19468_v47 = vpop.eup %19467 }
 0x7b6   : > { %v15290_v48 = vmul.f32 %v19468_v47, %v15281_v56 }
 0x7b8   : > { %v15292_v59 = vsel %vm15291_vm9, %v15281_v56, %v15290_v48 }
 0x7b9   : > { %v15295_v63 = vsel %vm15293_vm10, %v15294_v58, %v15292_v59 }
 0x7ba   : > { %v15303_v0 = vadd.f32 1e-06, %v15295_v63 }
 0x7bc   : > { %19469 = vrcp.f32 %v15303_v0 }
 0x7c6   : > { %v19470_v5 = vpop.eup %19469 }
 0x7c7   : > { %v15307_v3 = vmul.f32 %v19470_v5, %v15301_v4 }
 0x7c9   : > { %v21279_v27 = vadd.f32 %v16618_v49, %v15307_v3  ;;  %v15867_v49 = vld [vmem:[%s21437_s7 + $0x30] sm:$0xff]  ;;  %v19053_v3 = vpack.c.bf16 %v21260_v36, %v21256_v35 }
 0x7cb   : > { %v15329_v6 = vsel %vm399_vm1, %v21279_v27, 0 }
 0x7cc   : > { %v15410_v14 = vand.u32 4294901760, %v15329_v6 }
 0x7ce   : > { %v15411_v52 = vsub.f32 %v15329_v6, %v15410_v14 }
 0x7d0   : > { %v15412_v44 = vand.u32 4294901760, %v15411_v52 }
 0x7d2   : > { %v15413_v46 = vsub.f32 %v15411_v52, %v15412_v44 }
 0x7d4   : > { %v15414_v51 = vand.u32 4294901760, %v15413_v46 }
 0x7d6   : > { %18510 = vmatmul.mubr.f32.vlgmr.msra.gmra.mrb[74].mxu0 %v15414_v51 }
 0x7d7   : > { %18980 = vmatpush3.bf16.msra.mxu0 %v21206_v2  ;;  %18520 = vmatprep.mubr.f32.mxu0 %v21225_v16  ;;  %v15894_v2 = vand.u32 4294901760, %v15865_v32 }
 0x7d8   : > { %18982 = vmatprep.subr.bf16.mxu0 %v21212_v42 }
 0x7db   : > { %18984 = vmatpush3.bf16.msra.mxu0 %v21212_v42 }
 0x7dc   : > { %18986 = vmatprep.subr.bf16.mxu0 %v21217_v40 }
 0x7de   : > { %18521 = vmatmul.mubr.f32.vlgmr.msra.gmra.mrb[74].mxu0 %v15410_v14 }
 0x7df   : > { %18988 = vmatpush3.bf16.msra.mxu0 %v21217_v40  ;;  %18531 = vmatprep.mubr.f32.mxu0 %v21228_v57  ;;  %v15868_v40 = vld [vmem:[%s21437_s7 + $0x38] sm:$0xff] }
 0x7e0   : > { %18990 = vmatprep.subr.bf16.mxu0 %v21221_v54  ;;  %v15903_v57 = vand.u32 4294901760, %v15868_v40 }
 0x7e3   : > { %18992 = vmatpush3.bf16.msra.mxu0 %v21221_v54 }
 0x7e4   : > { %18994 = vmatprep.subr.bf16.mxu0 %v21198_v30 }
 0x7e6   : > { %18532 = vmatmul.mubr.f32.vlgmr.msra.gmra.mrb[74].mxu0 %v15411_v52 }
 0x7e7   : > { %18996 = vmatpush3.bf16.msra.mxu0 %v21198_v30  ;;  %18542 = vmatprep.mubr.f32.mxu0 %v15402_v15 }
 0x7e8   : > { %18998 = vmatprep.subr.bf16.mxu0 %v21200_v45 }
 0x7eb   : > { %19000 = vmatpush3.bf16.msra.mxu0 %v21200_v45 }
 0x7ec   : > { %19002 = vmatprep.subr.bf16.mxu0 %v21234_v9 }
 0x7ee   : > { %18543 = vmatmul.mubr.f32.vlgmr.msra.gmra.mrb[74].mxu0 %v15412_v44 }
 0x7ef   : > { %19004 = vmatpush3.bf16.msra.mxu0 %v21234_v9  ;;  %18553 = vmatprep.mubr.f32.mxu0 %v21225_v16  ;;  %v16025_v9 = vsub.f32 %v15868_v40, %v15903_v57 }
 0x7f0   : > { %19006 = vmatprep.subr.bf16.mxu0 %v21236_v1 }
 0x7f1   : > { %v16026_v11 = vand.u32 4294901760, %v16025_v9 }
 0x7f3   : > { %19008 = vmatpush3.bf16.msra.mxu0 %v21236_v1  ;;  %v16027_v17 = vsub.f32 %v16025_v9, %v16026_v11 }
 0x7f4   : > { %19010 = vmatprep.subr.bf16.mxu0 %v21198_v30 }
 0x7f5   : > { %v16028_v21 = vand.u32 4294901760, %v16027_v17 }
 0x7f6   : > { %18554 = vmatmul.mubr.f32.vlgmr.msra.gmra.mrb[74].mxu0 %v15410_v14 }
 0x7f7   : > { %19012 = vmatpush3.bf16.msra.mxu0 %v21198_v30  ;;  %18564 = vmatprep.mubr.f32.mxu0 %v21225_v16  ;;  %v15866_v30 = vld [vmem:[%s21437_s7 + $0x28] sm:$0xff]  ;;  %v15900_v16 = vand.u32 4294901760, %v15867_v49 }
 0x7f8   : > { %19014 = vmatprep.subr.bf16.mxu0 %v21200_v45  ;;  %v15897_v34 = vand.u32 4294901760, %v15866_v30 }
 0x7f9   : > { %v16018_v7 = vsub.f32 %v15867_v49, %v15900_v16  ;;  %v21328_v31 = vpack.c.bf16 %v15903_v57, %v15900_v16 }
 0x7fa   : > { %v16011_v42 = vsub.f32 %v15866_v30, %v15897_v34  ;;  %v21326_v50 = vpack.c.bf16 %v15897_v34, %v15894_v2  ;;  %v19081_v30 = vpack.c.bf16 %v15984_v38, %v15977_v37 }
 0x7fb   : > { %19016 = vmatpush3.bf16.msra.mxu0 %v21200_v45  ;;  %v16004_v45 = vsub.f32 %v15865_v32, %v15894_v2  ;;  %v16019_v61 = vand.u32 4294901760, %v16018_v7  ;;  %v19061_v19 = vpack.c.bf16 %v16025_v9, %v16018_v7  ;;  %v19085_v2 = vpack.c.bf16 %v15998_v39, %v15991_v62 }
 0x7fc   : > { %19018 = vmatprep.subr.bf16.mxu0 %v21250_v29  ;;  %v16012_v55 = vand.u32 4294901760, %v16011_v42 }
 0x7fd   : > { %v16005_v54 = vand.u32 4294901760, %v16004_v45  ;;  %v16020_v13 = vsub.f32 %v16018_v7, %v16019_v61  ;;  %v19057_v8 = vpack.c.bf16 %v16011_v42, %v16004_v45  ;;  %v19093_v41 = vpack.c.bf16 %v16026_v11, %v16019_v61 }
 0x7fe   : > { %18565 = vmatmul.mubr.f32.vlgmr.msra.gmra.mrb[74].mxu0 %v15410_v14  ;;  %v16013_v60 = vsub.f32 %v16011_v42, %v16012_v55 }
 0x7ff   : > { %19020 = vmatpush3.bf16.msra.mxu0 %v21250_v29  ;;  %v16006_v15 = vsub.f32 %v16004_v45, %v16005_v54  ;;  %v16021_v18 = vand.u32 4294901760, %v16020_v13  ;;  %v19089_v20 = vpack.c.bf16 %v16012_v55, %v16005_v54 }
 0x800   : > { %19022 = vmatprep.subr.bf16.mxu0 %v21258_v23  ;;  %v16014_v10 = vand.u32 4294901760, %v16013_v60 }
 0x801   : > { %v16007_v1 = vand.u32 4294901760, %v16006_v15  ;;  %v19045_v24 = vpack.c.bf16 %v16028_v21, %v16021_v18 }
 0x803   : > { %19024 = vmatpush3.bf16.msra.mxu0 %v21258_v23  ;;  %v19041_v12 = vpack.c.bf16 %v16014_v10, %v16007_v1 }
 0x804   : > { %19026 = vmatprep.subr.bf16.mxu0 %v21326_v50 }
 0x805   : > { %19042 = vmatprep.subr.bf16.mxu1 %v19041_v12 }
 0x806   : > { %19044 = vmatpush3.bf16.msra.mxu1 %v19041_v12 }
 0x807   : > { %19046 = vmatprep.subr.bf16.mxu1 %v19045_v24  ;;  %19028 = vmatpush3.bf16.msra.mxu0 %v21326_v50 }
 0x808   : > { %19030 = vmatprep.subr.bf16.mxu0 %v21328_v31 }
 0x80a   : > { %19048 = vmatpush3.bf16.msra.mxu1 %v19045_v24 }
 0x80b   : > { %19050 = vmatprep.subr.bf16.mxu1 %v19049_v25  ;;  %19032 = vmatpush3.bf16.msra.mxu0 %v21328_v31 }
 0x8d1   : > { %v18566_v28 = vpop.f32.mrb[74].mxu0 }
 0x8d2   : > { %v19122_v22 = vadd.f32 %v18566_v28, %v16619_v26  ;;  %v15849_v56 = vpop.f32.mrb[75].mxu0 }
 0x8d3   : > { %v19123_v47 = vadd.f32 %v16619_v26, %v15849_v56  ;;  %v16622_v26 = vld [vmem:[%s21438_s8 + $0x5] ss:$0 sm:$0xff] }
 0x8d4   : > { %v15860_v48 = vmax.f32 %v19122_v22, 0.0 }
 0x8d5   : > { %v15859_v58 = vmax.f32 %v19123_v47, 0.0 }
 0x8d6   : > { %v15879_v59 = vsel %vm15874_vm11, %v15860_v48, 0 }
 0x8d7   : > { %v15964_v63 = vand.u32 4294901760, %v15879_v59  ;;  %v15876_v0 = vsel %vm15874_vm11, %v15859_v58, 0 }
 0x8d8   : > { %v15954_v4 = vand.u32 4294901760, %v15876_v0 }
 0x8d9   : > { %v15965_v5 = vsub.f32 %v15879_v59, %v15964_v63 }
 0x8da   : > { %18602 = vmatprep.mubr.f32.mxu1 %v15954_v4  ;;  %v15955_v6 = vsub.f32 %v15876_v0, %v15954_v4 }
 0x8db   : > { %v15966_v14 = vand.u32 4294901760, %v15965_v5  ;;  %18603 = vmatmul.mubr.f32.vlgmr.msra.gmra.mrb[72].mxu1 %v15964_v63 }
 0x8dc   : > { %19052 = vmatpush3.bf16.msra.mxu1 %v19049_v25  ;;  %18621 = vmatprep.mubr.f32.mxu1 %v15955_v6  ;;  %v15956_v52 = vand.u32 4294901760, %v15955_v6 }
 0x8dd   : > { %19054 = vmatprep.subr.bf16.mxu1 %v19053_v3  ;;  %v15967_v44 = vsub.f32 %v15965_v5, %v15966_v14 }
 0x8de   : > { %v15957_v46 = vsub.f32 %v15955_v6, %v15956_v52 }
 0x8df   : > { %v15968_v32 = vand.u32 4294901760, %v15967_v44 }
 0x8e0   : > { %19056 = vmatpush3.bf16.msra.mxu1 %v19053_v3  ;;  %v15958_v51 = vand.u32 4294901760, %v15957_v46 }
 0x8e1   : > { %19058 = vmatprep.subr.bf16.mxu1 %v19057_v8 }
 0x8e2   : > { %18583 = vmatprep.mubr.f32.mxu0 %v15958_v51 }
 0x8e3   : > { %18584 = vmatmul.mubr.f32.vlgmr.msra.gmra.mrb[76].mxu0 %v15968_v32 }
 0x8e4   : > { %19060 = vmatpush3.bf16.msra.mxu1 %v19057_v8 }
 0x8e5   : > { %19062 = vmatprep.subr.bf16.mxu1 %v19061_v19 }
 0x8e8   : > { %19064 = vmatpush3.bf16.msra.mxu1 %v19061_v19  ;;  %v16621_v19 = vld [vmem:[%s21438_s8 + $0x4] ss:$0 sm:$0xff] }
 0x8e9   : > { %19066 = vmatprep.subr.bf16.mxu1 %v21250_v29 }
 0x8eb   : > { %18622 = vmatmul.mubr.f32.vlgmr.msra.gmra.mrb[72].mxu1 %v15965_v5 }
 0x8ec   : > { %19068 = vmatpush3.bf16.msra.mxu1 %v21250_v29  ;;  %18640 = vmatprep.mubr.f32.mxu1 %v15956_v52 }
 0x8ed   : > { %19070 = vmatprep.subr.bf16.mxu1 %v21258_v23 }
 0x8f0   : > { %19072 = vmatpush3.bf16.msra.mxu1 %v21258_v23 }
 0x8f1   : > { %19074 = vmatprep.subr.bf16.mxu1 %v21326_v50 }
 0x8f4   : > { %19076 = vmatpush3.bf16.msra.mxu1 %v21326_v50 }
 0x8f5   : > { %19078 = vmatprep.subr.bf16.mxu1 %v21328_v31 }
 0x8f8   : > { %19080 = vmatpush3.bf16.msra.mxu1 %v21328_v31 }
 0x8f9   : > { %19082 = vmatprep.subr.bf16.mxu1 %v19081_v30 }
 0x8fb   : > { %18641 = vmatmul.mubr.f32.vlgmr.msra.gmra.mrb[72].mxu1 %v15966_v14 }
 0x8fc   : > { %19084 = vmatpush3.bf16.msra.mxu1 %v19081_v30  ;;  %18659 = vmatprep.mubr.f32.mxu1 %v15954_v4 }
 0x8fd   : > { %19086 = vmatprep.subr.bf16.mxu1 %v19085_v2 }
 0x900   : > { %19088 = vmatpush3.bf16.msra.mxu1 %v19085_v2 }
 0x901   : > { %19090 = vmatprep.subr.bf16.mxu1 %v19089_v20 }
 0x904   : > { %19092 = vmatpush3.bf16.msra.mxu1 %v19089_v20 }
 0x905   : > { %19094 = vmatprep.subr.bf16.mxu1 %v19093_v41 }
 0x908   : > { %19096 = vmatpush3.bf16.msra.mxu1 %v19093_v41 }
 0x909   : > { %19098 = vmatprep.subr.bf16.mxu1 %v21250_v29 }
 0x90b   : > { %18660 = vmatmul.mubr.f32.vlgmr.msra.gmra.mrb[72].mxu1 %v15964_v63 }
 0x90c   : > { %19100 = vmatpush3.bf16.msra.mxu1 %v21250_v29  ;;  %18678 = vmatprep.mubr.f32.mxu1 %v15954_v4  ;;  %v16620_v29 = vld [vmem:[%s21438_s8 + $0x3] ss:$0 sm:$0xff] }
 0x90d   : > { %19102 = vmatprep.subr.bf16.mxu1 %v21258_v23 }
 0x910   : > { %19104 = vmatpush3.bf16.msra.mxu1 %v21258_v23 }
 0x911   : > { %19106 = vmatprep.subr.bf16.mxu1 %v21326_v50 }
 0x914   : > { %19108 = vmatpush3.bf16.msra.mxu1 %v21326_v50 }
 0x915   : > { %19110 = vmatprep.subr.bf16.mxu1 %v21328_v31 }
 0x918   : > { %19112 = vmatpush3.bf16.msra.mxu1 %v21328_v31 }
 0x91b   : > { %18679 = vmatmul.mubr.f32.vlgmr.msra.gmra.mrb[72].mxu1 %v15964_v63 }
 0x9b6   : > { %v18585_v43 = vpop.f32.mrb[76].mxu0 }
 0x9b7   : > { %v15960_v33 = vpop.f32.mrb[77].mxu0  ;;  %v15971_v35 = vadd.f32 %v18585_v43, %v16620_v29 }
 0x9b8   : > { %v15961_v36 = vadd.f32 %v16620_v29, %v15960_v33 }
 0x9ee   : > { %v18680_v37 = vpop.f32.mrb[72].mxu1 }
 0x9ef   : > { %v19125_v38 = vadd.f32 %v18680_v37, %v15971_v35  ;;  %v16451_v23 = vpop.f32.mrb[73].mxu1 }
 0x9f0   : > { %v19127_v62 = vadd.f32 %v16451_v23, %v15961_v36 }
 0x9f1   : > { %v16462_v45 = vadd.f32 %v19125_v38, %v21279_v27 }
 0x9f2   : > { %v16461_v39 = vadd.f32 %v19127_v62, %v21219_v53 }
 0x9f3   : > { %v16468_v42 = vsel %vm399_vm1, %v16462_v45, 0.0 }
 0x9f4   : > { %v16465_v34 = vsel %vm399_vm1, %v16461_v39, 0.0 }
 0x9f5   : > { %16466 = vadd.xlane.f32.xlu1 %v16465_v34 }
 0x9f9   : > { %16469 = vadd.xlane.f32.xlu1 %v16468_v42 }
 0xa82   : > { %v16467_v49 = vpop.xlane.xlu1 %16466 }
 0xa83   : > { %v16471_v40 = vmul.f32 0.03125, %v16467_v49 }
 0xa85   : > { %v16473_v54 = vsub.f32 %v16461_v39, %v16471_v40 }
 0xa86   : > { %v16470_v55 = vpop.xlane.xlu1 %16469 }
 0xa87   : > { %v16472_v16 = vmul.f32 0.03125, %v16470_v55  ;;  %v16475_v57 = vmul.f32 %v16473_v54, %v16473_v54  ;;  %v16503_v20 = vmul.f32 %v16621_v19, %v16473_v54 }
 0xa89   : > { %v16474_v15 = vsub.f32 %v16462_v45, %v16472_v16  ;;  %v16477_v60 = vsel %vm399_vm1, %v16475_v57, 0.0 }
 0xa8a   : > { %16478 = vadd.xlane.f32.xlu1 %v16477_v60 }
 0xa8b   : > { %v16476_v7 = vmul.f32 %v16474_v15, %v16474_v15  ;;  %v16504_v22 = vmul.f32 %v16621_v19, %v16474_v15 }
 0xa8d   : > { %v16480_v53 = vsel %vm399_vm1, %v16476_v7, 0.0 }
 0xa8e   : > { %16481 = vadd.xlane.f32.xlu0 %v16480_v53 }
 0xb17   : > { %v16479_v9 = vpop.xlane.xlu1 %16478 }
 0xb18   : > { %v16483_v27 = vmul.f32 0.032258064, %v16479_v9 }
 0xb1a   : > { %19471 = vrsqrt.f32 %v16483_v27  ;;  %vm16487_vm12 = vcmp.eq.f32.partialorder %v16483_v27, inf  ;;  %v16490_v12 = vand.u32 2147483648, %v16483_v27  ;;  %vm16489_vm13 = vcmp.eq.f32.partialorder %v16483_v27, 0.0 }
 0xb1b   : > { %v16482_v1 = vpop.xlane.xlu0 %16481 }
 0xb1c   : > { %v16484_v10 = vmul.f32 0.032258064, %v16482_v1 }
 0xb1e   : > { %19473 = vrsqrt.f32 %v16484_v10  ;;  %vm16494_vm14 = vcmp.eq.f32.partialorder %v16484_v10, inf  ;;  %v16497_v25 = vand.u32 2147483648, %v16484_v10  ;;  %vm16496_vm15 = vcmp.eq.f32.partialorder %v16484_v10, 0.0 }
 0xb24   : > { %v19472_v61 = vpop.eup %19471 }
 0xb25   : > { %v16486_v11 = vmul.f32 %v19472_v61, %v16483_v27 }
 0xb27   : > { %v16488_v13 = vsel %vm16487_vm12, %v16483_v27, %v16486_v11 }
 0xb28   : > { %v19474_v17 = vpop.eup %19473  ;;  %v16491_v18 = vsel %vm16489_vm13, %v16490_v12, %v16488_v13 }
 0xb29   : > { %v16505_v21 = vadd.f32 1e-06, %v16491_v18  ;;  %v16493_v24 = vmul.f32 %v19474_v17, %v16484_v10 }
 0xb2b   : > { %19475 = vrcp.f32 %v16505_v21  ;;  %v16495_v50 = vsel %vm16494_vm14, %v16484_v10, %v16493_v24 }
 0xb2c   : > { %v16498_v31 = vsel %vm16496_vm15, %v16497_v25, %v16495_v50 }
 0xb2d   : > { %v16506_v8 = vadd.f32 1e-06, %v16498_v31 }
 0xb2f   : > { %19477 = vrcp.f32 %v16506_v8 }
 0xb35   : > { %v19476_v41 = vpop.eup %19475 }
 0xb36   : > { %v16508_v28 = vmul.f32 %v19476_v41, %v16503_v20 }
 0xb38   : > { %v16515_v56 = vadd.f32 %v16622_v26, %v16508_v28 }
 0xb39   : > { %v19478_v47 = vpop.eup %19477 }
 0xb3a   : > { %v16510_v48 = vmul.f32 %v19478_v47, %v16504_v22  ;;  %16517 = vst.msk [vmem:[%s340_s28] sm:$0xff] %vm399_vm1, %v16515_v56 }
 0xb3c   : > { %v16516_v58 = vadd.f32 %v16622_v26, %v16510_v48 }
 0xb3e   : > { %16518 = vst.msk [vmem:[%s340_s28 + $0x8] sm:$0xff] %vm399_vm1, %v16516_v58 }
 0xb3f   : > { %19494 = shalt.err (!%p19491_p3)
}
 0xb40   : > { %s19495_s24 = scalar_lea.hbm %s21384_s21, 256  ;;  %s19499_s28 = scalar_lea.hbm %s21439_s9, 512 }
 0xb41   : > { %p19496_p4 = scmp.ne.s32.totalorder %s21384_s21, %s19495_s24  ;;  %p19500_p9 = scmp.lt.u32.totalorder %s21384_s21, %s21439_s9 }
 0xb42   : > { %p19501_p10 = scmp.lt.u32.totalorder %s19499_s28, %s19495_s24  ;;  %p19503_p12 = scmp.lt.u32.totalorder %s19495_s24, %s21384_s21 }
 0xb43   : > { %p19497_p7 = pnand %p19496_p4, %p19642_p5 }
 0xb44   : > { %p19502_p11 = por %p19501_p10, %p19500_p9 }
 0xb45   : > { %p19498_p8 = pneg %p19497_p7 }
 0xb46   : > { %p19504_p13 = por %p19503_p12, %p19502_p11 }
 0xb48   : > { %p19505_p0 = pnand %p19504_p13, %p19498_p8 }
 0xb4a   : > { %19508 = shalt.err (!%p19505_p0)
}
 0xb4b   : > { %s19552_s22 = smov 128   ;;  %s19553_s23 = smov 8  }
 0xb4c   : > { %19384 = dma.vmem_to_hbm [thread:$0]  (%p19642_p5), %s21386_s14, 256, %s21384_s21, %s21389_s13, %s19552_s22, %s19552_s22, %s19553_s23  }
 0xb4d PF: > { %p19390_p1 = scmp.ge.s32.totalorder %s19543_s12, 2  ;;  %s16548_s26 = sand.u32 1, %s19531_s30  }
 0xb4e   : > { %s16549_s29 = scalar_lea.sflag [#allocation3], %s16548_s26 }
 0xb4f   : > { %p19387_p2 = pnand %p19390_p1, %p19646_p6 }
 0xb51   : > { %19526 = dma.done.wait (!%p19387_p2), %s16549_s29, 256  }
 0xb52   : > { %19528 = vsyncadd (!%p19387_p2), %s16549_s29, 4294967040  ;;  %p19_p3 = scmp.ge.s32.totalorder %s19629_s15, 4   ;;  %s21442_s30 = smov %s19535_s10 }
 0xb53   : > { %s21443_s10 = smov %s19539_s11  ;;  %s21444_s11 = smov %s19640_s18 }
 0xb54   : > { %s21445_s12 = smov %s19629_s15  ;;  %21 = sbr.rel (!%p19_p3) target bundleno = 3 (0x3), region = 94 }
 0xb5b   :  { %16554 = vsyncpa [#allocation3], 1 }
 0xb5c   :  { %16556 = vsyncpa [#allocation3 + $0x1], 1 }

</bundles_post_ra>
